<compile_context>
chip_gen: v5e
topology: v5e:2x2
jax: 0.10.0
libtpu: 0.0.40
codegen_flags: <defaults>
</compile_context>

<pallas_src>
import functools

import jax
import jax.numpy as jnp
from jax import lax
from jax.experimental import pallas as pl
from jax.experimental.pallas import tpu as pltpu

COEFF = 0.97          # Lipschitz coefficient of the InducedNorm layers
N_POWER_ITERS = 10    # max_eval_lipschitz_iters for this synthetic instance
_EPS = 1e-12
# TODO(synk): atol/rtol-based early termination of the power iteration
# (lipschitz_tolerance) is not implemented; a fixed iteration count is used.


def _dot_t(a, w):
    """a @ w.T without materializing a transpose (contract on w's last axis)."""
    return lax.dot_general(a, w, (((1,), (1,)), ((), ())),
                           preferred_element_type=jnp.float32)


def _normalize(x):
    """L2-normalize via rsqrt-and-multiply (EUP rsqrt + VPU mul, no divide)."""
    n2 = jnp.sum(x * x)
    return x * lax.rsqrt(jnp.maximum(n2, _EPS * _EPS))


# --------------------------------------------------------------------------
# Fused kernel: power iteration for all three layers + Lipschitz scales
# + spectrally-normalized MLP forward, all in VMEM, one launch.
# --------------------------------------------------------------------------
def _fused_kernel(x_ref,
                  w1_ref, b1_ref, w2_ref, b2_ref, w3_ref, b3_ref,
                  u1_ref, v1_ref, u2_ref, v2_ref, u3_ref, v3_ref,
                  out_ref,
                  u1_out, v1_out, u2_out, v2_out, u3_out, v3_out,
                  *, n_iters):
    # weights in PyTorch (out, in) layout, f32
    w1 = w1_ref[...].astype(jnp.float32)
    w2 = w2_ref[...].astype(jnp.float32)
    w3 = w3_ref[...].astype(jnp.float32)

    carry0 = (u1_ref[...].astype(jnp.float32), v1_ref[...].astype(jnp.float32),
              u2_ref[...].astype(jnp.float32), v2_ref[...].astype(jnp.float32),
              u3_ref[...].astype(jnp.float32), v3_ref[...].astype(jnp.float32))

    def body(_, carry):
        u1, v1, u2, v2, u3, v3 = carry
        # v <- normalize(W^T u) for all three (independent) layers: 3-way ILP
        v1 = _normalize(jnp.dot(u1, w1, preferred_element_type=jnp.float32))
        v2 = _normalize(jnp.dot(u2, w2, preferred_element_type=jnp.float32))
        v3 = _normalize(jnp.dot(u3, w3, preferred_element_type=jnp.float32))
        # u <- normalize(W v): contract on w's second axis, no transpose in loop
        u1 = _normalize(_dot_t(v1, w1))
        u2 = _normalize(_dot_t(v2, w2))
        u3 = _normalize(_dot_t(v3, w3))
        return (u1, v1, u2, v2, u3, v3)

    u1, v1, u2, v2, u3, v3 = lax.fori_loop(0, n_iters, body, carry0, unroll=True)

    # sigma = u^T W v per layer, then scale = 1 / max(1, sigma / coeff)
    sigma1 = jnp.sum(u1 * _dot_t(v1, w1))
    sigma2 = jnp.sum(u2 * _dot_t(v2, w2))
    sigma3 = jnp.sum(u3 * _dot_t(v3, w3))
    one = jnp.float32(1.0)
    s1 = one / jnp.maximum(one, sigma1 / COEFF)
    s2 = one / jnp.maximum(one, sigma2 / COEFF)
    s3 = one / jnp.maximum(one, sigma3 / COEFF)

    # forward pass: y = s * (h @ W^T) + b  (scale the (B,out) result, not the weight)
    x = x_ref[...].astype(jnp.float32)
    h = _dot_t(x, w1) * s1 + b1_ref[...].astype(jnp.float32)
    h = h * jax.nn.sigmoid(h)                       # Swish / SiLU
    h = _dot_t(h, w2) * s2 + b2_ref[...].astype(jnp.float32)
    h = h * jax.nn.sigmoid(h)
    h = _dot_t(h, w3) * s3 + b3_ref[...].astype(jnp.float32)

    out_ref[...] = h.astype(out_ref.dtype)
    u1_out[...] = u1
    v1_out[...] = v1
    u2_out[...] = u2
    v2_out[...] = v2
    u3_out[...] = u3
    v3_out[...] = v3


# --------------------------------------------------------------------------
# LipschitzNetwork wrapper: pre-hook power iteration + forward, single launch.
# --------------------------------------------------------------------------
def lipschitz_network_forward(x, params, uv_state, n_iters=N_POWER_ITERS):
    """Mirrors LipschitzNetwork.forward with the _update_lipschitz pre-hook."""
    (w1, b1), (w2, b2), (w3, b3) = params
    (u1, v1), (u2, v2), (u3, v3) = uv_state
    batch = x.shape[0]
    d_out = w3.shape[0]

    vmem = pl.BlockSpec(memory_space=pltpu.MemorySpace.VMEM)
    kernel = functools.partial(_fused_kernel, n_iters=n_iters)

    out_shape = (
        jax.ShapeDtypeStruct((batch, d_out), x.dtype),
        jax.ShapeDtypeStruct(u1.shape, jnp.float32),
        jax.ShapeDtypeStruct(v1.shape, jnp.float32),
        jax.ShapeDtypeStruct(u2.shape, jnp.float32),
        jax.ShapeDtypeStruct(v2.shape, jnp.float32),
        jax.ShapeDtypeStruct(u3.shape, jnp.float32),
        jax.ShapeDtypeStruct(v3.shape, jnp.float32),
    )

    # TODO(synk): for large deployment batches, add a batch grid axis
    # (dimension_semantics=("parallel",)) with a big row tile so the MXU is fed
    # and v7x's second TensorCore is used; at batch=8 a single block is optimal.
    outs = pl.pallas_call(
        kernel,
        out_shape=out_shape,
        in_specs=[vmem] * 13,
        out_specs=(vmem,) * 7,
    )(x,
      w1, b1.reshape(1, -1),
      w2, b2.reshape(1, -1),
      w3, b3.reshape(1, -1),
      u1, v1, u2, v2, u3, v3)

    out = outs[0]
    new_uv = [(outs[1], outs[2]), (outs[3], outs[4]), (outs[5], outs[6])]
    return out, new_uv


# --------------------------------------------------------------------------
# Pure-JAX reference (same math) for a correctness check.
# --------------------------------------------------------------------------
def _reference_forward(x, params, uv_state, n_iters=N_POWER_ITERS):
    scales = []
    new_uv = []
    for (w, _), (u, v) in zip(params, uv_state):
        for _ in range(n_iters):
            v = _normalize(jnp.dot(u, w))
            u = _normalize(jnp.dot(v, w.T))
        sigma = jnp.sum(u * jnp.dot(v, w.T))
        scales.append(1.0 / jnp.maximum(jnp.float32(1.0), sigma / COEFF))
        new_uv.append((u, v))
    h = x.astype(jnp.float32)
    for i, ((w, b), s) in enumerate(zip(params, scales)):
        h = jnp.dot(h, w.T) * s + b
        if i < len(params) - 1:
            h = h * jax.nn.sigmoid(h)
    return h, new_uv


# --------------------------------------------------------------------------
if __name__ == "__main__":
    key = jax.random.PRNGKey(0)
    batch, d_in, hidden, d_out = 8, 32, 64, 32

    def _normed(k, n):
        v = jax.random.normal(k, (1, n), jnp.float32)
        return v / jnp.maximum(jnp.linalg.norm(v), 1e-12)

    keys = jax.random.split(key, 16)
    dims = [(hidden, d_in), (hidden, hidden), (d_out, hidden)]
    params = []
    uv_state = []
    for i, (o, ii) in enumerate(dims):
        w = jax.random.normal(keys[3 * i + 0], (o, ii), jnp.float32) * 0.1
        b = jax.random.normal(keys[3 * i + 1], (o,), jnp.float32) * 0.01
        params.append((w, b))
        ku, kv = jax.random.split(keys[3 * i + 2])
        uv_state.append((_normed(ku, o), _normed(kv, ii)))

    x = jax.random.normal(keys[15], (batch, d_in), jnp.float32)

    out, new_uv = lipschitz_network_forward(x, params, uv_state)
    out = jax.block_until_ready(out)

    # sanity: finite output of the expected shape, matches pure-JAX reference
    assert out.shape == (batch, d_out)
    assert bool(jnp.all(jnp.isfinite(out)))
    ref_out, _ = _reference_forward(x, params, uv_state)
    assert bool(jnp.allclose(out, ref_out, atol=2e-2, rtol=2e-2))

    print("KERNEL_OK")
</pallas_src>

<mosaic_0001>
module attributes {stable_mosaic.version = 11 : i64} {
  func.func @_fused_kernel(%arg0: memref<8x32xf32, #tpu.memory_space<vmem>>, %arg1: memref<64x32xf32, #tpu.memory_space<vmem>>, %arg2: memref<1x64xf32, #tpu.memory_space<vmem>>, %arg3: memref<64x64xf32, #tpu.memory_space<vmem>>, %arg4: memref<1x64xf32, #tpu.memory_space<vmem>>, %arg5: memref<32x64xf32, #tpu.memory_space<vmem>>, %arg6: memref<1x32xf32, #tpu.memory_space<vmem>>, %arg7: memref<1x64xf32, #tpu.memory_space<vmem>>, %arg8: memref<1x32xf32, #tpu.memory_space<vmem>>, %arg9: memref<1x64xf32, #tpu.memory_space<vmem>>, %arg10: memref<1x64xf32, #tpu.memory_space<vmem>>, %arg11: memref<1x32xf32, #tpu.memory_space<vmem>>, %arg12: memref<1x64xf32, #tpu.memory_space<vmem>>, %arg13: memref<8x32xf32, #tpu.memory_space<vmem>>, %arg14: memref<1x64xf32, #tpu.memory_space<vmem>>, %arg15: memref<1x32xf32, #tpu.memory_space<vmem>>, %arg16: memref<1x64xf32, #tpu.memory_space<vmem>>, %arg17: memref<1x64xf32, #tpu.memory_space<vmem>>, %arg18: memref<1x32xf32, #tpu.memory_space<vmem>>, %arg19: memref<1x64xf32, #tpu.memory_space<vmem>>) attributes {dimension_semantics = [], scalar_prefetch = 0 : i64, scratch_operands = 0 : i64, tpu.core_type = #tpu.core_type<tc>} {
    %c0 = arith.constant 0 : index
    %c0_0 = arith.constant 0 : index
    %0 = vector.load %arg1[%c0, %c0_0] : memref<64x32xf32, #tpu.memory_space<vmem>>, vector<64x32xf32>
    %c0_1 = arith.constant 0 : index
    %c0_2 = arith.constant 0 : index
    %1 = vector.load %arg3[%c0_1, %c0_2] : memref<64x64xf32, #tpu.memory_space<vmem>>, vector<64x64xf32>
    %c0_3 = arith.constant 0 : index
    %c0_4 = arith.constant 0 : index
    %2 = vector.load %arg5[%c0_3, %c0_4] : memref<32x64xf32, #tpu.memory_space<vmem>>, vector<32x64xf32>
    %c0_5 = arith.constant 0 : index
    %c0_6 = arith.constant 0 : index
    %3 = vector.load %arg7[%c0_5, %c0_6] : memref<1x64xf32, #tpu.memory_space<vmem>>, vector<1x64xf32>
    %c0_7 = arith.constant 0 : index
    %c0_8 = arith.constant 0 : index
    %4 = vector.load %arg8[%c0_7, %c0_8] : memref<1x32xf32, #tpu.memory_space<vmem>>, vector<1x32xf32>
    %c0_9 = arith.constant 0 : index
    %c0_10 = arith.constant 0 : index
    %5 = vector.load %arg9[%c0_9, %c0_10] : memref<1x64xf32, #tpu.memory_space<vmem>>, vector<1x64xf32>
    %c0_11 = arith.constant 0 : index
    %c0_12 = arith.constant 0 : index
    %6 = vector.load %arg10[%c0_11, %c0_12] : memref<1x64xf32, #tpu.memory_space<vmem>>, vector<1x64xf32>
    %c0_13 = arith.constant 0 : index
    %c0_14 = arith.constant 0 : index
    %7 = vector.load %arg11[%c0_13, %c0_14] : memref<1x32xf32, #tpu.memory_space<vmem>>, vector<1x32xf32>
    %c0_15 = arith.constant 0 : index
    %c0_16 = arith.constant 0 : index
    %8 = vector.load %arg12[%c0_15, %c0_16] : memref<1x64xf32, #tpu.memory_space<vmem>>, vector<1x64xf32>
    %c0_i32 = arith.constant 0 : i32
    %cst = arith.constant dense<0.000000e+00> : vector<1x32xf32>
    %9 = tpu.matmul %3, %0, %cst {dimension_numbers = #tpu.dot_dimension_numbers<[1], [0], [0], [1], [0, 0, 1, 1], [], []>} : vector<1x64xf32>, vector<64x32xf32>, vector<1x32xf32> -> vector<1x32xf32>
    %10 = arith.mulf %9, %9 : vector<1x32xf32>
    %11 = vector.shape_cast %10 : vector<1x32xf32> to vector<1x1x32xf32>
    %cst_17 = arith.constant dense<0.000000e+00> : vector<1xf32>
    %12 = vector.multi_reduction <add>, %11, %cst_17 [1, 2] : vector<1x1x32xf32> to vector<1xf32>
    %13 = vector.shape_cast %12 : vector<1xf32> to vector<1x1x1xf32>
    %14 = vector.extract %13[0, 0, 0] : f32 from vector<1x1x1xf32>
    %cst_18 = arith.constant 1.000000e-24 : f32
    %15 = arith.maximumf %14, %cst_18 : f32
    %16 = math.rsqrt %15 : f32
    %17 = vector.broadcast %16 : f32 to vector<1x32xf32>
    %18 = arith.mulf %9, %17 : vector<1x32xf32>
    %cst_19 = arith.constant dense<0.000000e+00> : vector<1x64xf32>
    %19 = tpu.matmul %5, %1, %cst_19 {dimension_numbers = #tpu.dot_dimension_numbers<[1], [0], [0], [1], [0, 0, 1, 1], [], []>} : vector<1x64xf32>, vector<64x64xf32>, vector<1x64xf32> -> vector<1x64xf32>
    %20 = arith.mulf %19, %19 : vector<1x64xf32>
    %21 = vector.shape_cast %20 : vector<1x64xf32> to vector<1x1x64xf32>
    %cst_20 = arith.constant dense<0.000000e+00> : vector<1xf32>
    %22 = vector.multi_reduction <add>, %21, %cst_20 [1, 2] : vector<1x1x64xf32> to vector<1xf32>
    %23 = vector.shape_cast %22 : vector<1xf32> to vector<1x1x1xf32>
    %24 = vector.extract %23[0, 0, 0] : f32 from vector<1x1x1xf32>
    %cst_21 = arith.constant 1.000000e-24 : f32
    %25 = arith.maximumf %24, %cst_21 : f32
    %26 = math.rsqrt %25 : f32
    %27 = vector.broadcast %26 : f32 to vector<1x64xf32>
    %28 = arith.mulf %19, %27 : vector<1x64xf32>
    %cst_22 = arith.constant dense<0.000000e+00> : vector<1x64xf32>
    %29 = tpu.matmul %7, %2, %cst_22 {dimension_numbers = #tpu.dot_dimension_numbers<[1], [0], [0], [1], [0, 0, 1, 1], [], []>} : vector<1x32xf32>, vector<32x64xf32>, vector<1x64xf32> -> vector<1x64xf32>
    %30 = arith.mulf %29, %29 : vector<1x64xf32>
    %31 = vector.shape_cast %30 : vector<1x64xf32> to vector<1x1x64xf32>
    %cst_23 = arith.constant dense<0.000000e+00> : vector<1xf32>
    %32 = vector.multi_reduction <add>, %31, %cst_23 [1, 2] : vector<1x1x64xf32> to vector<1xf32>
    %33 = vector.shape_cast %32 : vector<1xf32> to vector<1x1x1xf32>
    %34 = vector.extract %33[0, 0, 0] : f32 from vector<1x1x1xf32>
    %cst_24 = arith.constant 1.000000e-24 : f32
    %35 = arith.maximumf %34, %cst_24 : f32
    %36 = math.rsqrt %35 : f32
    %37 = vector.broadcast %36 : f32 to vector<1x64xf32>
    %38 = arith.mulf %29, %37 : vector<1x64xf32>
    %cst_25 = arith.constant dense<0.000000e+00> : vector<1x64xf32>
    %39 = tpu.matmul %18, %0, %cst_25 {dimension_numbers = #tpu.dot_dimension_numbers<[1], [1], [0], [0], [0, 0, 1, 0], [], []>} : vector<1x32xf32>, vector<64x32xf32>, vector<1x64xf32> -> vector<1x64xf32>
    %40 = arith.mulf %39, %39 : vector<1x64xf32>
    %41 = vector.shape_cast %40 : vector<1x64xf32> to vector<1x1x64xf32>
    %cst_26 = arith.constant dense<0.000000e+00> : vector<1xf32>
    %42 = vector.multi_reduction <add>, %41, %cst_26 [1, 2] : vector<1x1x64xf32> to vector<1xf32>
    %43 = vector.shape_cast %42 : vector<1xf32> to vector<1x1x1xf32>
    %44 = vector.extract %43[0, 0, 0] : f32 from vector<1x1x1xf32>
    %cst_27 = arith.constant 1.000000e-24 : f32
    %45 = arith.maximumf %44, %cst_27 : f32
    %46 = math.rsqrt %45 : f32
    %47 = vector.broadcast %46 : f32 to vector<1x64xf32>
    %48 = arith.mulf %39, %47 : vector<1x64xf32>
    %cst_28 = arith.constant dense<0.000000e+00> : vector<1x64xf32>
    %49 = tpu.matmul %28, %1, %cst_28 {dimension_numbers = #tpu.dot_dimension_numbers<[1], [1], [0], [0], [0, 0, 1, 0], [], []>} : vector<1x64xf32>, vector<64x64xf32>, vector<1x64xf32> -> vector<1x64xf32>
    %50 = arith.mulf %49, %49 : vector<1x64xf32>
    %51 = vector.shape_cast %50 : vector<1x64xf32> to vector<1x1x64xf32>
    %cst_29 = arith.constant dense<0.000000e+00> : vector<1xf32>
    %52 = vector.multi_reduction <add>, %51, %cst_29 [1, 2] : vector<1x1x64xf32> to vector<1xf32>
    %53 = vector.shape_cast %52 : vector<1xf32> to vector<1x1x1xf32>
    %54 = vector.extract %53[0, 0, 0] : f32 from vector<1x1x1xf32>
    %cst_30 = arith.constant 1.000000e-24 : f32
    %55 = arith.maximumf %54, %cst_30 : f32
    %56 = math.rsqrt %55 : f32
    %57 = vector.broadcast %56 : f32 to vector<1x64xf32>
    %58 = arith.mulf %49, %57 : vector<1x64xf32>
    %cst_31 = arith.constant dense<0.000000e+00> : vector<1x32xf32>
    %59 = tpu.matmul %38, %2, %cst_31 {dimension_numbers = #tpu.dot_dimension_numbers<[1], [1], [0], [0], [0, 0, 1, 0], [], []>} : vector<1x64xf32>, vector<32x64xf32>, vector<1x32xf32> -> vector<1x32xf32>
    %60 = arith.mulf %59, %59 : vector<1x32xf32>
    %61 = vector.shape_cast %60 : vector<1x32xf32> to vector<1x1x32xf32>
    %cst_32 = arith.constant dense<0.000000e+00> : vector<1xf32>
    %62 = vector.multi_reduction <add>, %61, %cst_32 [1, 2] : vector<1x1x32xf32> to vector<1xf32>
    %63 = vector.shape_cast %62 : vector<1xf32> to vector<1x1x1xf32>
    %64 = vector.extract %63[0, 0, 0] : f32 from vector<1x1x1xf32>
    %cst_33 = arith.constant 1.000000e-24 : f32
    %65 = arith.maximumf %64, %cst_33 : f32
    %66 = math.rsqrt %65 : f32
    %67 = vector.broadcast %66 : f32 to vector<1x32xf32>
    %68 = arith.mulf %59, %67 : vector<1x32xf32>
    %c1_i32 = arith.constant 1 : i32
    %cst_34 = arith.constant dense<0.000000e+00> : vector<1x32xf32>
    %69 = tpu.matmul %48, %0, %cst_34 {dimension_numbers = #tpu.dot_dimension_numbers<[1], [0], [0], [1], [0, 0, 1, 1], [], []>} : vector<1x64xf32>, vector<64x32xf32>, vector<1x32xf32> -> vector<1x32xf32>
    %70 = arith.mulf %69, %69 : vector<1x32xf32>
    %71 = vector.shape_cast %70 : vector<1x32xf32> to vector<1x1x32xf32>
    %cst_35 = arith.constant dense<0.000000e+00> : vector<1xf32>
    %72 = vector.multi_reduction <add>, %71, %cst_35 [1, 2] : vector<1x1x32xf32> to vector<1xf32>
    %73 = vector.shape_cast %72 : vector<1xf32> to vector<1x1x1xf32>
    %74 = vector.extract %73[0, 0, 0] : f32 from vector<1x1x1xf32>
    %cst_36 = arith.constant 1.000000e-24 : f32
    %75 = arith.maximumf %74, %cst_36 : f32
    %76 = math.rsqrt %75 : f32
    %77 = vector.broadcast %76 : f32 to vector<1x32xf32>
    %78 = arith.mulf %69, %77 : vector<1x32xf32>
    %cst_37 = arith.constant dense<0.000000e+00> : vector<1x64xf32>
    %79 = tpu.matmul %58, %1, %cst_37 {dimension_numbers = #tpu.dot_dimension_numbers<[1], [0], [0], [1], [0, 0, 1, 1], [], []>} : vector<1x64xf32>, vector<64x64xf32>, vector<1x64xf32> -> vector<1x64xf32>
    %80 = arith.mulf %79, %79 : vector<1x64xf32>
    %81 = vector.shape_cast %80 : vector<1x64xf32> to vector<1x1x64xf32>
    %cst_38 = arith.constant dense<0.000000e+00> : vector<1xf32>
    %82 = vector.multi_reduction <add>, %81, %cst_38 [1, 2] : vector<1x1x64xf32> to vector<1xf32>
    %83 = vector.shape_cast %82 : vector<1xf32> to vector<1x1x1xf32>
    %84 = vector.extract %83[0, 0, 0] : f32 from vector<1x1x1xf32>
    %cst_39 = arith.constant 1.000000e-24 : f32
    %85 = arith.maximumf %84, %cst_39 : f32
    %86 = math.rsqrt %85 : f32
    %87 = vector.broadcast %86 : f32 to vector<1x64xf32>
    %88 = arith.mulf %79, %87 : vector<1x64xf32>
    %cst_40 = arith.constant dense<0.000000e+00> : vector<1x64xf32>
    %89 = tpu.matmul %68, %2, %cst_40 {dimension_numbers = #tpu.dot_dimension_numbers<[1], [0], [0], [1], [0, 0, 1, 1], [], []>} : vector<1x32xf32>, vector<32x64xf32>, vector<1x64xf32> -> vector<1x64xf32>
    %90 = arith.mulf %89, %89 : vector<1x64xf32>
    %91 = vector.shape_cast %90 : vector<1x64xf32> to vector<1x1x64xf32>
    %cst_41 = arith.constant dense<0.000000e+00> : vector<1xf32>
    %92 = vector.multi_reduction <add>, %91, %cst_41 [1, 2] : vector<1x1x64xf32> to vector<1xf32>
    %93 = vector.shape_cast %92 : vector<1xf32> to vector<1x1x1xf32>
    %94 = vector.extract %93[0, 0, 0] : f32 from vector<1x1x1xf32>
    %cst_42 = arith.constant 1.000000e-24 : f32
    %95 = arith.maximumf %94, %cst_42 : f32
    %96 = math.rsqrt %95 : f32
    %97 = vector.broadcast %96 : f32 to vector<1x64xf32>
    %98 = arith.mulf %89, %97 : vector<1x64xf32>
    %cst_43 = arith.constant dense<0.000000e+00> : vector<1x64xf32>
    %99 = tpu.matmul %78, %0, %cst_43 {dimension_numbers = #tpu.dot_dimension_numbers<[1], [1], [0], [0], [0, 0, 1, 0], [], []>} : vector<1x32xf32>, vector<64x32xf32>, vector<1x64xf32> -> vector<1x64xf32>
    %100 = arith.mulf %99, %99 : vector<1x64xf32>
    %101 = vector.shape_cast %100 : vector<1x64xf32> to vector<1x1x64xf32>
    %cst_44 = arith.constant dense<0.000000e+00> : vector<1xf32>
    %102 = vector.multi_reduction <add>, %101, %cst_44 [1, 2] : vector<1x1x64xf32> to vector<1xf32>
    %103 = vector.shape_cast %102 : vector<1xf32> to vector<1x1x1xf32>
    %104 = vector.extract %103[0, 0, 0] : f32 from vector<1x1x1xf32>
    %cst_45 = arith.constant 1.000000e-24 : f32
    %105 = arith.maximumf %104, %cst_45 : f32
    %106 = math.rsqrt %105 : f32
    %107 = vector.broadcast %106 : f32 to vector<1x64xf32>
    %108 = arith.mulf %99, %107 : vector<1x64xf32>
    %cst_46 = arith.constant dense<0.000000e+00> : vector<1x64xf32>
    %109 = tpu.matmul %88, %1, %cst_46 {dimension_numbers = #tpu.dot_dimension_numbers<[1], [1], [0], [0], [0, 0, 1, 0], [], []>} : vector<1x64xf32>, vector<64x64xf32>, vector<1x64xf32> -> vector<1x64xf32>
    %110 = arith.mulf %109, %109 : vector<1x64xf32>
    %111 = vector.shape_cast %110 : vector<1x64xf32> to vector<1x1x64xf32>
    %cst_47 = arith.constant dense<0.000000e+00> : vector<1xf32>
    %112 = vector.multi_reduction <add>, %111, %cst_47 [1, 2] : vector<1x1x64xf32> to vector<1xf32>
    %113 = vector.shape_cast %112 : vector<1xf32> to vector<1x1x1xf32>
    %114 = vector.extract %113[0, 0, 0] : f32 from vector<1x1x1xf32>
    %cst_48 = arith.constant 1.000000e-24 : f32
    %115 = arith.maximumf %114, %cst_48 : f32
    %116 = math.rsqrt %115 : f32
    %117 = vector.broadcast %116 : f32 to vector<1x64xf32>
    %118 = arith.mulf %109, %117 : vector<1x64xf32>
    %cst_49 = arith.constant dense<0.000000e+00> : vector<1x32xf32>
    %119 = tpu.matmul %98, %2, %cst_49 {dimension_numbers = #tpu.dot_dimension_numbers<[1], [1], [0], [0], [0, 0, 1, 0], [], []>} : vector<1x64xf32>, vector<32x64xf32>, vector<1x32xf32> -> vector<1x32xf32>
    %120 = arith.mulf %119, %119 : vector<1x32xf32>
    %121 = vector.shape_cast %120 : vector<1x32xf32> to vector<1x1x32xf32>
    %cst_50 = arith.constant dense<0.000000e+00> : vector<1xf32>
    %122 = vector.multi_reduction <add>, %121, %cst_50 [1, 2] : vector<1x1x32xf32> to vector<1xf32>
    %123 = vector.shape_cast %122 : vector<1xf32> to vector<1x1x1xf32>
    %124 = vector.extract %123[0, 0, 0] : f32 from vector<1x1x1xf32>
    %cst_51 = arith.constant 1.000000e-24 : f32
    %125 = arith.maximumf %124, %cst_51 : f32
    %126 = math.rsqrt %125 : f32
    %127 = vector.broadcast %126 : f32 to vector<1x32xf32>
    %128 = arith.mulf %119, %127 : vector<1x32xf32>
    %c2_i32 = arith.constant 2 : i32
    %cst_52 = arith.constant dense<0.000000e+00> : vector<1x32xf32>
    %129 = tpu.matmul %108, %0, %cst_52 {dimension_numbers = #tpu.dot_dimension_numbers<[1], [0], [0], [1], [0, 0, 1, 1], [], []>} : vector<1x64xf32>, vector<64x32xf32>, vector<1x32xf32> -> vector<1x32xf32>
    %130 = arith.mulf %129, %129 : vector<1x32xf32>
    %131 = vector.shape_cast %130 : vector<1x32xf32> to vector<1x1x32xf32>
    %cst_53 = arith.constant dense<0.000000e+00> : vector<1xf32>
    %132 = vector.multi_reduction <add>, %131, %cst_53 [1, 2] : vector<1x1x32xf32> to vector<1xf32>
    %133 = vector.shape_cast %132 : vector<1xf32> to vector<1x1x1xf32>
    %134 = vector.extract %133[0, 0, 0] : f32 from vector<1x1x1xf32>
    %cst_54 = arith.constant 1.000000e-24 : f32
    %135 = arith.maximumf %134, %cst_54 : f32
    %136 = math.rsqrt %135 : f32
    %137 = vector.broadcast %136 : f32 to vector<1x32xf32>
    %138 = arith.mulf %129, %137 : vector<1x32xf32>
    %cst_55 = arith.constant dense<0.000000e+00> : vector<1x64xf32>
    %139 = tpu.matmul %118, %1, %cst_55 {dimension_numbers = #tpu.dot_dimension_numbers<[1], [0], [0], [1], [0, 0, 1, 1], [], []>} : vector<1x64xf32>, vector<64x64xf32>, vector<1x64xf32> -> vector<1x64xf32>
    %140 = arith.mulf %139, %139 : vector<1x64xf32>
    %141 = vector.shape_cast %140 : vector<1x64xf32> to vector<1x1x64xf32>
    %cst_56 = arith.constant dense<0.000000e+00> : vector<1xf32>
    %142 = vector.multi_reduction <add>, %141, %cst_56 [1, 2] : vector<1x1x64xf32> to vector<1xf32>
    %143 = vector.shape_cast %142 : vector<1xf32> to vector<1x1x1xf32>
    %144 = vector.extract %143[0, 0, 0] : f32 from vector<1x1x1xf32>
    %cst_57 = arith.constant 1.000000e-24 : f32
    %145 = arith.maximumf %144, %cst_57 : f32
    %146 = math.rsqrt %145 : f32
    %147 = vector.broadcast %146 : f32 to vector<1x64xf32>
    %148 = arith.mulf %139, %147 : vector<1x64xf32>
    %cst_58 = arith.constant dense<0.000000e+00> : vector<1x64xf32>
    %149 = tpu.matmul %128, %2, %cst_58 {dimension_numbers = #tpu.dot_dimension_numbers<[1], [0], [0], [1], [0, 0, 1, 1], [], []>} : vector<1x32xf32>, vector<32x64xf32>, vector<1x64xf32> -> vector<1x64xf32>
    %150 = arith.mulf %149, %149 : vector<1x64xf32>
    %151 = vector.shape_cast %150 : vector<1x64xf32> to vector<1x1x64xf32>
    %cst_59 = arith.constant dense<0.000000e+00> : vector<1xf32>
    %152 = vector.multi_reduction <add>, %151, %cst_59 [1, 2] : vector<1x1x64xf32> to vector<1xf32>
    %153 = vector.shape_cast %152 : vector<1xf32> to vector<1x1x1xf32>
    %154 = vector.extract %153[0, 0, 0] : f32 from vector<1x1x1xf32>
    %cst_60 = arith.constant 1.000000e-24 : f32
    %155 = arith.maximumf %154, %cst_60 : f32
    %156 = math.rsqrt %155 : f32
    %157 = vector.broadcast %156 : f32 to vector<1x64xf32>
    %158 = arith.mulf %149, %157 : vector<1x64xf32>
    %cst_61 = arith.constant dense<0.000000e+00> : vector<1x64xf32>
    %159 = tpu.matmul %138, %0, %cst_61 {dimension_numbers = #tpu.dot_dimension_numbers<[1], [1], [0], [0], [0, 0, 1, 0], [], []>} : vector<1x32xf32>, vector<64x32xf32>, vector<1x64xf32> -> vector<1x64xf32>
    %160 = arith.mulf %159, %159 : vector<1x64xf32>
    %161 = vector.shape_cast %160 : vector<1x64xf32> to vector<1x1x64xf32>
    %cst_62 = arith.constant dense<0.000000e+00> : vector<1xf32>
    %162 = vector.multi_reduction <add>, %161, %cst_62 [1, 2] : vector<1x1x64xf32> to vector<1xf32>
    %163 = vector.shape_cast %162 : vector<1xf32> to vector<1x1x1xf32>
    %164 = vector.extract %163[0, 0, 0] : f32 from vector<1x1x1xf32>
    %cst_63 = arith.constant 1.000000e-24 : f32
    %165 = arith.maximumf %164, %cst_63 : f32
    %166 = math.rsqrt %165 : f32
    %167 = vector.broadcast %166 : f32 to vector<1x64xf32>
    %168 = arith.mulf %159, %167 : vector<1x64xf32>
    %cst_64 = arith.constant dense<0.000000e+00> : vector<1x64xf32>
    %169 = tpu.matmul %148, %1, %cst_64 {dimension_numbers = #tpu.dot_dimension_numbers<[1], [1], [0], [0], [0, 0, 1, 0], [], []>} : vector<1x64xf32>, vector<64x64xf32>, vector<1x64xf32> -> vector<1x64xf32>
    %170 = arith.mulf %169, %169 : vector<1x64xf32>
    %171 = vector.shape_cast %170 : vector<1x64xf32> to vector<1x1x64xf32>
    %cst_65 = arith.constant dense<0.000000e+00> : vector<1xf32>
    %172 = vector.multi_reduction <add>, %171, %cst_65 [1, 2] : vector<1x1x64xf32> to vector<1xf32>
    %173 = vector.shape_cast %172 : vector<1xf32> to vector<1x1x1xf32>
    %174 = vector.extract %173[0, 0, 0] : f32 from vector<1x1x1xf32>
    %cst_66 = arith.constant 1.000000e-24 : f32
    %175 = arith.maximumf %174, %cst_66 : f32
    %176 = math.rsqrt %175 : f32
    %177 = vector.broadcast %176 : f32 to vector<1x64xf32>
    %178 = arith.mulf %169, %177 : vector<1x64xf32>
    %cst_67 = arith.constant dense<0.000000e+00> : vector<1x32xf32>
    %179 = tpu.matmul %158, %2, %cst_67 {dimension_numbers = #tpu.dot_dimension_numbers<[1], [1], [0], [0], [0, 0, 1, 0], [], []>} : vector<1x64xf32>, vector<32x64xf32>, vector<1x32xf32> -> vector<1x32xf32>
    %180 = arith.mulf %179, %179 : vector<1x32xf32>
    %181 = vector.shape_cast %180 : vector<1x32xf32> to vector<1x1x32xf32>
    %cst_68 = arith.constant dense<0.000000e+00> : vector<1xf32>
    %182 = vector.multi_reduction <add>, %181, %cst_68 [1, 2] : vector<1x1x32xf32> to vector<1xf32>
    %183 = vector.shape_cast %182 : vector<1xf32> to vector<1x1x1xf32>
    %184 = vector.extract %183[0, 0, 0] : f32 from vector<1x1x1xf32>
    %cst_69 = arith.constant 1.000000e-24 : f32
    %185 = arith.maximumf %184, %cst_69 : f32
    %186 = math.rsqrt %185 : f32
    %187 = vector.broadcast %186 : f32 to vector<1x32xf32>
    %188 = arith.mulf %179, %187 : vector<1x32xf32>
    %c3_i32 = arith.constant 3 : i32
    %cst_70 = arith.constant dense<0.000000e+00> : vector<1x32xf32>
    %189 = tpu.matmul %168, %0, %cst_70 {dimension_numbers = #tpu.dot_dimension_numbers<[1], [0], [0], [1], [0, 0, 1, 1], [], []>} : vector<1x64xf32>, vector<64x32xf32>, vector<1x32xf32> -> vector<1x32xf32>
    %190 = arith.mulf %189, %189 : vector<1x32xf32>
    %191 = vector.shape_cast %190 : vector<1x32xf32> to vector<1x1x32xf32>
    %cst_71 = arith.constant dense<0.000000e+00> : vector<1xf32>
    %192 = vector.multi_reduction <add>, %191, %cst_71 [1, 2] : vector<1x1x32xf32> to vector<1xf32>
    %193 = vector.shape_cast %192 : vector<1xf32> to vector<1x1x1xf32>
    %194 = vector.extract %193[0, 0, 0] : f32 from vector<1x1x1xf32>
    %cst_72 = arith.constant 1.000000e-24 : f32
    %195 = arith.maximumf %194, %cst_72 : f32
    %196 = math.rsqrt %195 : f32
    %197 = vector.broadcast %196 : f32 to vector<1x32xf32>
    %198 = arith.mulf %189, %197 : vector<1x32xf32>
    %cst_73 = arith.constant dense<0.000000e+00> : vector<1x64xf32>
    %199 = tpu.matmul %178, %1, %cst_73 {dimension_numbers = #tpu.dot_dimension_numbers<[1], [0], [0], [1], [0, 0, 1, 1], [], []>} : vector<1x64xf32>, vector<64x64xf32>, vector<1x64xf32> -> vector<1x64xf32>
    %200 = arith.mulf %199, %199 : vector<1x64xf32>
    %201 = vector.shape_cast %200 : vector<1x64xf32> to vector<1x1x64xf32>
    %cst_74 = arith.constant dense<0.000000e+00> : vector<1xf32>
    %202 = vector.multi_reduction <add>, %201, %cst_74 [1, 2] : vector<1x1x64xf32> to vector<1xf32>
    %203 = vector.shape_cast %202 : vector<1xf32> to vector<1x1x1xf32>
    %204 = vector.extract %203[0, 0, 0] : f32 from vector<1x1x1xf32>
    %cst_75 = arith.constant 1.000000e-24 : f32
    %205 = arith.maximumf %204, %cst_75 : f32
    %206 = math.rsqrt %205 : f32
    %207 = vector.broadcast %206 : f32 to vector<1x64xf32>
    %208 = arith.mulf %199, %207 : vector<1x64xf32>
    %cst_76 = arith.constant dense<0.000000e+00> : vector<1x64xf32>
    %209 = tpu.matmul %188, %2, %cst_76 {dimension_numbers = #tpu.dot_dimension_numbers<[1], [0], [0], [1], [0, 0, 1, 1], [], []>} : vector<1x32xf32>, vector<32x64xf32>, vector<1x64xf32> -> vector<1x64xf32>
    %210 = arith.mulf %209, %209 : vector<1x64xf32>
    %211 = vector.shape_cast %210 : vector<1x64xf32> to vector<1x1x64xf32>
    %cst_77 = arith.constant dense<0.000000e+00> : vector<1xf32>
    %212 = vector.multi_reduction <add>, %211, %cst_77 [1, 2] : vector<1x1x64xf32> to vector<1xf32>
    %213 = vector.shape_cast %212 : vector<1xf32> to vector<1x1x1xf32>
    %214 = vector.extract %213[0, 0, 0] : f32 from vector<1x1x1xf32>
    %cst_78 = arith.constant 1.000000e-24 : f32
    %215 = arith.maximumf %214, %cst_78 : f32
    %216 = math.rsqrt %215 : f32
    %217 = vector.broadcast %216 : f32 to vector<1x64xf32>
    %218 = arith.mulf %209, %217 : vector<1x64xf32>
    %cst_79 = arith.constant dense<0.000000e+00> : vector<1x64xf32>
    %219 = tpu.matmul %198, %0, %cst_79 {dimension_numbers = #tpu.dot_dimension_numbers<[1], [1], [0], [0], [0, 0, 1, 0], [], []>} : vector<1x32xf32>, vector<64x32xf32>, vector<1x64xf32> -> vector<1x64xf32>
    %220 = arith.mulf %219, %219 : vector<1x64xf32>
    %221 = vector.shape_cast %220 : vector<1x64xf32> to vector<1x1x64xf32>
    %cst_80 = arith.constant dense<0.000000e+00> : vector<1xf32>
    %222 = vector.multi_reduction <add>, %221, %cst_80 [1, 2] : vector<1x1x64xf32> to vector<1xf32>
    %223 = vector.shape_cast %222 : vector<1xf32> to vector<1x1x1xf32>
    %224 = vector.extract %223[0, 0, 0] : f32 from vector<1x1x1xf32>
    %cst_81 = arith.constant 1.000000e-24 : f32
    %225 = arith.maximumf %224, %cst_81 : f32
    %226 = math.rsqrt %225 : f32
    %227 = vector.broadcast %226 : f32 to vector<1x64xf32>
    %228 = arith.mulf %219, %227 : vector<1x64xf32>
    %cst_82 = arith.constant dense<0.000000e+00> : vector<1x64xf32>
    %229 = tpu.matmul %208, %1, %cst_82 {dimension_numbers = #tpu.dot_dimension_numbers<[1], [1], [0], [0], [0, 0, 1, 0], [], []>} : vector<1x64xf32>, vector<64x64xf32>, vector<1x64xf32> -> vector<1x64xf32>
    %230 = arith.mulf %229, %229 : vector<1x64xf32>
    %231 = vector.shape_cast %230 : vector<1x64xf32> to vector<1x1x64xf32>
    %cst_83 = arith.constant dense<0.000000e+00> : vector<1xf32>
    %232 = vector.multi_reduction <add>, %231, %cst_83 [1, 2] : vector<1x1x64xf32> to vector<1xf32>
    %233 = vector.shape_cast %232 : vector<1xf32> to vector<1x1x1xf32>
    %234 = vector.extract %233[0, 0, 0] : f32 from vector<1x1x1xf32>
    %cst_84 = arith.constant 1.000000e-24 : f32
    %235 = arith.maximumf %234, %cst_84 : f32
    %236 = math.rsqrt %235 : f32
    %237 = vector.broadcast %236 : f32 to vector<1x64xf32>
    %238 = arith.mulf %229, %237 : vector<1x64xf32>
    %cst_85 = arith.constant dense<0.000000e+00> : vector<1x32xf32>
    %239 = tpu.matmul %218, %2, %cst_85 {dimension_numbers = #tpu.dot_dimension_numbers<[1], [1], [0], [0], [0, 0, 1, 0], [], []>} : vector<1x64xf32>, vector<32x64xf32>, vector<1x32xf32> -> vector<1x32xf32>
    %240 = arith.mulf %239, %239 : vector<1x32xf32>
    %241 = vector.shape_cast %240 : vector<1x32xf32> to vector<1x1x32xf32>
    %cst_86 = arith.constant dense<0.000000e+00> : vector<1xf32>
    %242 = vector.multi_reduction <add>, %241, %cst_86 [1, 2] : vector<1x1x32xf32> to vector<1xf32>
    %243 = vector.shape_cast %242 : vector<1xf32> to vector<1x1x1xf32>
    %244 = vector.extract %243[0, 0, 0] : f32 from vector<1x1x1xf32>
    %cst_87 = arith.constant 1.000000e-24 : f32
    %245 = arith.maximumf %244, %cst_87 : f32
    %246 = math.rsqrt %245 : f32
    %247 = vector.broadcast %246 : f32 to vector<1x32xf32>
    %248 = arith.mulf %239, %247 : vector<1x32xf32>
    %c4_i32 = arith.constant 4 : i32
    %cst_88 = arith.constant dense<0.000000e+00> : vector<1x32xf32>
    %249 = tpu.matmul %228, %0, %cst_88 {dimension_numbers = #tpu.dot_dimension_numbers<[1], [0], [0], [1], [0, 0, 1, 1], [], []>} : vector<1x64xf32>, vector<64x32xf32>, vector<1x32xf32> -> vector<1x32xf32>
    %250 = arith.mulf %249, %249 : vector<1x32xf32>
    %251 = vector.shape_cast %250 : vector<1x32xf32> to vector<1x1x32xf32>
    %cst_89 = arith.constant dense<0.000000e+00> : vector<1xf32>
    %252 = vector.multi_reduction <add>, %251, %cst_89 [1, 2] : vector<1x1x32xf32> to vector<1xf32>
    %253 = vector.shape_cast %252 : vector<1xf32> to vector<1x1x1xf32>
    %254 = vector.extract %253[0, 0, 0] : f32 from vector<1x1x1xf32>
    %cst_90 = arith.constant 1.000000e-24 : f32
    %255 = arith.maximumf %254, %cst_90 : f32
    %256 = math.rsqrt %255 : f32
    %257 = vector.broadcast %256 : f32 to vector<1x32xf32>
    %258 = arith.mulf %249, %257 : vector<1x32xf32>
    %cst_91 = arith.constant dense<0.000000e+00> : vector<1x64xf32>
    %259 = tpu.matmul %238, %1, %cst_91 {dimension_numbers = #tpu.dot_dimension_numbers<[1], [0], [0], [1], [0, 0, 1, 1], [], []>} : vector<1x64xf32>, vector<64x64xf32>, vector<1x64xf32> -> vector<1x64xf32>
    %260 = arith.mulf %259, %259 : vector<1x64xf32>
    %261 = vector.shape_cast %260 : vector<1x64xf32> to vector<1x1x64xf32>
    %cst_92 = arith.constant dense<0.000000e+00> : vector<1xf32>
    %262 = vector.multi_reduction <add>, %261, %cst_92 [1, 2] : vector<1x1x64xf32> to vector<1xf32>
    %263 = vector.shape_cast %262 : vector<1xf32> to vector<1x1x1xf32>
    %264 = vector.extract %263[0, 0, 0] : f32 from vector<1x1x1xf32>
    %cst_93 = arith.constant 1.000000e-24 : f32
    %265 = arith.maximumf %264, %cst_93 : f32
    %266 = math.rsqrt %265 : f32
    %267 = vector.broadcast %266 : f32 to vector<1x64xf32>
    %268 = arith.mulf %259, %267 : vector<1x64xf32>
    %cst_94 = arith.constant dense<0.000000e+00> : vector<1x64xf32>
    %269 = tpu.matmul %248, %2, %cst_94 {dimension_numbers = #tpu.dot_dimension_numbers<[1], [0], [0], [1], [0, 0, 1, 1], [], []>} : vector<1x32xf32>, vector<32x64xf32>, vector<1x64xf32> -> vector<1x64xf32>
    %270 = arith.mulf %269, %269 : vector<1x64xf32>
    %271 = vector.shape_cast %270 : vector<1x64xf32> to vector<1x1x64xf32>
    %cst_95 = arith.constant dense<0.000000e+00> : vector<1xf32>
    %272 = vector.multi_reduction <add>, %271, %cst_95 [1, 2] : vector<1x1x64xf32> to vector<1xf32>
    %273 = vector.shape_cast %272 : vector<1xf32> to vector<1x1x1xf32>
    %274 = vector.extract %273[0, 0, 0] : f32 from vector<1x1x1xf32>
    %cst_96 = arith.constant 1.000000e-24 : f32
    %275 = arith.maximumf %274, %cst_96 : f32
    %276 = math.rsqrt %275 : f32
    %277 = vector.broadcast %276 : f32 to vector<1x64xf32>
    %278 = arith.mulf %269, %277 : vector<1x64xf32>
    %cst_97 = arith.constant dense<0.000000e+00> : vector<1x64xf32>
    %279 = tpu.matmul %258, %0, %cst_97 {dimension_numbers = #tpu.dot_dimension_numbers<[1], [1], [0], [0], [0, 0, 1, 0], [], []>} : vector<1x32xf32>, vector<64x32xf32>, vector<1x64xf32> -> vector<1x64xf32>
    %280 = arith.mulf %279, %279 : vector<1x64xf32>
    %281 = vector.shape_cast %280 : vector<1x64xf32> to vector<1x1x64xf32>
    %cst_98 = arith.constant dense<0.000000e+00> : vector<1xf32>
    %282 = vector.multi_reduction <add>, %281, %cst_98 [1, 2] : vector<1x1x64xf32> to vector<1xf32>
    %283 = vector.shape_cast %282 : vector<1xf32> to vector<1x1x1xf32>
    %284 = vector.extract %283[0, 0, 0] : f32 from vector<1x1x1xf32>
    %cst_99 = arith.constant 1.000000e-24 : f32
    %285 = arith.maximumf %284, %cst_99 : f32
    %286 = math.rsqrt %285 : f32
    %287 = vector.broadcast %286 : f32 to vector<1x64xf32>
    %288 = arith.mulf %279, %287 : vector<1x64xf32>
    %cst_100 = arith.constant dense<0.000000e+00> : vector<1x64xf32>
    %289 = tpu.matmul %268, %1, %cst_100 {dimension_numbers = #tpu.dot_dimension_numbers<[1], [1], [0], [0], [0, 0, 1, 0], [], []>} : vector<1x64xf32>, vector<64x64xf32>, vector<1x64xf32> -> vector<1x64xf32>
    %290 = arith.mulf %289, %289 : vector<1x64xf32>
    %291 = vector.shape_cast %290 : vector<1x64xf32> to vector<1x1x64xf32>
    %cst_101 = arith.constant dense<0.000000e+00> : vector<1xf32>
    %292 = vector.multi_reduction <add>, %291, %cst_101 [1, 2] : vector<1x1x64xf32> to vector<1xf32>
    %293 = vector.shape_cast %292 : vector<1xf32> to vector<1x1x1xf32>
    %294 = vector.extract %293[0, 0, 0] : f32 from vector<1x1x1xf32>
    %cst_102 = arith.constant 1.000000e-24 : f32
    %295 = arith.maximumf %294, %cst_102 : f32
    %296 = math.rsqrt %295 : f32
    %297 = vector.broadcast %296 : f32 to vector<1x64xf32>
    %298 = arith.mulf %289, %297 : vector<1x64xf32>
    %cst_103 = arith.constant dense<0.000000e+00> : vector<1x32xf32>
    %299 = tpu.matmul %278, %2, %cst_103 {dimension_numbers = #tpu.dot_dimension_numbers<[1], [1], [0], [0], [0, 0, 1, 0], [], []>} : vector<1x64xf32>, vector<32x64xf32>, vector<1x32xf32> -> vector<1x32xf32>
    %300 = arith.mulf %299, %299 : vector<1x32xf32>
    %301 = vector.shape_cast %300 : vector<1x32xf32> to vector<1x1x32xf32>
    %cst_104 = arith.constant dense<0.000000e+00> : vector<1xf32>
    %302 = vector.multi_reduction <add>, %301, %cst_104 [1, 2] : vector<1x1x32xf32> to vector<1xf32>
    %303 = vector.shape_cast %302 : vector<1xf32> to vector<1x1x1xf32>
    %304 = vector.extract %303[0, 0, 0] : f32 from vector<1x1x1xf32>
    %cst_105 = arith.constant 1.000000e-24 : f32
    %305 = arith.maximumf %304, %cst_105 : f32
    %306 = math.rsqrt %305 : f32
    %307 = vector.broadcast %306 : f32 to vector<1x32xf32>
    %308 = arith.mulf %299, %307 : vector<1x32xf32>
    %c5_i32 = arith.constant 5 : i32
    %cst_106 = arith.constant dense<0.000000e+00> : vector<1x32xf32>
    %309 = tpu.matmul %288, %0, %cst_106 {dimension_numbers = #tpu.dot_dimension_numbers<[1], [0], [0], [1], [0, 0, 1, 1], [], []>} : vector<1x64xf32>, vector<64x32xf32>, vector<1x32xf32> -> vector<1x32xf32>
    %310 = arith.mulf %309, %309 : vector<1x32xf32>
    %311 = vector.shape_cast %310 : vector<1x32xf32> to vector<1x1x32xf32>
    %cst_107 = arith.constant dense<0.000000e+00> : vector<1xf32>
    %312 = vector.multi_reduction <add>, %311, %cst_107 [1, 2] : vector<1x1x32xf32> to vector<1xf32>
    %313 = vector.shape_cast %312 : vector<1xf32> to vector<1x1x1xf32>
    %314 = vector.extract %313[0, 0, 0] : f32 from vector<1x1x1xf32>
    %cst_108 = arith.constant 1.000000e-24 : f32
    %315 = arith.maximumf %314, %cst_108 : f32
    %316 = math.rsqrt %315 : f32
    %317 = vector.broadcast %316 : f32 to vector<1x32xf32>
    %318 = arith.mulf %309, %317 : vector<1x32xf32>
    %cst_109 = arith.constant dense<0.000000e+00> : vector<1x64xf32>
    %319 = tpu.matmul %298, %1, %cst_109 {dimension_numbers = #tpu.dot_dimension_numbers<[1], [0], [0], [1], [0, 0, 1, 1], [], []>} : vector<1x64xf32>, vector<64x64xf32>, vector<1x64xf32> -> vector<1x64xf32>
    %320 = arith.mulf %319, %319 : vector<1x64xf32>
    %321 = vector.shape_cast %320 : vector<1x64xf32> to vector<1x1x64xf32>
    %cst_110 = arith.constant dense<0.000000e+00> : vector<1xf32>
    %322 = vector.multi_reduction <add>, %321, %cst_110 [1, 2] : vector<1x1x64xf32> to vector<1xf32>
    %323 = vector.shape_cast %322 : vector<1xf32> to vector<1x1x1xf32>
    %324 = vector.extract %323[0, 0, 0] : f32 from vector<1x1x1xf32>
    %cst_111 = arith.constant 1.000000e-24 : f32
    %325 = arith.maximumf %324, %cst_111 : f32
    %326 = math.rsqrt %325 : f32
    %327 = vector.broadcast %326 : f32 to vector<1x64xf32>
    %328 = arith.mulf %319, %327 : vector<1x64xf32>
    %cst_112 = arith.constant dense<0.000000e+00> : vector<1x64xf32>
    %329 = tpu.matmul %308, %2, %cst_112 {dimension_numbers = #tpu.dot_dimension_numbers<[1], [0], [0], [1], [0, 0, 1, 1], [], []>} : vector<1x32xf32>, vector<32x64xf32>, vector<1x64xf32> -> vector<1x64xf32>
    %330 = arith.mulf %329, %329 : vector<1x64xf32>
    %331 = vector.shape_cast %330 : vector<1x64xf32> to vector<1x1x64xf32>
    %cst_113 = arith.constant dense<0.000000e+00> : vector<1xf32>
    %332 = vector.multi_reduction <add>, %331, %cst_113 [1, 2] : vector<1x1x64xf32> to vector<1xf32>
    %333 = vector.shape_cast %332 : vector<1xf32> to vector<1x1x1xf32>
    %334 = vector.extract %333[0, 0, 0] : f32 from vector<1x1x1xf32>
    %cst_114 = arith.constant 1.000000e-24 : f32
    %335 = arith.maximumf %334, %cst_114 : f32
    %336 = math.rsqrt %335 : f32
    %337 = vector.broadcast %336 : f32 to vector<1x64xf32>
    %338 = arith.mulf %329, %337 : vector<1x64xf32>
    %cst_115 = arith.constant dense<0.000000e+00> : vector<1x64xf32>
    %339 = tpu.matmul %318, %0, %cst_115 {dimension_numbers = #tpu.dot_dimension_numbers<[1], [1], [0], [0], [0, 0, 1, 0], [], []>} : vector<1x32xf32>, vector<64x32xf32>, vector<1x64xf32> -> vector<1x64xf32>
    %340 = arith.mulf %339, %339 : vector<1x64xf32>
    %341 = vector.shape_cast %340 : vector<1x64xf32> to vector<1x1x64xf32>
    %cst_116 = arith.constant dense<0.000000e+00> : vector<1xf32>
    %342 = vector.multi_reduction <add>, %341, %cst_116 [1, 2] : vector<1x1x64xf32> to vector<1xf32>
    %343 = vector.shape_cast %342 : vector<1xf32> to vector<1x1x1xf32>
    %344 = vector.extract %343[0, 0, 0] : f32 from vector<1x1x1xf32>
    %cst_117 = arith.constant 1.000000e-24 : f32
    %345 = arith.maximumf %344, %cst_117 : f32
    %346 = math.rsqrt %345 : f32
    %347 = vector.broadcast %346 : f32 to vector<1x64xf32>
    %348 = arith.mulf %339, %347 : vector<1x64xf32>
    %cst_118 = arith.constant dense<0.000000e+00> : vector<1x64xf32>
    %349 = tpu.matmul %328, %1, %cst_118 {dimension_numbers = #tpu.dot_dimension_numbers<[1], [1], [0], [0], [0, 0, 1, 0], [], []>} : vector<1x64xf32>, vector<64x64xf32>, vector<1x64xf32> -> vector<1x64xf32>
    %350 = arith.mulf %349, %349 : vector<1x64xf32>
    %351 = vector.shape_cast %350 : vector<1x64xf32> to vector<1x1x64xf32>
    %cst_119 = arith.constant dense<0.000000e+00> : vector<1xf32>
    %352 = vector.multi_reduction <add>, %351, %cst_119 [1, 2] : vector<1x1x64xf32> to vector<1xf32>
    %353 = vector.shape_cast %352 : vector<1xf32> to vector<1x1x1xf32>
    %354 = vector.extract %353[0, 0, 0] : f32 from vector<1x1x1xf32>
    %cst_120 = arith.constant 1.000000e-24 : f32
    %355 = arith.maximumf %354, %cst_120 : f32
    %356 = math.rsqrt %355 : f32
    %357 = vector.broadcast %356 : f32 to vector<1x64xf32>
    %358 = arith.mulf %349, %357 : vector<1x64xf32>
    %cst_121 = arith.constant dense<0.000000e+00> : vector<1x32xf32>
    %359 = tpu.matmul %338, %2, %cst_121 {dimension_numbers = #tpu.dot_dimension_numbers<[1], [1], [0], [0], [0, 0, 1, 0], [], []>} : vector<1x64xf32>, vector<32x64xf32>, vector<1x32xf32> -> vector<1x32xf32>
    %360 = arith.mulf %359, %359 : vector<1x32xf32>
    %361 = vector.shape_cast %360 : vector<1x32xf32> to vector<1x1x32xf32>
    %cst_122 = arith.constant dense<0.000000e+00> : vector<1xf32>
    %362 = vector.multi_reduction <add>, %361, %cst_122 [1, 2] : vector<1x1x32xf32> to vector<1xf32>
    %363 = vector.shape_cast %362 : vector<1xf32> to vector<1x1x1xf32>
    %364 = vector.extract %363[0, 0, 0] : f32 from vector<1x1x1xf32>
    %cst_123 = arith.constant 1.000000e-24 : f32
    %365 = arith.maximumf %364, %cst_123 : f32
    %366 = math.rsqrt %365 : f32
    %367 = vector.broadcast %366 : f32 to vector<1x32xf32>
    %368 = arith.mulf %359, %367 : vector<1x32xf32>
    %c6_i32 = arith.constant 6 : i32
    %cst_124 = arith.constant dense<0.000000e+00> : vector<1x32xf32>
    %369 = tpu.matmul %348, %0, %cst_124 {dimension_numbers = #tpu.dot_dimension_numbers<[1], [0], [0], [1], [0, 0, 1, 1], [], []>} : vector<1x64xf32>, vector<64x32xf32>, vector<1x32xf32> -> vector<1x32xf32>
    %370 = arith.mulf %369, %369 : vector<1x32xf32>
    %371 = vector.shape_cast %370 : vector<1x32xf32> to vector<1x1x32xf32>
    %cst_125 = arith.constant dense<0.000000e+00> : vector<1xf32>
    %372 = vector.multi_reduction <add>, %371, %cst_125 [1, 2] : vector<1x1x32xf32> to vector<1xf32>
    %373 = vector.shape_cast %372 : vector<1xf32> to vector<1x1x1xf32>
    %374 = vector.extract %373[0, 0, 0] : f32 from vector<1x1x1xf32>
    %cst_126 = arith.constant 1.000000e-24 : f32
    %375 = arith.maximumf %374, %cst_126 : f32
    %376 = math.rsqrt %375 : f32
    %377 = vector.broadcast %376 : f32 to vector<1x32xf32>
    %378 = arith.mulf %369, %377 : vector<1x32xf32>
    %cst_127 = arith.constant dense<0.000000e+00> : vector<1x64xf32>
    %379 = tpu.matmul %358, %1, %cst_127 {dimension_numbers = #tpu.dot_dimension_numbers<[1], [0], [0], [1], [0, 0, 1, 1], [], []>} : vector<1x64xf32>, vector<64x64xf32>, vector<1x64xf32> -> vector<1x64xf32>
    %380 = arith.mulf %379, %379 : vector<1x64xf32>
    %381 = vector.shape_cast %380 : vector<1x64xf32> to vector<1x1x64xf32>
    %cst_128 = arith.constant dense<0.000000e+00> : vector<1xf32>
    %382 = vector.multi_reduction <add>, %381, %cst_128 [1, 2] : vector<1x1x64xf32> to vector<1xf32>
    %383 = vector.shape_cast %382 : vector<1xf32> to vector<1x1x1xf32>
    %384 = vector.extract %383[0, 0, 0] : f32 from vector<1x1x1xf32>
    %cst_129 = arith.constant 1.000000e-24 : f32
    %385 = arith.maximumf %384, %cst_129 : f32
    %386 = math.rsqrt %385 : f32
    %387 = vector.broadcast %386 : f32 to vector<1x64xf32>
    %388 = arith.mulf %379, %387 : vector<1x64xf32>
    %cst_130 = arith.constant dense<0.000000e+00> : vector<1x64xf32>
    %389 = tpu.matmul %368, %2, %cst_130 {dimension_numbers = #tpu.dot_dimension_numbers<[1], [0], [0], [1], [0, 0, 1, 1], [], []>} : vector<1x32xf32>, vector<32x64xf32>, vector<1x64xf32> -> vector<1x64xf32>
    %390 = arith.mulf %389, %389 : vector<1x64xf32>
    %391 = vector.shape_cast %390 : vector<1x64xf32> to vector<1x1x64xf32>
    %cst_131 = arith.constant dense<0.000000e+00> : vector<1xf32>
    %392 = vector.multi_reduction <add>, %391, %cst_131 [1, 2] : vector<1x1x64xf32> to vector<1xf32>
    %393 = vector.shape_cast %392 : vector<1xf32> to vector<1x1x1xf32>
    %394 = vector.extract %393[0, 0, 0] : f32 from vector<1x1x1xf32>
    %cst_132 = arith.constant 1.000000e-24 : f32
    %395 = arith.maximumf %394, %cst_132 : f32
    %396 = math.rsqrt %395 : f32
    %397 = vector.broadcast %396 : f32 to vector<1x64xf32>
    %398 = arith.mulf %389, %397 : vector<1x64xf32>
    %cst_133 = arith.constant dense<0.000000e+00> : vector<1x64xf32>
    %399 = tpu.matmul %378, %0, %cst_133 {dimension_numbers = #tpu.dot_dimension_numbers<[1], [1], [0], [0], [0, 0, 1, 0], [], []>} : vector<1x32xf32>, vector<64x32xf32>, vector<1x64xf32> -> vector<1x64xf32>
    %400 = arith.mulf %399, %399 : vector<1x64xf32>
    %401 = vector.shape_cast %400 : vector<1x64xf32> to vector<1x1x64xf32>
    %cst_134 = arith.constant dense<0.000000e+00> : vector<1xf32>
    %402 = vector.multi_reduction <add>, %401, %cst_134 [1, 2] : vector<1x1x64xf32> to vector<1xf32>
    %403 = vector.shape_cast %402 : vector<1xf32> to vector<1x1x1xf32>
    %404 = vector.extract %403[0, 0, 0] : f32 from vector<1x1x1xf32>
    %cst_135 = arith.constant 1.000000e-24 : f32
    %405 = arith.maximumf %404, %cst_135 : f32
    %406 = math.rsqrt %405 : f32
    %407 = vector.broadcast %406 : f32 to vector<1x64xf32>
    %408 = arith.mulf %399, %407 : vector<1x64xf32>
    %cst_136 = arith.constant dense<0.000000e+00> : vector<1x64xf32>
    %409 = tpu.matmul %388, %1, %cst_136 {dimension_numbers = #tpu.dot_dimension_numbers<[1], [1], [0], [0], [0, 0, 1, 0], [], []>} : vector<1x64xf32>, vector<64x64xf32>, vector<1x64xf32> -> vector<1x64xf32>
    %410 = arith.mulf %409, %409 : vector<1x64xf32>
    %411 = vector.shape_cast %410 : vector<1x64xf32> to vector<1x1x64xf32>
    %cst_137 = arith.constant dense<0.000000e+00> : vector<1xf32>
    %412 = vector.multi_reduction <add>, %411, %cst_137 [1, 2] : vector<1x1x64xf32> to vector<1xf32>
    %413 = vector.shape_cast %412 : vector<1xf32> to vector<1x1x1xf32>
    %414 = vector.extract %413[0, 0, 0] : f32 from vector<1x1x1xf32>
    %cst_138 = arith.constant 1.000000e-24 : f32
    %415 = arith.maximumf %414, %cst_138 : f32
    %416 = math.rsqrt %415 : f32
    %417 = vector.broadcast %416 : f32 to vector<1x64xf32>
    %418 = arith.mulf %409, %417 : vector<1x64xf32>
    %cst_139 = arith.constant dense<0.000000e+00> : vector<1x32xf32>
    %419 = tpu.matmul %398, %2, %cst_139 {dimension_numbers = #tpu.dot_dimension_numbers<[1], [1], [0], [0], [0, 0, 1, 0], [], []>} : vector<1x64xf32>, vector<32x64xf32>, vector<1x32xf32> -> vector<1x32xf32>
    %420 = arith.mulf %419, %419 : vector<1x32xf32>
    %421 = vector.shape_cast %420 : vector<1x32xf32> to vector<1x1x32xf32>
    %cst_140 = arith.constant dense<0.000000e+00> : vector<1xf32>
    %422 = vector.multi_reduction <add>, %421, %cst_140 [1, 2] : vector<1x1x32xf32> to vector<1xf32>
    %423 = vector.shape_cast %422 : vector<1xf32> to vector<1x1x1xf32>
    %424 = vector.extract %423[0, 0, 0] : f32 from vector<1x1x1xf32>
    %cst_141 = arith.constant 1.000000e-24 : f32
    %425 = arith.maximumf %424, %cst_141 : f32
    %426 = math.rsqrt %425 : f32
    %427 = vector.broadcast %426 : f32 to vector<1x32xf32>
    %428 = arith.mulf %419, %427 : vector<1x32xf32>
    %c7_i32 = arith.constant 7 : i32
    %cst_142 = arith.constant dense<0.000000e+00> : vector<1x32xf32>
    %429 = tpu.matmul %408, %0, %cst_142 {dimension_numbers = #tpu.dot_dimension_numbers<[1], [0], [0], [1], [0, 0, 1, 1], [], []>} : vector<1x64xf32>, vector<64x32xf32>, vector<1x32xf32> -> vector<1x32xf32>
    %430 = arith.mulf %429, %429 : vector<1x32xf32>
    %431 = vector.shape_cast %430 : vector<1x32xf32> to vector<1x1x32xf32>
    %cst_143 = arith.constant dense<0.000000e+00> : vector<1xf32>
    %432 = vector.multi_reduction <add>, %431, %cst_143 [1, 2] : vector<1x1x32xf32> to vector<1xf32>
    %433 = vector.shape_cast %432 : vector<1xf32> to vector<1x1x1xf32>
    %434 = vector.extract %433[0, 0, 0] : f32 from vector<1x1x1xf32>
    %cst_144 = arith.constant 1.000000e-24 : f32
    %435 = arith.maximumf %434, %cst_144 : f32
    %436 = math.rsqrt %435 : f32
    %437 = vector.broadcast %436 : f32 to vector<1x32xf32>
    %438 = arith.mulf %429, %437 : vector<1x32xf32>
    %cst_145 = arith.constant dense<0.000000e+00> : vector<1x64xf32>
    %439 = tpu.matmul %418, %1, %cst_145 {dimension_numbers = #tpu.dot_dimension_numbers<[1], [0], [0], [1], [0, 0, 1, 1], [], []>} : vector<1x64xf32>, vector<64x64xf32>, vector<1x64xf32> -> vector<1x64xf32>
    %440 = arith.mulf %439, %439 : vector<1x64xf32>
    %441 = vector.shape_cast %440 : vector<1x64xf32> to vector<1x1x64xf32>
    %cst_146 = arith.constant dense<0.000000e+00> : vector<1xf32>
    %442 = vector.multi_reduction <add>, %441, %cst_146 [1, 2] : vector<1x1x64xf32> to vector<1xf32>
    %443 = vector.shape_cast %442 : vector<1xf32> to vector<1x1x1xf32>
    %444 = vector.extract %443[0, 0, 0] : f32 from vector<1x1x1xf32>
    %cst_147 = arith.constant 1.000000e-24 : f32
    %445 = arith.maximumf %444, %cst_147 : f32
    %446 = math.rsqrt %445 : f32
    %447 = vector.broadcast %446 : f32 to vector<1x64xf32>
    %448 = arith.mulf %439, %447 : vector<1x64xf32>
    %cst_148 = arith.constant dense<0.000000e+00> : vector<1x64xf32>
    %449 = tpu.matmul %428, %2, %cst_148 {dimension_numbers = #tpu.dot_dimension_numbers<[1], [0], [0], [1], [0, 0, 1, 1], [], []>} : vector<1x32xf32>, vector<32x64xf32>, vector<1x64xf32> -> vector<1x64xf32>
    %450 = arith.mulf %449, %449 : vector<1x64xf32>
    %451 = vector.shape_cast %450 : vector<1x64xf32> to vector<1x1x64xf32>
    %cst_149 = arith.constant dense<0.000000e+00> : vector<1xf32>
    %452 = vector.multi_reduction <add>, %451, %cst_149 [1, 2] : vector<1x1x64xf32> to vector<1xf32>
    %453 = vector.shape_cast %452 : vector<1xf32> to vector<1x1x1xf32>
    %454 = vector.extract %453[0, 0, 0] : f32 from vector<1x1x1xf32>
    %cst_150 = arith.constant 1.000000e-24 : f32
    %455 = arith.maximumf %454, %cst_150 : f32
    %456 = math.rsqrt %455 : f32
    %457 = vector.broadcast %456 : f32 to vector<1x64xf32>
    %458 = arith.mulf %449, %457 : vector<1x64xf32>
    %cst_151 = arith.constant dense<0.000000e+00> : vector<1x64xf32>
    %459 = tpu.matmul %438, %0, %cst_151 {dimension_numbers = #tpu.dot_dimension_numbers<[1], [1], [0], [0], [0, 0, 1, 0], [], []>} : vector<1x32xf32>, vector<64x32xf32>, vector<1x64xf32> -> vector<1x64xf32>
    %460 = arith.mulf %459, %459 : vector<1x64xf32>
    %461 = vector.shape_cast %460 : vector<1x64xf32> to vector<1x1x64xf32>
    %cst_152 = arith.constant dense<0.000000e+00> : vector<1xf32>
    %462 = vector.multi_reduction <add>, %461, %cst_152 [1, 2] : vector<1x1x64xf32> to vector<1xf32>
    %463 = vector.shape_cast %462 : vector<1xf32> to vector<1x1x1xf32>
    %464 = vector.extract %463[0, 0, 0] : f32 from vector<1x1x1xf32>
    %cst_153 = arith.constant 1.000000e-24 : f32
    %465 = arith.maximumf %464, %cst_153 : f32
    %466 = math.rsqrt %465 : f32
    %467 = vector.broadcast %466 : f32 to vector<1x64xf32>
    %468 = arith.mulf %459, %467 : vector<1x64xf32>
    %cst_154 = arith.constant dense<0.000000e+00> : vector<1x64xf32>
    %469 = tpu.matmul %448, %1, %cst_154 {dimension_numbers = #tpu.dot_dimension_numbers<[1], [1], [0], [0], [0, 0, 1, 0], [], []>} : vector<1x64xf32>, vector<64x64xf32>, vector<1x64xf32> -> vector<1x64xf32>
    %470 = arith.mulf %469, %469 : vector<1x64xf32>
    %471 = vector.shape_cast %470 : vector<1x64xf32> to vector<1x1x64xf32>
    %cst_155 = arith.constant dense<0.000000e+00> : vector<1xf32>
    %472 = vector.multi_reduction <add>, %471, %cst_155 [1, 2] : vector<1x1x64xf32> to vector<1xf32>
    %473 = vector.shape_cast %472 : vector<1xf32> to vector<1x1x1xf32>
    %474 = vector.extract %473[0, 0, 0] : f32 from vector<1x1x1xf32>
    %cst_156 = arith.constant 1.000000e-24 : f32
    %475 = arith.maximumf %474, %cst_156 : f32
    %476 = math.rsqrt %475 : f32
    %477 = vector.broadcast %476 : f32 to vector<1x64xf32>
    %478 = arith.mulf %469, %477 : vector<1x64xf32>
    %cst_157 = arith.constant dense<0.000000e+00> : vector<1x32xf32>
    %479 = tpu.matmul %458, %2, %cst_157 {dimension_numbers = #tpu.dot_dimension_numbers<[1], [1], [0], [0], [0, 0, 1, 0], [], []>} : vector<1x64xf32>, vector<32x64xf32>, vector<1x32xf32> -> vector<1x32xf32>
    %480 = arith.mulf %479, %479 : vector<1x32xf32>
    %481 = vector.shape_cast %480 : vector<1x32xf32> to vector<1x1x32xf32>
    %cst_158 = arith.constant dense<0.000000e+00> : vector<1xf32>
    %482 = vector.multi_reduction <add>, %481, %cst_158 [1, 2] : vector<1x1x32xf32> to vector<1xf32>
    %483 = vector.shape_cast %482 : vector<1xf32> to vector<1x1x1xf32>
    %484 = vector.extract %483[0, 0, 0] : f32 from vector<1x1x1xf32>
    %cst_159 = arith.constant 1.000000e-24 : f32
    %485 = arith.maximumf %484, %cst_159 : f32
    %486 = math.rsqrt %485 : f32
    %487 = vector.broadcast %486 : f32 to vector<1x32xf32>
    %488 = arith.mulf %479, %487 : vector<1x32xf32>
    %c8_i32 = arith.constant 8 : i32
    %cst_160 = arith.constant dense<0.000000e+00> : vector<1x32xf32>
    %489 = tpu.matmul %468, %0, %cst_160 {dimension_numbers = #tpu.dot_dimension_numbers<[1], [0], [0], [1], [0, 0, 1, 1], [], []>} : vector<1x64xf32>, vector<64x32xf32>, vector<1x32xf32> -> vector<1x32xf32>
    %490 = arith.mulf %489, %489 : vector<1x32xf32>
    %491 = vector.shape_cast %490 : vector<1x32xf32> to vector<1x1x32xf32>
    %cst_161 = arith.constant dense<0.000000e+00> : vector<1xf32>
    %492 = vector.multi_reduction <add>, %491, %cst_161 [1, 2] : vector<1x1x32xf32> to vector<1xf32>
    %493 = vector.shape_cast %492 : vector<1xf32> to vector<1x1x1xf32>
    %494 = vector.extract %493[0, 0, 0] : f32 from vector<1x1x1xf32>
    %cst_162 = arith.constant 1.000000e-24 : f32
    %495 = arith.maximumf %494, %cst_162 : f32
    %496 = math.rsqrt %495 : f32
    %497 = vector.broadcast %496 : f32 to vector<1x32xf32>
    %498 = arith.mulf %489, %497 : vector<1x32xf32>
    %cst_163 = arith.constant dense<0.000000e+00> : vector<1x64xf32>
    %499 = tpu.matmul %478, %1, %cst_163 {dimension_numbers = #tpu.dot_dimension_numbers<[1], [0], [0], [1], [0, 0, 1, 1], [], []>} : vector<1x64xf32>, vector<64x64xf32>, vector<1x64xf32> -> vector<1x64xf32>
    %500 = arith.mulf %499, %499 : vector<1x64xf32>
    %501 = vector.shape_cast %500 : vector<1x64xf32> to vector<1x1x64xf32>
    %cst_164 = arith.constant dense<0.000000e+00> : vector<1xf32>
    %502 = vector.multi_reduction <add>, %501, %cst_164 [1, 2] : vector<1x1x64xf32> to vector<1xf32>
    %503 = vector.shape_cast %502 : vector<1xf32> to vector<1x1x1xf32>
    %504 = vector.extract %503[0, 0, 0] : f32 from vector<1x1x1xf32>
    %cst_165 = arith.constant 1.000000e-24 : f32
    %505 = arith.maximumf %504, %cst_165 : f32
    %506 = math.rsqrt %505 : f32
    %507 = vector.broadcast %506 : f32 to vector<1x64xf32>
    %508 = arith.mulf %499, %507 : vector<1x64xf32>
    %cst_166 = arith.constant dense<0.000000e+00> : vector<1x64xf32>
    %509 = tpu.matmul %488, %2, %cst_166 {dimension_numbers = #tpu.dot_dimension_numbers<[1], [0], [0], [1], [0, 0, 1, 1], [], []>} : vector<1x32xf32>, vector<32x64xf32>, vector<1x64xf32> -> vector<1x64xf32>
    %510 = arith.mulf %509, %509 : vector<1x64xf32>
    %511 = vector.shape_cast %510 : vector<1x64xf32> to vector<1x1x64xf32>
    %cst_167 = arith.constant dense<0.000000e+00> : vector<1xf32>
    %512 = vector.multi_reduction <add>, %511, %cst_167 [1, 2] : vector<1x1x64xf32> to vector<1xf32>
    %513 = vector.shape_cast %512 : vector<1xf32> to vector<1x1x1xf32>
    %514 = vector.extract %513[0, 0, 0] : f32 from vector<1x1x1xf32>
    %cst_168 = arith.constant 1.000000e-24 : f32
    %515 = arith.maximumf %514, %cst_168 : f32
    %516 = math.rsqrt %515 : f32
    %517 = vector.broadcast %516 : f32 to vector<1x64xf32>
    %518 = arith.mulf %509, %517 : vector<1x64xf32>
    %cst_169 = arith.constant dense<0.000000e+00> : vector<1x64xf32>
    %519 = tpu.matmul %498, %0, %cst_169 {dimension_numbers = #tpu.dot_dimension_numbers<[1], [1], [0], [0], [0, 0, 1, 0], [], []>} : vector<1x32xf32>, vector<64x32xf32>, vector<1x64xf32> -> vector<1x64xf32>
    %520 = arith.mulf %519, %519 : vector<1x64xf32>
    %521 = vector.shape_cast %520 : vector<1x64xf32> to vector<1x1x64xf32>
    %cst_170 = arith.constant dense<0.000000e+00> : vector<1xf32>
    %522 = vector.multi_reduction <add>, %521, %cst_170 [1, 2] : vector<1x1x64xf32> to vector<1xf32>
    %523 = vector.shape_cast %522 : vector<1xf32> to vector<1x1x1xf32>
    %524 = vector.extract %523[0, 0, 0] : f32 from vector<1x1x1xf32>
    %cst_171 = arith.constant 1.000000e-24 : f32
    %525 = arith.maximumf %524, %cst_171 : f32
    %526 = math.rsqrt %525 : f32
    %527 = vector.broadcast %526 : f32 to vector<1x64xf32>
    %528 = arith.mulf %519, %527 : vector<1x64xf32>
    %cst_172 = arith.constant dense<0.000000e+00> : vector<1x64xf32>
    %529 = tpu.matmul %508, %1, %cst_172 {dimension_numbers = #tpu.dot_dimension_numbers<[1], [1], [0], [0], [0, 0, 1, 0], [], []>} : vector<1x64xf32>, vector<64x64xf32>, vector<1x64xf32> -> vector<1x64xf32>
    %530 = arith.mulf %529, %529 : vector<1x64xf32>
    %531 = vector.shape_cast %530 : vector<1x64xf32> to vector<1x1x64xf32>
    %cst_173 = arith.constant dense<0.000000e+00> : vector<1xf32>
    %532 = vector.multi_reduction <add>, %531, %cst_173 [1, 2] : vector<1x1x64xf32> to vector<1xf32>
    %533 = vector.shape_cast %532 : vector<1xf32> to vector<1x1x1xf32>
    %534 = vector.extract %533[0, 0, 0] : f32 from vector<1x1x1xf32>
    %cst_174 = arith.constant 1.000000e-24 : f32
    %535 = arith.maximumf %534, %cst_174 : f32
    %536 = math.rsqrt %535 : f32
    %537 = vector.broadcast %536 : f32 to vector<1x64xf32>
    %538 = arith.mulf %529, %537 : vector<1x64xf32>
    %cst_175 = arith.constant dense<0.000000e+00> : vector<1x32xf32>
    %539 = tpu.matmul %518, %2, %cst_175 {dimension_numbers = #tpu.dot_dimension_numbers<[1], [1], [0], [0], [0, 0, 1, 0], [], []>} : vector<1x64xf32>, vector<32x64xf32>, vector<1x32xf32> -> vector<1x32xf32>
    %540 = arith.mulf %539, %539 : vector<1x32xf32>
    %541 = vector.shape_cast %540 : vector<1x32xf32> to vector<1x1x32xf32>
    %cst_176 = arith.constant dense<0.000000e+00> : vector<1xf32>
    %542 = vector.multi_reduction <add>, %541, %cst_176 [1, 2] : vector<1x1x32xf32> to vector<1xf32>
    %543 = vector.shape_cast %542 : vector<1xf32> to vector<1x1x1xf32>
    %544 = vector.extract %543[0, 0, 0] : f32 from vector<1x1x1xf32>
    %cst_177 = arith.constant 1.000000e-24 : f32
    %545 = arith.maximumf %544, %cst_177 : f32
    %546 = math.rsqrt %545 : f32
    %547 = vector.broadcast %546 : f32 to vector<1x32xf32>
    %548 = arith.mulf %539, %547 : vector<1x32xf32>
    %c9_i32 = arith.constant 9 : i32
    %cst_178 = arith.constant dense<0.000000e+00> : vector<1x32xf32>
    %549 = tpu.matmul %528, %0, %cst_178 {dimension_numbers = #tpu.dot_dimension_numbers<[1], [0], [0], [1], [0, 0, 1, 1], [], []>} : vector<1x64xf32>, vector<64x32xf32>, vector<1x32xf32> -> vector<1x32xf32>
    %550 = arith.mulf %549, %549 : vector<1x32xf32>
    %551 = vector.shape_cast %550 : vector<1x32xf32> to vector<1x1x32xf32>
    %cst_179 = arith.constant dense<0.000000e+00> : vector<1xf32>
    %552 = vector.multi_reduction <add>, %551, %cst_179 [1, 2] : vector<1x1x32xf32> to vector<1xf32>
    %553 = vector.shape_cast %552 : vector<1xf32> to vector<1x1x1xf32>
    %554 = vector.extract %553[0, 0, 0] : f32 from vector<1x1x1xf32>
    %cst_180 = arith.constant 1.000000e-24 : f32
    %555 = arith.maximumf %554, %cst_180 : f32
    %556 = math.rsqrt %555 : f32
    %557 = vector.broadcast %556 : f32 to vector<1x32xf32>
    %558 = arith.mulf %549, %557 : vector<1x32xf32>
    %cst_181 = arith.constant dense<0.000000e+00> : vector<1x64xf32>
    %559 = tpu.matmul %538, %1, %cst_181 {dimension_numbers = #tpu.dot_dimension_numbers<[1], [0], [0], [1], [0, 0, 1, 1], [], []>} : vector<1x64xf32>, vector<64x64xf32>, vector<1x64xf32> -> vector<1x64xf32>
    %560 = arith.mulf %559, %559 : vector<1x64xf32>
    %561 = vector.shape_cast %560 : vector<1x64xf32> to vector<1x1x64xf32>
    %cst_182 = arith.constant dense<0.000000e+00> : vector<1xf32>
    %562 = vector.multi_reduction <add>, %561, %cst_182 [1, 2] : vector<1x1x64xf32> to vector<1xf32>
    %563 = vector.shape_cast %562 : vector<1xf32> to vector<1x1x1xf32>
    %564 = vector.extract %563[0, 0, 0] : f32 from vector<1x1x1xf32>
    %cst_183 = arith.constant 1.000000e-24 : f32
    %565 = arith.maximumf %564, %cst_183 : f32
    %566 = math.rsqrt %565 : f32
    %567 = vector.broadcast %566 : f32 to vector<1x64xf32>
    %568 = arith.mulf %559, %567 : vector<1x64xf32>
    %cst_184 = arith.constant dense<0.000000e+00> : vector<1x64xf32>
    %569 = tpu.matmul %548, %2, %cst_184 {dimension_numbers = #tpu.dot_dimension_numbers<[1], [0], [0], [1], [0, 0, 1, 1], [], []>} : vector<1x32xf32>, vector<32x64xf32>, vector<1x64xf32> -> vector<1x64xf32>
    %570 = arith.mulf %569, %569 : vector<1x64xf32>
    %571 = vector.shape_cast %570 : vector<1x64xf32> to vector<1x1x64xf32>
    %cst_185 = arith.constant dense<0.000000e+00> : vector<1xf32>
    %572 = vector.multi_reduction <add>, %571, %cst_185 [1, 2] : vector<1x1x64xf32> to vector<1xf32>
    %573 = vector.shape_cast %572 : vector<1xf32> to vector<1x1x1xf32>
    %574 = vector.extract %573[0, 0, 0] : f32 from vector<1x1x1xf32>
    %cst_186 = arith.constant 1.000000e-24 : f32
    %575 = arith.maximumf %574, %cst_186 : f32
    %576 = math.rsqrt %575 : f32
    %577 = vector.broadcast %576 : f32 to vector<1x64xf32>
    %578 = arith.mulf %569, %577 : vector<1x64xf32>
    %cst_187 = arith.constant dense<0.000000e+00> : vector<1x64xf32>
    %579 = tpu.matmul %558, %0, %cst_187 {dimension_numbers = #tpu.dot_dimension_numbers<[1], [1], [0], [0], [0, 0, 1, 0], [], []>} : vector<1x32xf32>, vector<64x32xf32>, vector<1x64xf32> -> vector<1x64xf32>
    %580 = arith.mulf %579, %579 : vector<1x64xf32>
    %581 = vector.shape_cast %580 : vector<1x64xf32> to vector<1x1x64xf32>
    %cst_188 = arith.constant dense<0.000000e+00> : vector<1xf32>
    %582 = vector.multi_reduction <add>, %581, %cst_188 [1, 2] : vector<1x1x64xf32> to vector<1xf32>
    %583 = vector.shape_cast %582 : vector<1xf32> to vector<1x1x1xf32>
    %584 = vector.extract %583[0, 0, 0] : f32 from vector<1x1x1xf32>
    %cst_189 = arith.constant 1.000000e-24 : f32
    %585 = arith.maximumf %584, %cst_189 : f32
    %586 = math.rsqrt %585 : f32
    %587 = vector.broadcast %586 : f32 to vector<1x64xf32>
    %588 = arith.mulf %579, %587 : vector<1x64xf32>
    %cst_190 = arith.constant dense<0.000000e+00> : vector<1x64xf32>
    %589 = tpu.matmul %568, %1, %cst_190 {dimension_numbers = #tpu.dot_dimension_numbers<[1], [1], [0], [0], [0, 0, 1, 0], [], []>} : vector<1x64xf32>, vector<64x64xf32>, vector<1x64xf32> -> vector<1x64xf32>
    %590 = arith.mulf %589, %589 : vector<1x64xf32>
    %591 = vector.shape_cast %590 : vector<1x64xf32> to vector<1x1x64xf32>
    %cst_191 = arith.constant dense<0.000000e+00> : vector<1xf32>
    %592 = vector.multi_reduction <add>, %591, %cst_191 [1, 2] : vector<1x1x64xf32> to vector<1xf32>
    %593 = vector.shape_cast %592 : vector<1xf32> to vector<1x1x1xf32>
    %594 = vector.extract %593[0, 0, 0] : f32 from vector<1x1x1xf32>
    %cst_192 = arith.constant 1.000000e-24 : f32
    %595 = arith.maximumf %594, %cst_192 : f32
    %596 = math.rsqrt %595 : f32
    %597 = vector.broadcast %596 : f32 to vector<1x64xf32>
    %598 = arith.mulf %589, %597 : vector<1x64xf32>
    %cst_193 = arith.constant dense<0.000000e+00> : vector<1x32xf32>
    %599 = tpu.matmul %578, %2, %cst_193 {dimension_numbers = #tpu.dot_dimension_numbers<[1], [1], [0], [0], [0, 0, 1, 0], [], []>} : vector<1x64xf32>, vector<32x64xf32>, vector<1x32xf32> -> vector<1x32xf32>
    %600 = arith.mulf %599, %599 : vector<1x32xf32>
    %601 = vector.shape_cast %600 : vector<1x32xf32> to vector<1x1x32xf32>
    %cst_194 = arith.constant dense<0.000000e+00> : vector<1xf32>
    %602 = vector.multi_reduction <add>, %601, %cst_194 [1, 2] : vector<1x1x32xf32> to vector<1xf32>
    %603 = vector.shape_cast %602 : vector<1xf32> to vector<1x1x1xf32>
    %604 = vector.extract %603[0, 0, 0] : f32 from vector<1x1x1xf32>
    %cst_195 = arith.constant 1.000000e-24 : f32
    %605 = arith.maximumf %604, %cst_195 : f32
    %606 = math.rsqrt %605 : f32
    %607 = vector.broadcast %606 : f32 to vector<1x32xf32>
    %608 = arith.mulf %599, %607 : vector<1x32xf32>
    %cst_196 = arith.constant dense<0.000000e+00> : vector<1x64xf32>
    %609 = tpu.matmul %558, %0, %cst_196 {dimension_numbers = #tpu.dot_dimension_numbers<[1], [1], [0], [0], [0, 0, 1, 0], [], []>} : vector<1x32xf32>, vector<64x32xf32>, vector<1x64xf32> -> vector<1x64xf32>
    %610 = arith.mulf %588, %609 : vector<1x64xf32>
    %611 = vector.shape_cast %610 : vector<1x64xf32> to vector<1x1x64xf32>
    %cst_197 = arith.constant dense<0.000000e+00> : vector<1xf32>
    %612 = vector.multi_reduction <add>, %611, %cst_197 [1, 2] : vector<1x1x64xf32> to vector<1xf32>
    %613 = vector.shape_cast %612 : vector<1xf32> to vector<1x1x1xf32>
    %614 = vector.extract %613[0, 0, 0] : f32 from vector<1x1x1xf32>
    %cst_198 = arith.constant dense<0.000000e+00> : vector<1x64xf32>
    %615 = tpu.matmul %568, %1, %cst_198 {dimension_numbers = #tpu.dot_dimension_numbers<[1], [1], [0], [0], [0, 0, 1, 0], [], []>} : vector<1x64xf32>, vector<64x64xf32>, vector<1x64xf32> -> vector<1x64xf32>
    %616 = arith.mulf %598, %615 : vector<1x64xf32>
    %617 = vector.shape_cast %616 : vector<1x64xf32> to vector<1x1x64xf32>
    %cst_199 = arith.constant dense<0.000000e+00> : vector<1xf32>
    %618 = vector.multi_reduction <add>, %617, %cst_199 [1, 2] : vector<1x1x64xf32> to vector<1xf32>
    %619 = vector.shape_cast %618 : vector<1xf32> to vector<1x1x1xf32>
    %620 = vector.extract %619[0, 0, 0] : f32 from vector<1x1x1xf32>
    %cst_200 = arith.constant dense<0.000000e+00> : vector<1x32xf32>
    %621 = tpu.matmul %578, %2, %cst_200 {dimension_numbers = #tpu.dot_dimension_numbers<[1], [1], [0], [0], [0, 0, 1, 0], [], []>} : vector<1x64xf32>, vector<32x64xf32>, vector<1x32xf32> -> vector<1x32xf32>
    %622 = arith.mulf %608, %621 : vector<1x32xf32>
    %623 = vector.shape_cast %622 : vector<1x32xf32> to vector<1x1x32xf32>
    %cst_201 = arith.constant dense<0.000000e+00> : vector<1xf32>
    %624 = vector.multi_reduction <add>, %623, %cst_201 [1, 2] : vector<1x1x32xf32> to vector<1xf32>
    %625 = vector.shape_cast %624 : vector<1xf32> to vector<1x1x1xf32>
    %626 = vector.extract %625[0, 0, 0] : f32 from vector<1x1x1xf32>
    %cst_202 = arith.constant 9.700000e-01 : f32
    %627 = arith.divf %614, %cst_202 : f32
    %cst_203 = arith.constant 1.000000e+00 : f32
    %628 = arith.maximumf %cst_203, %627 : f32
    %cst_204 = arith.constant 1.000000e+00 : f32
    %629 = arith.divf %cst_204, %628 : f32
    %cst_205 = arith.constant 9.700000e-01 : f32
    %630 = arith.divf %620, %cst_205 : f32
    %cst_206 = arith.constant 1.000000e+00 : f32
    %631 = arith.maximumf %cst_206, %630 : f32
    %cst_207 = arith.constant 1.000000e+00 : f32
    %632 = arith.divf %cst_207, %631 : f32
    %cst_208 = arith.constant 9.700000e-01 : f32
    %633 = arith.divf %626, %cst_208 : f32
    %cst_209 = arith.constant 1.000000e+00 : f32
    %634 = arith.maximumf %cst_209, %633 : f32
    %cst_210 = arith.constant 1.000000e+00 : f32
    %635 = arith.divf %cst_210, %634 : f32
    %c0_211 = arith.constant 0 : index
    %c0_212 = arith.constant 0 : index
    %636 = vector.load %arg0[%c0_211, %c0_212] : memref<8x32xf32, #tpu.memory_space<vmem>>, vector<8x32xf32>
    %cst_213 = arith.constant dense<0.000000e+00> : vector<8x64xf32>
    %637 = tpu.matmul %636, %0, %cst_213 {dimension_numbers = #tpu.dot_dimension_numbers<[1], [1], [0], [0], [0, 0, 1, 0], [], []>} : vector<8x32xf32>, vector<64x32xf32>, vector<8x64xf32> -> vector<8x64xf32>
    %638 = vector.broadcast %629 : f32 to vector<8x64xf32>
    %639 = arith.mulf %637, %638 : vector<8x64xf32>
    %c0_214 = arith.constant 0 : index
    %c0_215 = arith.constant 0 : index
    %640 = vector.load %arg2[%c0_214, %c0_215] : memref<1x64xf32, #tpu.memory_space<vmem>>, vector<1x64xf32>
    %641 = vector.broadcast %640 : vector<1x64xf32> to vector<8x64xf32>
    %642 = arith.addf %639, %641 : vector<8x64xf32>
    %643 = arith.negf %642 : vector<8x64xf32>
    %644 = math.exp %643 : vector<8x64xf32>
    %cst_216 = arith.constant 1.000000e+00 : f32
    %645 = vector.broadcast %cst_216 : f32 to vector<8x64xf32>
    %646 = arith.addf %645, %644 : vector<8x64xf32>
    %647 = arith.divf %645, %646 : vector<8x64xf32>
    %648 = arith.mulf %642, %647 : vector<8x64xf32>
    %cst_217 = arith.constant dense<0.000000e+00> : vector<8x64xf32>
    %649 = tpu.matmul %648, %1, %cst_217 {dimension_numbers = #tpu.dot_dimension_numbers<[1], [1], [0], [0], [0, 0, 1, 0], [], []>} : vector<8x64xf32>, vector<64x64xf32>, vector<8x64xf32> -> vector<8x64xf32>
    %650 = vector.broadcast %632 : f32 to vector<8x64xf32>
    %651 = arith.mulf %649, %650 : vector<8x64xf32>
    %c0_218 = arith.constant 0 : index
    %c0_219 = arith.constant 0 : index
    %652 = vector.load %arg4[%c0_218, %c0_219] : memref<1x64xf32, #tpu.memory_space<vmem>>, vector<1x64xf32>
    %653 = vector.broadcast %652 : vector<1x64xf32> to vector<8x64xf32>
    %654 = arith.addf %651, %653 : vector<8x64xf32>
    %655 = arith.negf %654 : vector<8x64xf32>
    %656 = math.exp %655 : vector<8x64xf32>
    %cst_220 = arith.constant 1.000000e+00 : f32
    %657 = vector.broadcast %cst_220 : f32 to vector<8x64xf32>
    %658 = arith.addf %657, %656 : vector<8x64xf32>
    %659 = arith.divf %657, %658 : vector<8x64xf32>
    %660 = arith.mulf %654, %659 : vector<8x64xf32>
    %cst_221 = arith.constant dense<0.000000e+00> : vector<8x32xf32>
    %661 = tpu.matmul %660, %2, %cst_221 {dimension_numbers = #tpu.dot_dimension_numbers<[1], [1], [0], [0], [0, 0, 1, 0], [], []>} : vector<8x64xf32>, vector<32x64xf32>, vector<8x32xf32> -> vector<8x32xf32>
    %662 = vector.broadcast %635 : f32 to vector<8x32xf32>
    %663 = arith.mulf %661, %662 : vector<8x32xf32>
    %c0_222 = arith.constant 0 : index
    %c0_223 = arith.constant 0 : index
    %664 = vector.load %arg6[%c0_222, %c0_223] : memref<1x32xf32, #tpu.memory_space<vmem>>, vector<1x32xf32>
    %665 = vector.broadcast %664 : vector<1x32xf32> to vector<8x32xf32>
    %666 = arith.addf %663, %665 : vector<8x32xf32>
    %c0_224 = arith.constant 0 : index
    %c0_225 = arith.constant 0 : index
    %667 = vector.load %arg13[%c0_224, %c0_225] : memref<8x32xf32, #tpu.memory_space<vmem>>, vector<8x32xf32>
    tpu.vector_store %arg13[%c0_224, %c0_225], %666 {strides = array<i32>} : memref<8x32xf32, #tpu.memory_space<vmem>>, vector<8x32xf32>,
    %c0_226 = arith.constant 0 : index
    %c0_227 = arith.constant 0 : index
    %668 = vector.load %arg14[%c0_226, %c0_227] : memref<1x64xf32, #tpu.memory_space<vmem>>, vector<1x64xf32>
    tpu.vector_store %arg14[%c0_226, %c0_227], %588 {strides = array<i32>} : memref<1x64xf32, #tpu.memory_space<vmem>>, vector<1x64xf32>,
    %c0_228 = arith.constant 0 : index
    %c0_229 = arith.constant 0 : index
    %669 = vector.load %arg15[%c0_228, %c0_229] : memref<1x32xf32, #tpu.memory_space<vmem>>, vector<1x32xf32>
    tpu.vector_store %arg15[%c0_228, %c0_229], %558 {strides = array<i32>} : memref<1x32xf32, #tpu.memory_space<vmem>>, vector<1x32xf32>,
    %c0_230 = arith.constant 0 : index
    %c0_231 = arith.constant 0 : index
    %670 = vector.load %arg16[%c0_230, %c0_231] : memref<1x64xf32, #tpu.memory_space<vmem>>, vector<1x64xf32>
    tpu.vector_store %arg16[%c0_230, %c0_231], %598 {strides = array<i32>} : memref<1x64xf32, #tpu.memory_space<vmem>>, vector<1x64xf32>,
    %c0_232 = arith.constant 0 : index
    %c0_233 = arith.constant 0 : index
    %671 = vector.load %arg17[%c0_232, %c0_233] : memref<1x64xf32, #tpu.memory_space<vmem>>, vector<1x64xf32>
    tpu.vector_store %arg17[%c0_232, %c0_233], %568 {strides = array<i32>} : memref<1x64xf32, #tpu.memory_space<vmem>>, vector<1x64xf32>,
    %c0_234 = arith.constant 0 : index
    %c0_235 = arith.constant 0 : index
    %672 = vector.load %arg18[%c0_234, %c0_235] : memref<1x32xf32, #tpu.memory_space<vmem>>, vector<1x32xf32>
    tpu.vector_store %arg18[%c0_234, %c0_235], %608 {strides = array<i32>} : memref<1x32xf32, #tpu.memory_space<vmem>>, vector<1x32xf32>,
    %c0_236 = arith.constant 0 : index
    %c0_237 = arith.constant 0 : index
    %673 = vector.load %arg19[%c0_236, %c0_237] : memref<1x64xf32, #tpu.memory_space<vmem>>, vector<1x64xf32>
    tpu.vector_store %arg19[%c0_236, %c0_237], %578 {strides = array<i32>} : memref<1x64xf32, #tpu.memory_space<vmem>>, vector<1x64xf32>,
    return
  }
}

</mosaic_0001>

<bundles_post_ra>
// kernel: tpu_custom_call.1
= control target key start
LH: loop header
LB: loop body
LE: loop exit
PB: predicated region body
PF: predicated region fallthrough
CT: control target
= control target key end

     0   :  { %s5999_s0 = inlined_call_operand.hbm [shape: f32[8,32], index: 0, kind: input, shape index: {}]   ;;  %s6000_s1 = inlined_call_operand.vmem [shape: f32[64,32], index: 1, kind: input, shape index: {}]   ;;  %s6001_s2 = inlined_call_operand.vmem [shape: f32[1,64], index: 2, kind: input, shape index: {}]   ;;  %s6002_s3 = inlined_call_operand.vmem [shape: f32[64,64], index: 3, kind: input, shape index: {}]   ;;  %s6003_s4 = inlined_call_operand.vmem [shape: f32[1,64], index: 4, kind: input, shape index: {}]   ;;  %s6004_s5 = inlined_call_operand.vmem [shape: f32[32,64], index: 5, kind: input, shape index: {}]   ;;  %s6005_s6 = inlined_call_operand.vmem [shape: f32[1,32], index: 6, kind: input, shape index: {}]   ;;  %s6006_s7 = inlined_call_operand.vmem [shape: f32[1,64], index: 7, kind: input, shape index: {}]   ;;  %s6007_s8 = inlined_call_operand.vmem [shape: f32[1,32], index: 8, kind: input, shape index: {}]   ;;  %s6008_s9 = inlined_call_operand.vmem [shape: f32[1,64], index: 9, kind: input, shape index: {}]   ;;  %s6009_s10 = inlined_call_operand.vmem [shape: f32[1,64], index: 10, kind: input, shape index: {}]   ;;  %s6010_s11 = inlined_call_operand.vmem [shape: f32[1,32], index: 11, kind: input, shape index: {}]   ;;  %s6011_s12 = inlined_call_operand.vmem [shape: f32[1,64], index: 12, kind: input, shape index: {}]   ;;  %s6012_s13 = inlined_call_operand.hbm [shape: f32[8,32], index: 13, kind: output, shape index: {0}]   ;;  %s6013_s14 = inlined_call_operand.hbm [shape: f32[1,64], index: 14, kind: output, shape index: {1}]   ;;  %s6014_s15 = inlined_call_operand.hbm [shape: f32[1,32], index: 15, kind: output, shape index: {2}]   ;;  %s6015_s16 = inlined_call_operand.hbm [shape: f32[1,64], index: 16, kind: output, shape index: {3}]   ;;  %s6016_s17 = inlined_call_operand.hbm [shape: f32[1,64], index: 17, kind: output, shape index: {4}]   ;;  %s6017_s18 = inlined_call_operand.hbm [shape: f32[1,32], index: 18, kind: output, shape index: {5}]   ;;  %s6018_s19 = inlined_call_operand.hbm [shape: f32[1,64], index: 19, kind: output, shape index: {6}]  }
   0x1   :  { %6021 = sst [smem:[#allocation20_spill]] %s5999_s0 }
   0x2   :  { %6022 = sst [smem:[#allocation21_spill]] %s6000_s1 }
   0x3   :  { %6023 = sst [smem:[#allocation22_spill]] %s6001_s2 }
   0x4   :  { %6024 = sst [smem:[#allocation23_spill]] %s6002_s3 }
   0x5   :  { %25 = vsyncpa [#allocation3], 0 }
   0x6   :  { %26 = vsyncpa [#allocation4], 0 }
   0x7   :  { %27 = vsyncpa [#allocation7], 0 }
   0x8   :  { %28 = vsyncpa [#allocation10], 0 }
   0x9   :  { %29 = vsyncpa [#allocation13], 0  ;;  %s6025_s29 = sld [smem:[#allocation20_spill]]  ;;  %s4406_s30 = smov [#allocation2]  }
   0xa   :  { %s37_s20 = sshll.u32 %s4406_s30, 4  ;;  %s38_s20 = int_to_ptr.vmem [resolvable:$true] %s37_s20 }
   0xf   :  { %s35_s0 = sshll.u32 %s6025_s29, 4  ;;  %s36_s0 = int_to_ptr.hbm [resolvable:$true] %s35_s0 }
  0x10   :  { %40 = dma.hbm_to_vmem [thread:$0]  %s36_s0, 128, %s38_s20, [#allocation3]  }
  0x11   :  { %4396 = dma.done.wait [#allocation3], 128  }
  0x12   :  { %4397 = vsyncadd [#allocation3], 4294967168  ;;  %s6026_s22 = sld [smem:[#allocation21_spill]]  ;;  %vm92_vm0 = vcmask 523264   ;;  %v89_v14 = vld [vmem:[%s6006_s7] sm:$0x1] }
  0x13   :  { %s6027_s25 = sld [smem:[#allocation23_spill]]  ;;  %v90_v17 = vld [vmem:[%s6008_s9] sm:$0x1]  ;;  %v4651_v18 = vld [vmem:[%s6004_s5 + $0x18] sm:$0xff]  ;;  %v4656_v19 = vld [vmem:[%s6004_s5 + $0x10] sm:$0xff]  ;;  %vm193_vm1 = vcmask 261120  }
  0x14   :  { %209 = vmatpush.msra.mxu3 %v4651_v18  ;;  %v4668_v20 = vld [vmem:[%s6004_s5 + $0x8] sm:$0xff]  ;;  %v4673_v21 = vld [vmem:[%s6004_s5] sm:$0xff]  ;;  %vm117_vm2 = vcmask 253952   ;;  %vm167_vm3 = vcmask 516096   ;;  %s4407_s29 = smov 1e-24  }
  0x15   :  { %v91_v22 = vld [vmem:[%s6010_s11] sm:$0x1] }
  0x16   :  { %210 = vmatpush.msra.mxu3 %v4656_v19 }
  0x18   :  { %v4523_v0 = vld [vmem:[%s6026_s22 + $0x38] sm:$0xff]  ;;  %v4528_v1 = vld [vmem:[%s6026_s22 + $0x30] sm:$0xff]  ;;  %v4534_v2 = vld [vmem:[%s6026_s22 + $0x28] sm:$0xff]  ;;  %211 = vmatpush.msra.mxu3 %v4668_v20 }
  0x19   :  { %104 = vmatpush.msra.mxu0 %v4523_v0  ;;  %v4540_v3 = vld [vmem:[%s6027_s25 + $0x38] sm:$0xff]  ;;  %v4545_v4 = vld [vmem:[%s6027_s25 + $0x30] sm:$0xff]  ;;  %v4550_v5 = vld [vmem:[%s6026_s22 + $0x20] sm:$0xff] }
  0x1a   :  { %154 = vmatpush.msra.mxu1 %v4540_v3  ;;  %3467 = vmatpush.xpose.msk.msra.mxu2 %vm92_vm0, %v4540_v3  ;;  %v4559_v6 = vld [vmem:[%s6026_s22 + $0x18] sm:$0xff]  ;;  %v4564_v7 = vld [vmem:[%s6027_s25 + $0x28] sm:$0xff]  ;;  %v4571_v8 = vld [vmem:[%s6027_s25 + $0x20] sm:$0xff] }
  0x1b   :  { %105 = vmatpush.msra.mxu0 %v4528_v1  ;;  %v4576_v9 = vld [vmem:[%s6026_s22 + $0x10] sm:$0xff]  ;;  %v4585_v10 = vld [vmem:[%s6027_s25 + $0x18] sm:$0xff]  ;;  %v4590_v11 = vld [vmem:[%s6026_s22 + $0x8] sm:$0xff]  ;;  %212 = vmatpush.msra.mxu3 %v4673_v21 }
  0x1c   :  { %155 = vmatpush.msra.mxu1 %v4545_v4  ;;  %v4597_v12 = vld [vmem:[%s6027_s25 + $0x10] sm:$0xff]  ;;  %v4602_v13 = vld [vmem:[%s6026_s22] sm:$0xff]  ;;  %v4614_v15 = vld [vmem:[%s6027_s25 + $0x8] sm:$0xff]  ;;  %3457 = vmatmul.msk.f32.vlgmr.msra.gmra.mxu3 %vm193_vm1, %v91_v22 }
  0x1d   :  { %106 = vmatpush.msra.mxu0 %v4534_v2  ;;  %v4621_v16 = vld [vmem:[%s6027_s25] sm:$0xff]  ;;  %3458 = vmatpush.xpose.msk.msrb.mxu3 %vm193_vm1, %v4523_v0 }
  0x1e   :  { %156 = vmatpush.msra.mxu1 %v4564_v7  ;;  %3468 = vmatpush.xpose.msk.msra.mxu2 %vm92_vm0, %v4545_v4 }
  0x1f   :  { %107 = vmatpush.msra.mxu0 %v4550_v5 }
  0x20   :  { %157 = vmatpush.msra.mxu1 %v4571_v8 }
  0x21   :  { %108 = vmatpush.msra.mxu0 %v4559_v6  ;;  %3459 = vmatpush.xpose.msk.msrb.mxu3 %vm193_vm1, %v4528_v1 }
  0x22   :  { %158 = vmatpush.msra.mxu1 %v4585_v10  ;;  %3469 = vmatpush.xpose.msk.msra.mxu2 %vm92_vm0, %v4564_v7 }
  0x23   :  { %109 = vmatpush.msra.mxu0 %v4576_v9 }
  0x24   :  { %159 = vmatpush.msra.mxu1 %v4597_v12 }
  0x25   :  { %110 = vmatpush.msra.mxu0 %v4590_v11  ;;  %3460 = vmatpush.xpose.msk.msrb.mxu3 %vm193_vm1, %v4534_v2 }
  0x26   :  { %160 = vmatpush.msra.mxu1 %v4614_v15  ;;  %3470 = vmatpush.xpose.msk.msra.mxu2 %vm92_vm0, %v4571_v8 }
  0x27   :  { %111 = vmatpush.msra.mxu0 %v4602_v13 }
  0x28   :  { %3455 = vmatmul.msk.f32.vlgmr.msra.gmra.mxu0 %vm92_vm0, %v89_v14  ;;  %161 = vmatpush.msra.mxu1 %v4621_v16 }
  0x29   :  { %3456 = vmatmul.msk.f32.vlgmr.msra.gmra.mxu1 %vm92_vm0, %v90_v17  ;;  %3476 = vmatpush.xpose.msk.msrb.mxu0 %vm92_vm0, %v4651_v18 }
  0x2a   :  { %461 = vmatpush.msrb.mxu1 %v4523_v0  ;;  %3471 = vmatpush.xpose.msk.msra.mxu2 %vm92_vm0, %v4585_v10 }
  0x2b   :  { %3461 = vmatpush.xpose.msk.msrb.mxu3 %vm193_vm1, %v4550_v5 }
  0x2c   :  { %462 = vmatpush.msrb.mxu1 %v4528_v1 }
  0x2d   :  { %3477 = vmatpush.xpose.msk.msrb.mxu0 %vm92_vm0, %v4656_v19 }
  0x2e   :  { %463 = vmatpush.msrb.mxu1 %v4534_v2  ;;  %3472 = vmatpush.xpose.msk.msra.mxu2 %vm92_vm0, %v4597_v12 }
  0x2f   :  { %3462 = vmatpush.xpose.msk.msrb.mxu3 %vm193_vm1, %v4559_v6 }
  0x30   :  { %464 = vmatpush.msrb.mxu1 %v4550_v5 }
  0x31   :  { %3478 = vmatpush.xpose.msk.msrb.mxu0 %vm92_vm0, %v4668_v20 }
  0x32   :  { %465 = vmatpush.msrb.mxu1 %v4559_v6  ;;  %3473 = vmatpush.xpose.msk.msra.mxu2 %vm92_vm0, %v4614_v15 }
  0x33   :  { %3463 = vmatpush.xpose.msk.msrb.mxu3 %vm193_vm1, %v4576_v9 }
  0x34   :  { %466 = vmatpush.msrb.mxu1 %v4576_v9 }
  0x35   :  { %3479 = vmatpush.xpose.msk.msrb.mxu0 %vm92_vm0, %v4673_v21 }
  0x36   :  { %467 = vmatpush.msrb.mxu1 %v4590_v11  ;;  %3474 = vmatpush.xpose.msk.msra.mxu2 %vm92_vm0, %v4621_v16 }
  0x37   :  { %3464 = vmatpush.xpose.msk.msrb.mxu3 %vm193_vm1, %v4590_v11 }
  0x38   :  { %468 = vmatpush.msrb.mxu1 %v4602_v13 }
  0x39   :  { %510 = vmatpush.msra.mxu0 %v4540_v3 }
  0x3a   :  { %563 = vmatpush.msra.mxu1 %v4651_v18  ;;  %3502 = vmatpush.xpose.msk.msrb.mxu2 %vm92_vm0, %v4651_v18 }
  0x3b   :  { %511 = vmatpush.msra.mxu0 %v4545_v4  ;;  %3465 = vmatpush.xpose.msk.msrb.mxu3 %vm193_vm1, %v4602_v13 }
  0x3c   :  { %564 = vmatpush.msra.mxu1 %v4656_v19 }
  0x3d   :  { %512 = vmatpush.msra.mxu0 %v4564_v7 }
  0x3e   :  { %565 = vmatpush.msra.mxu1 %v4668_v20  ;;  %3503 = vmatpush.xpose.msk.msrb.mxu2 %vm92_vm0, %v4656_v19 }
  0x3f   :  { %513 = vmatpush.msra.mxu0 %v4571_v8  ;;  %3484 = vmatpush.xpose.msk.msra.mxu3 %vm193_vm1, %v4523_v0 }
  0x40   :  { %566 = vmatpush.msra.mxu1 %v4673_v21 }
  0x41   :  { %514 = vmatpush.msra.mxu0 %v4585_v10 }
  0x42   :  { %3504 = vmatpush.xpose.msk.msrb.mxu2 %vm92_vm0, %v4668_v20 }
  0x43   :  { %515 = vmatpush.msra.mxu0 %v4597_v12  ;;  %3485 = vmatpush.xpose.msk.msra.mxu3 %vm193_vm1, %v4528_v1 }
  0x45   :  { %516 = vmatpush.msra.mxu0 %v4614_v15 }
  0x46   :  { %3505 = vmatpush.xpose.msk.msrb.mxu2 %vm92_vm0, %v4673_v21 }
  0x47   :  { %517 = vmatpush.msra.mxu0 %v4621_v16  ;;  %3486 = vmatpush.xpose.msk.msra.mxu3 %vm193_vm1, %v4534_v2 }
  0x4b   :  { %3487 = vmatpush.xpose.msk.msra.mxu3 %vm193_vm1, %v4550_v5 }
  0x4f   :  { %3488 = vmatpush.xpose.msk.msra.mxu3 %vm193_vm1, %v4559_v6 }
  0x53   :  { %3489 = vmatpush.xpose.msk.msra.mxu3 %vm193_vm1, %v4576_v9 }
  0x57   :  { %3490 = vmatpush.xpose.msk.msra.mxu3 %vm193_vm1, %v4590_v11 }
  0x5b   :  { %3491 = vmatpush.xpose.msk.msra.mxu3 %vm193_vm1, %v4602_v13 }
  0x9f   :  { %v4742_v29 = vpop.f32.mrf.mxu3 }
  0xa0   :  { %v217_v30 = vmul.f32 %v4742_v29, %v4742_v29 }
  0xa2   :  { %v218_v31 = vsel %vm167_vm3, %v217_v30, 0.0 }
  0xa3   :  { %219 = vadd.xlane.f32.xlu1 %v218_v31 }
  0xa5   :  { %v113_v23 = vpop.f32.mrf.mxu0 }
  0xa6   :  { %v116_v24 = vmul.f32 %v113_v23, %v113_v23  ;;  %v4719_v26 = vpop.f32.mrf.mxu1 }
  0xa7   :  { %v166_v27 = vmul.f32 %v4719_v26, %v4719_v26 }
  0xa8   :  { %v118_v25 = vsel %vm117_vm2, %v116_v24, 0.0 }
  0xa9   :  { %119 = vadd.xlane.f32.xlu0 %v118_v25  ;;  %v168_v28 = vsel %vm167_vm3, %v166_v27, 0.0 }
  0xb1   :  { %169 = vadd.xlane.f32.xlu0 %v168_v28 }
 0x116   :  { %v220_v54 = vpop.xlane.xlu1 %219 }
 0x117   :  { %v221_v55 = vrot.slane %v220_v54, 4 }
 0x119   :  { %v222_v59 = vadd.f32 %v221_v55, %v220_v54 }
 0x11b   :  { %v223_v60 = vrot.slane %v222_v59, 2 }
 0x11c   :  { %v120_v32 = vpop.xlane.xlu0 %119 }
 0x11d   :  { %v121_v33 = vrot.slane %v120_v32, 4  ;;  %v224_v63 = vadd.f32 %v223_v60, %v222_v59 }
 0x11f   :  { %v122_v34 = vadd.f32 %v121_v33, %v120_v32  ;;  %v225_v22 = vrot.slane %v224_v63, 1 }
 0x121   :  { %v123_v35 = vrot.slane %v122_v34, 2  ;;  %v226_v25 = vadd.f32 %v225_v22, %v224_v63 }
 0x123   :  { %v124_v36 = vadd.f32 %v123_v35, %v122_v34 }
 0x124   :  { %v170_v39 = vpop.xlane.xlu0 %169 }
 0x125   :  { %v125_v37 = vrot.slane %v124_v36, 1  ;;  %v171_v40 = vrot.slane %v170_v39, 4 }
 0x127   :  { %v126_v38 = vadd.f32 %v125_v37, %v124_v36  ;;  %v172_v42 = vadd.f32 %v171_v40, %v170_v39 }
 0x129   :  { %3740 = vpush %v126_v38  ;;  %v173_v43 = vrot.slane %v172_v42, 2 }
 0x12b   :  { %v174_v46 = vadd.f32 %v173_v43, %v172_v42 }
 0x12d   :  { %v175_v49 = vrot.slane %v174_v46, 1 }
 0x12f   :  { %v176_v52 = vadd.f32 %v175_v49, %v174_v46 }
 0x15a   :  { %s3741_s11 = spop %3740 }
 0x15b   :  { %s128_s0 = smax.f32 %s4407_s29, %s3741_s11 }
 0x15c   :  { %v129_v41 = vstv %s128_s0 }
 0x15d   :  { %4008 = vrsqrt.f32 %v129_v41  ;;  %vm136_vm5 = vweird.f32 %v129_v41 }
 0x163   :  { %v4009_v44 = vpop.eup %4008 }
 0x164   :  { %v131_v45 = vmul.f32 %v4009_v44, %v129_v41  ;;  %vm137_vm4 = vweird.f32 %v4009_v44 }
 0x165   :  { %vm138_vm6 = vmor %vm136_vm5, %vm137_vm4 }
 0x166   :  { %v132_v47 = vmul.f32 %v4009_v44, %v131_v45 }
 0x168   :  { %v133_v48 = vmul.f32 0.5, %v132_v47 }
 0x16a   :  { %v134_v50 = vsub.f32 1.5, %v133_v48 }
 0x16c   :  { %v135_v51 = vmul.f32 %v4009_v44, %v134_v50 }
 0x16e   :  { %v139_v53 = vsel %vm138_vm6, %v4009_v44, %v135_v51 }
 0x16f   :  { %3742 = vpush %v139_v53 }
 0x170   :  { %3744 = vpush %v176_v52 }
 0x1a0   :  { %s3743_s30 = spop %3742 }
 0x1a1   :  { %v141_v56 = vstv %s3743_s30  ;;  %s3745_s20 = spop %3744 }
 0x1a2   :  { %v142_v57 = vmul.f32 %v141_v56, %v113_v23  ;;  %s178_s21 = smax.f32 %s4407_s29, %s3745_s20 }
 0x1a3   :  { %v179_v58 = vstv %s178_s21 }
 0x1a4   :  { %4010 = vrsqrt.f32 %v179_v58  ;;  %3466 = vmatmul.msk.f32.vlgmr.msrb.gmra.mxu3 %vm193_vm1, %v142_v57  ;;  %vm186_vm7 = vweird.f32 %v179_v58 }
 0x1a5   :  { %3510 = vmatpush.xpose.msk.msrb.mxu3 %vm193_vm1, %v4523_v0 }
 0x1a9   :  { %3511 = vmatpush.xpose.msk.msrb.mxu3 %vm193_vm1, %v4528_v1 }
 0x1aa   :  { %v4011_v61 = vpop.eup %4010 }
 0x1ab   :  { %v181_v62 = vmul.f32 %v4011_v61, %v179_v58  ;;  %vm187_vm8 = vweird.f32 %v4011_v61 }
 0x1ac   :  { %vm188_vm9 = vmor %vm186_vm7, %vm187_vm8 }
 0x1ad   :  { %v182_v14 = vmul.f32 %v4011_v61, %v181_v62  ;;  %3512 = vmatpush.xpose.msk.msrb.mxu3 %vm193_vm1, %v4534_v2 }
 0x1af   :  { %v183_v17 = vmul.f32 0.5, %v182_v14 }
 0x1b1   :  { %v184_v23 = vsub.f32 1.5, %v183_v17  ;;  %3513 = vmatpush.xpose.msk.msrb.mxu3 %vm193_vm1, %v4550_v5 }
 0x1b3   :  { %v185_v24 = vmul.f32 %v4011_v61, %v184_v23 }
 0x1b5   :  { %v189_v27 = vsel %vm188_vm9, %v4011_v61, %v185_v24  ;;  %3514 = vmatpush.xpose.msk.msrb.mxu3 %vm193_vm1, %v4559_v6 }
 0x1b6   :  { %3746 = vpush %v189_v27 }
 0x1b7   :  { %3748 = vpush %v226_v25 }
 0x1b9   :  { %3515 = vmatpush.xpose.msk.msrb.mxu3 %vm193_vm1, %v4576_v9 }
 0x1bd   :  { %3516 = vmatpush.xpose.msk.msrb.mxu3 %vm193_vm1, %v4590_v11 }
 0x1c1   :  { %3517 = vmatpush.xpose.msk.msrb.mxu3 %vm193_vm1, %v4602_v13 }
 0x1e7   :  { %s3747_s1 = spop %3746 }
 0x1e8   :  { %v191_v28 = vstv %s3747_s1  ;;  %s3749_s2 = spop %3748 }
 0x1e9   :  { %v192_v30 = vmul.f32 %v191_v28, %v4719_v26  ;;  %s228_s7 = smax.f32 %s4407_s29, %s3749_s2 }
 0x1ea   :  { %v229_v31 = vstv %s228_s7 }
 0x1eb   :  { %4012 = vrsqrt.f32 %v229_v31  ;;  %3475 = vmatmul.msk.f32.vlgmr.msra.gmra.mxu2 %vm92_vm0, %v192_v30  ;;  %vm236_vm10 = vweird.f32 %v229_v31 }
 0x1ec   :  { %804 = vmatpush.msra.mxu2 %v4540_v3 }
 0x1ee   :  { %805 = vmatpush.msra.mxu2 %v4545_v4 }
 0x1f0   :  { %806 = vmatpush.msra.mxu2 %v4564_v7 }
 0x1f1   :  { %v4013_v32 = vpop.eup %4012 }
 0x1f2   :  { %v231_v33 = vmul.f32 %v4013_v32, %v229_v31  ;;  %807 = vmatpush.msra.mxu2 %v4571_v8  ;;  %vm237_vm11 = vweird.f32 %v4013_v32 }
 0x1f3   :  { %vm238_vm12 = vmor %vm236_vm10, %vm237_vm11 }
 0x1f4   :  { %v232_v34 = vmul.f32 %v4013_v32, %v231_v33  ;;  %808 = vmatpush.msra.mxu2 %v4585_v10 }
 0x1f6   :  { %v233_v26 = vmul.f32 0.5, %v232_v34  ;;  %809 = vmatpush.msra.mxu2 %v4597_v12 }
 0x1f8   :  { %v234_v35 = vsub.f32 1.5, %v233_v26  ;;  %810 = vmatpush.msra.mxu2 %v4614_v15 }
 0x1fa   :  { %v235_v36 = vmul.f32 %v4013_v32, %v234_v35  ;;  %811 = vmatpush.msra.mxu2 %v4621_v16 }
 0x1fc   :  { %v239_v37 = vsel %vm238_vm12, %v4013_v32, %v235_v36 }
 0x1fd   :  { %3750 = vpush %v239_v37 }
 0x227   :  { %v287_v38 = vpop.f32.mrf.mxu3 }
 0x228   :  { %v290_v39 = vmul.f32 %v287_v38, %v287_v38 }
 0x22a   :  { %v291_v40 = vsel %vm167_vm3, %v290_v39, 0.0 }
 0x22b   :  { %292 = vadd.xlane.f32.xlu1 %v291_v40 }
 0x22e   :  { %s3751_s9 = spop %3750 }
 0x22f   :  { %v241_v41 = vstv %s3751_s9 }
 0x230   :  { %v242_v42 = vmul.f32 %v241_v41, %v4742_v29 }
 0x232   :  { %3480 = vmatmul.msk.f32.vlgmr.msrb.gmra.mxu0 %vm92_vm0, %v242_v42 }
 0x233   :  { %755 = vmatpush.msrb.mxu0 %v4523_v0 }
 0x235   :  { %756 = vmatpush.msrb.mxu0 %v4528_v1 }
 0x237   :  { %757 = vmatpush.msrb.mxu0 %v4534_v2 }
 0x239   :  { %758 = vmatpush.msrb.mxu0 %v4550_v5 }
 0x23b   :  { %759 = vmatpush.msrb.mxu0 %v4559_v6 }
 0x23d   :  { %760 = vmatpush.msrb.mxu0 %v4576_v9 }
 0x23f   :  { %761 = vmatpush.msrb.mxu0 %v4590_v11 }
 0x241   :  { %762 = vmatpush.msrb.mxu0 %v4602_v13 }
 0x26e   :  { %v4788_v43 = vpop.f32.mrf.mxu2 }
 0x26f   :  { %v363_v29 = vmul.f32 %v4788_v43, %v4788_v43 }
 0x271   :  { %v364_v44 = vsel %vm167_vm3, %v363_v29, 0.0 }
 0x272   :  { %365 = vadd.xlane.f32.xlu2 %v364_v44 }
 0x29e   :  { %v293_v45 = vpop.xlane.xlu1 %292 }
 0x29f   :  { %v294_v46 = vrot.slane %v293_v45, 4 }
 0x2a1   :  { %v295_v47 = vadd.f32 %v294_v46, %v293_v45 }
 0x2a3   :  { %v296_v48 = vrot.slane %v295_v47, 2 }
 0x2a5   :  { %v297_v49 = vadd.f32 %v296_v48, %v295_v47 }
 0x2a7   :  { %v298_v50 = vrot.slane %v297_v49, 1 }
 0x2a9   :  { %v299_v51 = vadd.f32 %v298_v50, %v297_v49 }
 0x2ab   :  { %3752 = vpush %v299_v51 }
 0x2af   :  { %v4793_v52 = vpop.f32.mrf.mxu0 }
 0x2b0   :  { %v424_v53 = vmul.f32 %v4793_v52, %v4793_v52 }
 0x2b2   :  { %v425_v54 = vsel %vm117_vm2, %v424_v53, 0.0 }
 0x2b3   :  { %426 = vadd.xlane.f32.xlu2 %v425_v54 }
 0x2dc   :  { %s3753_s8 = spop %3752 }
 0x2dd   :  { %s301_s23 = smax.f32 %s4407_s29, %s3753_s8 }
 0x2de   :  { %v302_v55 = vstv %s301_s23 }
 0x2df   :  { %4014 = vrsqrt.f32 %v302_v55  ;;  %vm309_vm14 = vweird.f32 %v302_v55 }
 0x2e5   :  { %v4015_v56 = vpop.eup %4014  ;;  %v366_v57 = vpop.xlane.xlu2 %365 }
 0x2e6   :  { %v304_v58 = vmul.f32 %v4015_v56, %v302_v55  ;;  %v367_v59 = vrot.slane %v366_v57, 4  ;;  %vm310_vm13 = vweird.f32 %v4015_v56 }
 0x2e7   :  { %vm311_vm15 = vmor %vm309_vm14, %vm310_vm13 }
 0x2e8   :  { %v305_v60 = vmul.f32 %v4015_v56, %v304_v58  ;;  %v368_v61 = vadd.f32 %v367_v59, %v366_v57 }
 0x2ea   :  { %v306_v62 = vmul.f32 0.5, %v305_v60  ;;  %v369_v63 = vrot.slane %v368_v61, 2 }
 0x2ec   :  { %v307_v14 = vsub.f32 1.5, %v306_v62  ;;  %v370_v17 = vadd.f32 %v369_v63, %v368_v61 }
 0x2ee   :  { %v308_v22 = vmul.f32 %v4015_v56, %v307_v14  ;;  %v371_v23 = vrot.slane %v370_v17, 1 }
 0x2f0   :  { %v312_v24 = vsel %vm311_vm15, %v4015_v56, %v308_v22  ;;  %v372_v25 = vadd.f32 %v371_v23, %v370_v17 }
 0x2f1   :  { %3754 = vpush %v312_v24 }
 0x2f2   :  { %3756 = vpush %v372_v25 }
 0x322   :  { %s3755_s24 = spop %3754 }
 0x323   :  { %v314_v27 = vstv %s3755_s24  ;;  %s3757_s3 = spop %3756 }
 0x324   :  { %v315_v28 = vmul.f32 %v314_v27, %v287_v38  ;;  %s374_s10 = smax.f32 %s4407_s29, %s3757_s3 }
 0x325   :  { %v375_v30 = vstv %s374_s10 }
 0x326   :  { %4016 = vrsqrt.f32 %v375_v30  ;;  %v427_v31 = vpop.xlane.xlu2 %426  ;;  %3481 = vmatmul.msk.f32.vlgmr.msrb.gmra.mxu1 %vm92_vm0, %v315_v28  ;;  %vm382_vm5 = vweird.f32 %v375_v30 }
 0x327   :  { %v428_v32 = vrot.slane %v427_v31, 4  ;;  %3493 = vmatpush.xpose.msk.msrb.mxu1 %vm92_vm0, %v4540_v3 }
 0x329   :  { %v429_v33 = vadd.f32 %v428_v32, %v427_v31 }
 0x32b   :  { %v430_v34 = vrot.slane %v429_v33, 2  ;;  %3494 = vmatpush.xpose.msk.msrb.mxu1 %vm92_vm0, %v4545_v4 }
 0x32c   :  { %v4017_v26 = vpop.eup %4016 }
 0x32d   :  { %v377_v35 = vmul.f32 %v4017_v26, %v375_v30  ;;  %v431_v37 = vadd.f32 %v430_v34, %v429_v33  ;;  %vm383_vm4 = vweird.f32 %v4017_v26 }
 0x32e   :  { %vm384_vm6 = vmor %vm382_vm5, %vm383_vm4 }
 0x32f   :  { %v378_v36 = vmul.f32 %v4017_v26, %v377_v35  ;;  %3495 = vmatpush.xpose.msk.msrb.mxu1 %vm92_vm0, %v4564_v7  ;;  %v432_v40 = vrot.slane %v431_v37, 1 }
 0x331   :  { %v379_v38 = vmul.f32 0.5, %v378_v36  ;;  %v433_v29 = vadd.f32 %v432_v40, %v431_v37 }
 0x333   :  { %v380_v39 = vsub.f32 1.5, %v379_v38  ;;  %3496 = vmatpush.xpose.msk.msrb.mxu1 %vm92_vm0, %v4571_v8 }
 0x335   :  { %v381_v41 = vmul.f32 %v4017_v26, %v380_v39 }
 0x337   :  { %v385_v42 = vsel %vm384_vm6, %v4017_v26, %v381_v41  ;;  %3497 = vmatpush.xpose.msk.msrb.mxu1 %vm92_vm0, %v4585_v10 }
 0x338   :  { %3758 = vpush %v385_v42 }
 0x339   :  { %3760 = vpush %v433_v29 }
 0x33b   :  { %3498 = vmatpush.xpose.msk.msrb.mxu1 %vm92_vm0, %v4597_v12 }
 0x33f   :  { %3499 = vmatpush.xpose.msk.msrb.mxu1 %vm92_vm0, %v4614_v15 }
 0x343   :  { %3500 = vmatpush.xpose.msk.msrb.mxu1 %vm92_vm0, %v4621_v16 }
 0x369   :  { %s3759_s26 = spop %3758 }
 0x36a   :  { %v387_v44 = vstv %s3759_s26  ;;  %s3761_s12 = spop %3760 }
 0x36b   :  { %v388_v45 = vmul.f32 %v387_v44, %v4788_v43  ;;  %s435_s27 = smax.f32 %s4407_s29, %s3761_s12 }
 0x36c   :  { %v436_v46 = vstv %s435_s27 }
 0x36d   :  { %4018 = vrsqrt.f32 %v436_v46  ;;  %3482 = vmatmul.msk.f32.vlgmr.msra.gmra.mxu0 %vm92_vm0, %v388_v45  ;;  %vm443_vm8 = vweird.f32 %v436_v46 }
 0x36e   :  { %3519 = vmatpush.xpose.msk.msra.mxu0 %vm92_vm0, %v4540_v3 }
 0x372   :  { %3520 = vmatpush.xpose.msk.msra.mxu0 %vm92_vm0, %v4545_v4 }
 0x373   :  { %v4019_v47 = vpop.eup %4018 }
 0x374   :  { %v438_v48 = vmul.f32 %v4019_v47, %v436_v46  ;;  %vm444_vm7 = vweird.f32 %v4019_v47 }
 0x375   :  { %vm445_vm9 = vmor %vm443_vm8, %vm444_vm7 }
 0x376   :  { %v439_v49 = vmul.f32 %v4019_v47, %v438_v48  ;;  %3521 = vmatpush.xpose.msk.msra.mxu0 %vm92_vm0, %v4564_v7 }
 0x378   :  { %v440_v50 = vmul.f32 0.5, %v439_v49 }
 0x37a   :  { %v441_v43 = vsub.f32 1.5, %v440_v50  ;;  %3522 = vmatpush.xpose.msk.msra.mxu0 %vm92_vm0, %v4571_v8 }
 0x37c   :  { %v442_v51 = vmul.f32 %v4019_v47, %v441_v43 }
 0x37e   :  { %v446_v53 = vsel %vm445_vm9, %v4019_v47, %v442_v51  ;;  %3523 = vmatpush.xpose.msk.msra.mxu0 %vm92_vm0, %v4585_v10 }
 0x37f   :  { %3762 = vpush %v446_v53 }
 0x382   :  { %3524 = vmatpush.xpose.msk.msra.mxu0 %vm92_vm0, %v4597_v12 }
 0x386   :  { %3525 = vmatpush.xpose.msk.msra.mxu0 %vm92_vm0, %v4614_v15 }
 0x38a   :  { %3526 = vmatpush.xpose.msk.msra.mxu0 %vm92_vm0, %v4621_v16 }
 0x3a3   :  { %v470_v54 = vpop.f32.mrf.mxu1 }
 0x3a4   :  { %v473_v55 = vmul.f32 %v470_v54, %v470_v54 }
 0x3a6   :  { %v474_v56 = vsel %vm117_vm2, %v473_v55, 0.0 }
 0x3a7   :  { %475 = vadd.xlane.f32.xlu0 %v474_v56 }
 0x3b0   :  { %s3763_s28 = spop %3762 }
 0x3b1   :  { %v448_v57 = vstv %s3763_s28 }
 0x3b2   :  { %v449_v58 = vmul.f32 %v448_v57, %v4793_v52 }
 0x3b4   :  { %3483 = vmatmul.msk.f32.vlgmr.msra.gmra.mxu1 %vm193_vm1, %v449_v58 }
 0x3b5   :  { %857 = vmatpush.msra.mxu1 %v4651_v18 }
 0x3b7   :  { %858 = vmatpush.msra.mxu1 %v4656_v19 }
 0x3b9   :  { %859 = vmatpush.msra.mxu1 %v4668_v20 }
 0x3bb   :  { %860 = vmatpush.msra.mxu1 %v4673_v21 }
 0x3ea   :  { %v4843_v59 = vpop.f32.mrf.mxu0 }
 0x3eb   :  { %v522_v60 = vmul.f32 %v4843_v59, %v4843_v59 }
 0x3ed   :  { %v523_v61 = vsel %vm167_vm3, %v522_v60, 0.0 }
 0x3ee   :  { %524 = vadd.xlane.f32.xlu1 %v523_v61 }
 0x41a   :  { %v476_v62 = vpop.xlane.xlu0 %475 }
 0x41b   :  { %v477_v52 = vrot.slane %v476_v62, 4 }
 0x41d   :  { %v478_v63 = vadd.f32 %v477_v52, %v476_v62 }
 0x41f   :  { %v479_v14 = vrot.slane %v478_v63, 2 }
 0x421   :  { %v480_v17 = vadd.f32 %v479_v14, %v478_v63 }
 0x423   :  { %v481_v22 = vrot.slane %v480_v17, 1 }
 0x425   :  { %v482_v23 = vadd.f32 %v481_v22, %v480_v17 }
 0x427   :  { %3764 = vpush %v482_v23 }
 0x431   :  { %v4848_v24 = vpop.f32.mrf.mxu1 }
 0x432   :  { %v571_v25 = vmul.f32 %v4848_v24, %v4848_v24 }
 0x434   :  { %v572_v27 = vsel %vm167_vm3, %v571_v25, 0.0 }
 0x435   :  { %573 = vadd.xlane.f32.xlu2 %v572_v27 }
 0x458   :  { %s3765_s11 = spop %3764 }
 0x459   :  { %s484_s0 = smax.f32 %s4407_s29, %s3765_s11 }
 0x45a   :  { %v485_v28 = vstv %s484_s0 }
 0x45b   :  { %4020 = vrsqrt.f32 %v485_v28  ;;  %vm492_vm11 = vweird.f32 %v485_v28 }
 0x461   :  { %v4021_v30 = vpop.eup %4020  ;;  %v525_v31 = vpop.xlane.xlu1 %524 }
 0x462   :  { %v487_v32 = vmul.f32 %v4021_v30, %v485_v28  ;;  %v526_v33 = vrot.slane %v525_v31, 4  ;;  %vm493_vm10 = vweird.f32 %v4021_v30 }
 0x463   :  { %vm494_vm12 = vmor %vm492_vm11, %vm493_vm10 }
 0x464   :  { %v488_v34 = vmul.f32 %v4021_v30, %v487_v32  ;;  %v527_v26 = vadd.f32 %v526_v33, %v525_v31 }
 0x466   :  { %v489_v35 = vmul.f32 0.5, %v488_v34  ;;  %v528_v36 = vrot.slane %v527_v26, 2 }
 0x468   :  { %v490_v37 = vsub.f32 1.5, %v489_v35  ;;  %v529_v38 = vadd.f32 %v528_v36, %v527_v26 }
 0x46a   :  { %v491_v39 = vmul.f32 %v4021_v30, %v490_v37  ;;  %v530_v40 = vrot.slane %v529_v38, 1 }
 0x46c   :  { %v495_v41 = vsel %vm494_vm12, %v4021_v30, %v491_v39  ;;  %v531_v42 = vadd.f32 %v530_v40, %v529_v38 }
 0x46d   :  { %3766 = vpush %v495_v41 }
 0x46e   :  { %3768 = vpush %v531_v42 }
 0x49e   :  { %s3767_s30 = spop %3766 }
 0x49f   :  { %v497_v29 = vstv %s3767_s30  ;;  %s3769_s20 = spop %3768 }
 0x4a0   :  { %v498_v44 = vmul.f32 %v497_v29, %v470_v54  ;;  %s533_s21 = smax.f32 %s4407_s29, %s3769_s20 }
 0x4a1   :  { %v534_v45 = vstv %s533_s21 }
 0x4a2   :  { %4022 = vrsqrt.f32 %v534_v45  ;;  %3492 = vmatmul.msk.f32.vlgmr.msra.gmra.mxu3 %vm193_vm1, %v498_v44  ;;  %vm541_vm14 = vweird.f32 %v534_v45 }
 0x4a3   :  { %3545 = vmatpush.xpose.msk.msra.mxu3 %vm92_vm0, %v4540_v3 }
 0x4a7   :  { %3546 = vmatpush.xpose.msk.msra.mxu3 %vm92_vm0, %v4545_v4 }
 0x4a8   :  { %v4023_v46 = vpop.eup %4022  ;;  %v574_v47 = vpop.xlane.xlu2 %573 }
 0x4a9   :  { %v536_v48 = vmul.f32 %v4023_v46, %v534_v45  ;;  %v575_v49 = vrot.slane %v574_v47, 4  ;;  %vm542_vm13 = vweird.f32 %v4023_v46 }
 0x4aa   :  { %vm543_vm15 = vmor %vm541_vm14, %vm542_vm13 }
 0x4ab   :  { %v537_v50 = vmul.f32 %v4023_v46, %v536_v48  ;;  %v576_v43 = vadd.f32 %v575_v49, %v574_v47  ;;  %3547 = vmatpush.xpose.msk.msra.mxu3 %vm92_vm0, %v4564_v7 }
 0x4ad   :  { %v538_v51 = vmul.f32 0.5, %v537_v50  ;;  %v577_v53 = vrot.slane %v576_v43, 2 }
 0x4af   :  { %v539_v54 = vsub.f32 1.5, %v538_v51  ;;  %v578_v55 = vadd.f32 %v577_v53, %v576_v43  ;;  %3548 = vmatpush.xpose.msk.msra.mxu3 %vm92_vm0, %v4571_v8 }
 0x4b1   :  { %v540_v3 = vmul.f32 %v4023_v46, %v539_v54  ;;  %v579_v4 = vrot.slane %v578_v55, 1 }
 0x4b3   :  { %v544_v56 = vsel %vm543_vm15, %v4023_v46, %v540_v3  ;;  %v580_v57 = vadd.f32 %v579_v4, %v578_v55  ;;  %3549 = vmatpush.xpose.msk.msra.mxu3 %vm92_vm0, %v4585_v10 }
 0x4b4   :  { %3770 = vpush %v544_v56 }
 0x4b5   :  { %3772 = vpush %v580_v57 }
 0x4b7   :  { %3550 = vmatpush.xpose.msk.msra.mxu3 %vm92_vm0, %v4597_v12 }
 0x4bb   :  { %3551 = vmatpush.xpose.msk.msra.mxu3 %vm92_vm0, %v4614_v15 }
 0x4bf   :  { %3552 = vmatpush.xpose.msk.msra.mxu3 %vm92_vm0, %v4621_v16 }
 0x4e5   :  { %s3771_s1 = spop %3770 }
 0x4e6   :  { %v546_v7 = vstv %s3771_s1  ;;  %s3773_s2 = spop %3772 }
 0x4e7   :  { %v547_v8 = vmul.f32 %v546_v7, %v4843_v59  ;;  %s582_s7 = smax.f32 %s4407_s29, %s3773_s2 }
 0x4e8   :  { %v583_v58 = vstv %s582_s7 }
 0x4e9   :  { %4024 = vrsqrt.f32 %v583_v58  ;;  %3501 = vmatmul.msk.f32.vlgmr.msrb.gmra.mxu1 %vm92_vm0, %v547_v8  ;;  %vm590_vm5 = vweird.f32 %v583_v58 }
 0x4ea   :  { %3528 = vmatpush.xpose.msk.msrb.mxu1 %vm92_vm0, %v4651_v18 }
 0x4ee   :  { %3529 = vmatpush.xpose.msk.msrb.mxu1 %vm92_vm0, %v4656_v19 }
 0x4ef   :  { %v4025_v10 = vpop.eup %4024 }
 0x4f0   :  { %v585_v12 = vmul.f32 %v4025_v10, %v583_v58  ;;  %vm591_vm4 = vweird.f32 %v4025_v10 }
 0x4f1   :  { %vm592_vm6 = vmor %vm590_vm5, %vm591_vm4 }
 0x4f2   :  { %v586_v15 = vmul.f32 %v4025_v10, %v585_v12  ;;  %3530 = vmatpush.xpose.msk.msrb.mxu1 %vm92_vm0, %v4668_v20 }
 0x4f4   :  { %v587_v16 = vmul.f32 0.5, %v586_v15 }
 0x4f6   :  { %v588_v59 = vsub.f32 1.5, %v587_v16  ;;  %3531 = vmatpush.xpose.msk.msrb.mxu1 %vm92_vm0, %v4673_v21 }
 0x4f8   :  { %v589_v60 = vmul.f32 %v4025_v10, %v588_v59 }
 0x4fa   :  { %v593_v61 = vsel %vm592_vm6, %v4025_v10, %v589_v60 }
 0x4fb   :  { %3774 = vpush %v593_v61 }
 0x525   :  { %v617_v62 = vpop.f32.mrf.mxu3 }
 0x526   :  { %v620_v52 = vmul.f32 %v617_v62, %v617_v62 }
 0x528   :  { %v621_v63 = vsel %vm167_vm3, %v620_v52, 0.0  ;;  %v4932_v52 = vld [vmem:[%s6027_s25 + $0x38] sm:$0xff] }
 0x529   :  { %622 = vadd.xlane.f32.xlu0 %v621_v63  ;;  %v4938_v63 = vld [vmem:[%s6027_s25 + $0x30] sm:$0xff] }
 0x52c   :  { %s3775_s9 = spop %3774 }
 0x52d   :  { %v595_v14 = vstv %s3775_s9 }
 0x52e   :  { %v596_v17 = vmul.f32 %v595_v14, %v4848_v24  ;;  %v4944_v14 = vld [vmem:[%s6027_s25 + $0x28] sm:$0xff] }
 0x530   :  { %3506 = vmatmul.msk.f32.vlgmr.msrb.gmra.mxu2 %vm92_vm0, %v596_v17  ;;  %v4950_v17 = vld [vmem:[%s6027_s25 + $0x20] sm:$0xff] }
 0x531   :  { %1049 = vmatpush.msrb.mxu2 %v4523_v0 }
 0x533   :  { %1050 = vmatpush.msrb.mxu2 %v4528_v1 }
 0x535   :  { %1051 = vmatpush.msrb.mxu2 %v4534_v2 }
 0x537   :  { %1052 = vmatpush.msrb.mxu2 %v4550_v5 }
 0x539   :  { %1053 = vmatpush.msrb.mxu2 %v4559_v6 }
 0x53b   :  { %1054 = vmatpush.msrb.mxu2 %v4576_v9 }
 0x53d   :  { %1055 = vmatpush.msrb.mxu2 %v4590_v11 }
 0x53f   :  { %1056 = vmatpush.msrb.mxu2 %v4602_v13 }
 0x566   :  { %v4894_v22 = vpop.f32.mrf.mxu1 }
 0x567   :  { %v669_v23 = vmul.f32 %v4894_v22, %v4894_v22 }
 0x569   :  { %v670_v0 = vsel %vm167_vm3, %v669_v23, 0.0  ;;  %v4962_v23 = vld [vmem:[%s6027_s25 + $0x10] sm:$0xff] }
 0x56a   :  { %671 = vadd.xlane.f32.xlu1 %v670_v0  ;;  %v4968_v0 = vld [vmem:[%s6027_s25 + $0x8] sm:$0xff] }
 0x59c   :  { %v623_v1 = vpop.xlane.xlu0 %622 }
 0x59d   :  { %v624_v2 = vrot.slane %v623_v1, 4 }
 0x59f   :  { %v625_v24 = vadd.f32 %v624_v2, %v623_v1  ;;  %v4974_v1 = vld [vmem:[%s6027_s25] sm:$0xff] }
 0x5a1   :  { %v626_v5 = vrot.slane %v625_v24, 2 }
 0x5a3   :  { %v627_v25 = vadd.f32 %v626_v5, %v625_v24 }
 0x5a5   :  { %v628_v6 = vrot.slane %v627_v25, 1 }
 0x5a7   :  { %v629_v27 = vadd.f32 %v628_v6, %v627_v25 }
 0x5a9   :  { %3776 = vpush %v629_v27 }
 0x5b3   :  { %v4899_v9 = vpop.f32.mrf.mxu2 }
 0x5b4   :  { %v718_v11 = vmul.f32 %v4899_v9, %v4899_v9 }
 0x5b6   :  { %v719_v13 = vsel %vm117_vm2, %v718_v11, 0.0 }
 0x5b7   :  { %720 = vadd.xlane.f32.xlu2 %v719_v13 }
 0x5da   :  { %s3777_s8 = spop %3776 }
 0x5db   :  { %s631_s23 = smax.f32 %s4407_s29, %s3777_s8 }
 0x5dc   :  { %v632_v28 = vstv %s631_s23 }
 0x5dd   :  { %4026 = vrsqrt.f32 %v632_v28  ;;  %v672_v30 = vpop.xlane.xlu1 %671  ;;  %vm639_vm8 = vweird.f32 %v632_v28 }
 0x5de   :  { %v673_v31 = vrot.slane %v672_v30, 4 }
 0x5e0   :  { %v674_v32 = vadd.f32 %v673_v31, %v672_v30 }
 0x5e2   :  { %v675_v33 = vrot.slane %v674_v32, 2 }
 0x5e3   :  { %v4027_v34 = vpop.eup %4026 }
 0x5e4   :  { %v634_v26 = vmul.f32 %v4027_v34, %v632_v28  ;;  %v676_v36 = vadd.f32 %v675_v33, %v674_v32  ;;  %vm640_vm7 = vweird.f32 %v4027_v34 }
 0x5e5   :  { %vm641_vm9 = vmor %vm639_vm8, %vm640_vm7 }
 0x5e6   :  { %v635_v35 = vmul.f32 %v4027_v34, %v634_v26  ;;  %v677_v39 = vrot.slane %v676_v36, 1 }
 0x5e8   :  { %v636_v37 = vmul.f32 0.5, %v635_v35  ;;  %v678_v42 = vadd.f32 %v677_v39, %v676_v36 }
 0x5ea   :  { %v637_v38 = vsub.f32 1.5, %v636_v37 }
 0x5ec   :  { %v638_v40 = vmul.f32 %v4027_v34, %v637_v38 }
 0x5ee   :  { %v642_v41 = vsel %vm641_vm9, %v4027_v34, %v638_v40 }
 0x5ef   :  { %3778 = vpush %v642_v41 }
 0x5f0   :  { %3780 = vpush %v678_v42 }
 0x620   :  { %s3779_s24 = spop %3778 }
 0x621   :  { %v644_v29 = vstv %s3779_s24  ;;  %s3781_s3 = spop %3780 }
 0x622   :  { %v645_v44 = vmul.f32 %v644_v29, %v617_v62  ;;  %s680_s10 = smax.f32 %s4407_s29, %s3781_s3 }
 0x623   :  { %v681_v45 = vstv %s680_s10 }
 0x624   :  { %4028 = vrsqrt.f32 %v681_v45  ;;  %3507 = vmatmul.msk.f32.vlgmr.msrb.gmra.mxu0 %vm92_vm0, %v645_v44  ;;  %vm688_vm11 = vweird.f32 %v681_v45 }
 0x625   :  { %3554 = vmatpush.xpose.msk.msrb.mxu0 %vm92_vm0, %v4651_v18 }
 0x629   :  { %3555 = vmatpush.xpose.msk.msrb.mxu0 %vm92_vm0, %v4656_v19 }
 0x62a   :  { %v4029_v46 = vpop.eup %4028  ;;  %v721_v47 = vpop.xlane.xlu2 %720 }
 0x62b   :  { %v683_v48 = vmul.f32 %v4029_v46, %v681_v45  ;;  %v722_v49 = vrot.slane %v721_v47, 4  ;;  %vm689_vm10 = vweird.f32 %v4029_v46 }
 0x62c   :  { %vm690_vm12 = vmor %vm688_vm11, %vm689_vm10 }
 0x62d   :  { %v684_v50 = vmul.f32 %v4029_v46, %v683_v48  ;;  %v723_v43 = vadd.f32 %v722_v49, %v721_v47  ;;  %3556 = vmatpush.xpose.msk.msrb.mxu0 %vm92_vm0, %v4668_v20  ;;  %v4993_v49 = vld [vmem:[%s6004_s5 + $0x18] sm:$0xff] }
 0x62f   :  { %v685_v51 = vmul.f32 0.5, %v684_v50  ;;  %v724_v53 = vrot.slane %v723_v43, 2 }
 0x631   :  { %v686_v54 = vsub.f32 1.5, %v685_v51  ;;  %v725_v55 = vadd.f32 %v724_v53, %v723_v43  ;;  %3557 = vmatpush.xpose.msk.msrb.mxu0 %vm92_vm0, %v4673_v21  ;;  %v5001_v43 = vld [vmem:[%s6004_s5 + $0x10] sm:$0xff] }
 0x633   :  { %v687_v3 = vmul.f32 %v4029_v46, %v686_v54  ;;  %v726_v4 = vrot.slane %v725_v55, 1 }
 0x635   :  { %v691_v56 = vsel %vm690_vm12, %v4029_v46, %v687_v3  ;;  %v727_v57 = vadd.f32 %v726_v4, %v725_v55  ;;  %v5008_v55 = vld [vmem:[%s6004_s5 + $0x8] sm:$0xff] }
 0x636   :  { %3782 = vpush %v691_v56 }
 0x637   :  { %3784 = vpush %v727_v57  ;;  %v5015_v57 = vld [vmem:[%s6004_s5] sm:$0xff] }
 0x667   :  { %s3783_s26 = spop %3782 }
 0x668   :  { %v693_v7 = vstv %s3783_s26  ;;  %s3785_s12 = spop %3784 }
 0x669   :  { %v694_v8 = vmul.f32 %v693_v7, %v4894_v22  ;;  %s729_s27 = smax.f32 %s4407_s29, %s3785_s12  ;;  %v4956_v22 = vld [vmem:[%s6027_s25 + $0x18] sm:$0xff] }
 0x66a   :  { %v730_v58 = vstv %s729_s27 }
 0x66b   :  { %4030 = vrsqrt.f32 %v730_v58  ;;  %3508 = vmatmul.msk.f32.vlgmr.msra.gmra.mxu2 %vm92_vm0, %v694_v8  ;;  %vm737_vm14 = vweird.f32 %v730_v58 }
 0x66c   :  { %1151 = vmatpush.msra.mxu2 %v4651_v18 }
 0x66e   :  { %1152 = vmatpush.msra.mxu2 %v4656_v19 }
 0x670   :  { %1153 = vmatpush.msra.mxu2 %v4668_v20 }
 0x671   :  { %v4031_v10 = vpop.eup %4030 }
 0x672   :  { %v732_v12 = vmul.f32 %v4031_v10, %v730_v58  ;;  %1154 = vmatpush.msra.mxu2 %v4673_v21  ;;  %vm738_vm13 = vweird.f32 %v4031_v10 }
 0x673   :  { %vm739_vm15 = vmor %vm737_vm14, %vm738_vm13 }
 0x674   :  { %v733_v15 = vmul.f32 %v4031_v10, %v732_v12 }
 0x676   :  { %v734_v16 = vmul.f32 0.5, %v733_v15 }
 0x678   :  { %v735_v59 = vsub.f32 1.5, %v734_v16 }
 0x67a   :  { %v736_v60 = vmul.f32 %v4031_v10, %v735_v59 }
 0x67c   :  { %v740_v61 = vsel %vm739_vm15, %v4031_v10, %v736_v60 }
 0x67d   :  { %3786 = vpush %v740_v61 }
 0x6a1   :  { %v4922_v62 = vpop.f32.mrf.mxu0 }
 0x6a2   :  { %v767_v18 = vmul.f32 %v4922_v62, %v4922_v62 }
 0x6a4   :  { %v768_v19 = vsel %vm117_vm2, %v767_v18, 0.0 }
 0x6a5   :  { %769 = vadd.xlane.f32.xlu0 %v768_v19 }
 0x6ae   :  { %s3787_s28 = spop %3786 }
 0x6af   :  { %v742_v20 = vstv %s3787_s28 }
 0x6b0   :  { %v743_v21 = vmul.f32 %v742_v20, %v4899_v9 }
 0x6b2   :  { %3509 = vmatmul.msk.f32.vlgmr.msra.gmra.mxu1 %vm193_vm1, %v743_v21 }
 0x6b3   :  { %1098 = vmatpush.msra.mxu1 %v4932_v52 }
 0x6b5   :  { %1099 = vmatpush.msra.mxu1 %v4938_v63 }
 0x6b7   :  { %1100 = vmatpush.msra.mxu1 %v4944_v14 }
 0x6b9   :  { %1101 = vmatpush.msra.mxu1 %v4950_v17 }
 0x6bb   :  { %1102 = vmatpush.msra.mxu1 %v4956_v22 }
 0x6bd   :  { %1103 = vmatpush.msra.mxu1 %v4962_v23 }
 0x6bf   :  { %1104 = vmatpush.msra.mxu1 %v4968_v0 }
 0x6c1   :  { %1105 = vmatpush.msra.mxu1 %v4974_v1 }
 0x6ee   :  { %v4977_v2 = vpop.f32.mrf.mxu2 }
 0x6ef   :  { %v816_v24 = vmul.f32 %v4977_v2, %v4977_v2 }
 0x6f1   :  { %v817_v5 = vsel %vm167_vm3, %v816_v24, 0.0 }
 0x6f2   :  { %818 = vadd.xlane.f32.xlu1 %v817_v5 }
 0x718   :  { %v770_v25 = vpop.xlane.xlu0 %769 }
 0x719   :  { %v771_v6 = vrot.slane %v770_v25, 4 }
 0x71b   :  { %v772_v27 = vadd.f32 %v771_v6, %v770_v25 }
 0x71d   :  { %v773_v9 = vrot.slane %v772_v27, 2 }
 0x71f   :  { %v774_v11 = vadd.f32 %v773_v9, %v772_v27 }
 0x721   :  { %v775_v13 = vrot.slane %v774_v11, 1 }
 0x723   :  { %v776_v28 = vadd.f32 %v775_v13, %v774_v11  ;;  %v5040_v13 = vld [vmem:[%s6026_s22 + $0x38] sm:$0xff] }
 0x725   :  { %3788 = vpush %v776_v28  ;;  %v5046_v28 = vld [vmem:[%s6026_s22 + $0x30] sm:$0xff] }
 0x72f   :  { %v4982_v30 = vpop.f32.mrf.mxu1 }
 0x730   :  { %v865_v31 = vmul.f32 %v4982_v30, %v4982_v30 }
 0x732   :  { %v866_v32 = vsel %vm167_vm3, %v865_v31, 0.0  ;;  %v5058_v31 = vld [vmem:[%s6026_s22 + $0x20] sm:$0xff] }
 0x733   :  { %867 = vadd.xlane.f32.xlu2 %v866_v32  ;;  %v5064_v32 = vld [vmem:[%s6026_s22 + $0x18] sm:$0xff] }
 0x756   :  { %s3789_s27 = spop %3788 }
 0x757   :  { %s778_s28 = smax.f32 %s4407_s29, %s3789_s27 }
 0x758   :  { %v779_v33 = vstv %s778_s28 }
 0x759   :  { %4032 = vrsqrt.f32 %v779_v33  ;;  %vm786_vm5 = vweird.f32 %v779_v33 }
 0x75f   :  { %v4033_v34 = vpop.eup %4032 }
 0x760   :  { %v781_v26 = vmul.f32 %v4033_v34, %v779_v33  ;;  %vm787_vm4 = vweird.f32 %v4033_v34  ;;  %v5070_v33 = vld [vmem:[%s6026_s22 + $0x10] sm:$0xff] }
 0x761   :  { %vm788_vm6 = vmor %vm786_vm5, %vm787_vm4 }
 0x762   :  { %v782_v35 = vmul.f32 %v4033_v34, %v781_v26  ;;  %v5082_v26 = vld [vmem:[%s6026_s22] sm:$0xff] }
 0x764   :  { %v783_v36 = vmul.f32 0.5, %v782_v35 }
 0x765   :  { %v819_v37 = vpop.xlane.xlu1 %818 }
 0x766   :  { %v784_v38 = vsub.f32 1.5, %v783_v36  ;;  %v820_v39 = vrot.slane %v819_v37, 4 }
 0x768   :  { %v821_v40 = vadd.f32 %v820_v39, %v819_v37  ;;  %v785_v41 = vmul.f32 %v4033_v34, %v784_v38 }
 0x76a   :  { %v822_v42 = vrot.slane %v821_v40, 2  ;;  %v789_v29 = vsel %vm788_vm6, %v4033_v34, %v785_v41  ;;  %v5076_v34 = vld [vmem:[%s6026_s22 + $0x8] sm:$0xff] }
 0x76b   :  { %3790 = vpush %v789_v29 }
 0x76c   :  { %v823_v44 = vadd.f32 %v822_v42, %v821_v40 }
 0x76e   :  { %v824_v45 = vrot.slane %v823_v44, 1 }
 0x770   :  { %v825_v46 = vadd.f32 %v824_v45, %v823_v44 }
 0x772   :  { %3792 = vpush %v825_v46 }
 0x79c   :  { %s3791_s11 = spop %3790 }
 0x79d   :  { %v791_v47 = vstv %s3791_s11 }
 0x79e   :  { %v792_v48 = vmul.f32 %v791_v47, %v4922_v62 }
 0x7a0   :  { %3518 = vmatmul.msk.f32.vlgmr.msrb.gmra.mxu3 %vm193_vm1, %v792_v48 }
 0x7a1   :  { %3580 = vmatpush.xpose.msk.msrb.mxu3 %vm92_vm0, %v4993_v49 }
 0x7a3   :  { %s3793_s20 = spop %3792 }
 0x7a4   :  { %s827_s21 = smax.f32 %s4407_s29, %s3793_s20 }
 0x7a5   :  { %v828_v50 = vstv %s827_s21  ;;  %3581 = vmatpush.xpose.msk.msrb.mxu3 %vm92_vm0, %v5001_v43 }
 0x7a6   :  { %4034 = vrsqrt.f32 %v828_v50  ;;  %v868_v51 = vpop.xlane.xlu2 %867  ;;  %vm835_vm8 = vweird.f32 %v828_v50 }
 0x7a7   :  { %v869_v53 = vrot.slane %v868_v51, 4 }
 0x7a9   :  { %v870_v54 = vadd.f32 %v869_v53, %v868_v51  ;;  %3582 = vmatpush.xpose.msk.msrb.mxu3 %vm92_vm0, %v5008_v55 }
 0x7ab   :  { %v871_v3 = vrot.slane %v870_v54, 2 }
 0x7ac   :  { %v4035_v4 = vpop.eup %4034 }
 0x7ad   :  { %v830_v56 = vmul.f32 %v4035_v4, %v828_v50  ;;  %3583 = vmatpush.xpose.msk.msrb.mxu3 %vm92_vm0, %v5015_v57  ;;  %v872_v8 = vadd.f32 %v871_v3, %v870_v54  ;;  %vm836_vm7 = vweird.f32 %v4035_v4 }
 0x7ae   :  { %vm837_vm9 = vmor %vm835_vm8, %vm836_vm7 }
 0x7af   :  { %v831_v7 = vmul.f32 %v4035_v4, %v830_v56  ;;  %v873_v12 = vrot.slane %v872_v8, 1 }
 0x7b1   :  { %v832_v58 = vmul.f32 0.5, %v831_v7  ;;  %v874_v59 = vadd.f32 %v873_v12, %v872_v8 }
 0x7b3   :  { %v833_v10 = vsub.f32 1.5, %v832_v58 }
 0x7b5   :  { %v834_v15 = vmul.f32 %v4035_v4, %v833_v10 }
 0x7b7   :  { %v838_v16 = vsel %vm837_vm9, %v4035_v4, %v834_v15 }
 0x7b8   :  { %3794 = vpush %v838_v16 }
 0x7b9   :  { %3796 = vpush %v874_v59 }
 0x7e9   :  { %s3795_s24 = spop %3794 }
 0x7ea   :  { %v840_v60 = vstv %s3795_s24  ;;  %s3797_s3 = spop %3796 }
 0x7eb   :  { %v841_v61 = vmul.f32 %v840_v60, %v4977_v2  ;;  %s876_s10 = smax.f32 %s4407_s29, %s3797_s3 }
 0x7ec   :  { %v877_v62 = vstv %s876_s10 }
 0x7ed   :  { %4036 = vrsqrt.f32 %v877_v62  ;;  %3527 = vmatmul.msk.f32.vlgmr.msra.gmra.mxu0 %vm92_vm0, %v841_v61  ;;  %vm884_vm11 = vweird.f32 %v877_v62 }
 0x7ee   :  { %1392 = vmatpush.msra.mxu0 %v4932_v52 }
 0x7f0   :  { %1393 = vmatpush.msra.mxu0 %v4938_v63 }
 0x7f2   :  { %1394 = vmatpush.msra.mxu0 %v4944_v14 }
 0x7f3   :  { %v4037_v18 = vpop.eup %4036 }
 0x7f4   :  { %v879_v19 = vmul.f32 %v4037_v18, %v877_v62  ;;  %1395 = vmatpush.msra.mxu0 %v4950_v17  ;;  %vm885_vm10 = vweird.f32 %v4037_v18 }
 0x7f5   :  { %vm886_vm12 = vmor %vm884_vm11, %vm885_vm10 }
 0x7f6   :  { %v880_v20 = vmul.f32 %v4037_v18, %v879_v19  ;;  %1396 = vmatpush.msra.mxu0 %v4956_v22 }
 0x7f8   :  { %v881_v21 = vmul.f32 0.5, %v880_v20  ;;  %1397 = vmatpush.msra.mxu0 %v4962_v23 }
 0x7fa   :  { %v882_v2 = vsub.f32 1.5, %v881_v21  ;;  %1398 = vmatpush.msra.mxu0 %v4968_v0 }
 0x7fc   :  { %v883_v24 = vmul.f32 %v4037_v18, %v882_v2  ;;  %1399 = vmatpush.msra.mxu0 %v4974_v1 }
 0x7fe   :  { %v887_v5 = vsel %vm886_vm12, %v4037_v18, %v883_v24 }
 0x7ff   :  { %3798 = vpush %v887_v5 }
 0x823   :  { %v5030_v25 = vpop.f32.mrf.mxu3 }
 0x824   :  { %v914_v6 = vmul.f32 %v5030_v25, %v5030_v25 }
 0x826   :  { %v915_v27 = vsel %vm167_vm3, %v914_v6, 0.0 }
 0x827   :  { %916 = vadd.xlane.f32.xlu0 %v915_v27 }
 0x830   :  { %s3799_s26 = spop %3798 }
 0x831   :  { %v889_v9 = vstv %s3799_s26 }
 0x832   :  { %v890_v11 = vmul.f32 %v889_v9, %v4982_v30  ;;  %v5052_v30 = vld [vmem:[%s6026_s22 + $0x28] sm:$0xff] }
 0x834   :  { %3532 = vmatmul.msk.f32.vlgmr.msrb.gmra.mxu1 %vm92_vm0, %v890_v11 }
 0x835   :  { %1343 = vmatpush.msrb.mxu1 %v5040_v13 }
 0x837   :  { %1344 = vmatpush.msrb.mxu1 %v5046_v28 }
 0x839   :  { %1345 = vmatpush.msrb.mxu1 %v5052_v30 }
 0x83b   :  { %1346 = vmatpush.msrb.mxu1 %v5058_v31 }
 0x83d   :  { %1347 = vmatpush.msrb.mxu1 %v5064_v32 }
 0x83f   :  { %1348 = vmatpush.msrb.mxu1 %v5070_v33 }
 0x841   :  { %1349 = vmatpush.msrb.mxu1 %v5076_v34 }
 0x843   :  { %1350 = vmatpush.msrb.mxu1 %v5082_v26 }
 0x86a   :  { %v5085_v35 = vpop.f32.mrf.mxu0 }
 0x86b   :  { %v963_v36 = vmul.f32 %v5085_v35, %v5085_v35 }
 0x86d   :  { %v964_v37 = vsel %vm167_vm3, %v963_v36, 0.0 }
 0x86e   :  { %965 = vadd.xlane.f32.xlu1 %v964_v37 }
 0x89a   :  { %v917_v38 = vpop.xlane.xlu0 %916 }
 0x89b   :  { %v918_v39 = vrot.slane %v917_v38, 4 }
 0x89d   :  { %v919_v40 = vadd.f32 %v918_v39, %v917_v38 }
 0x89f   :  { %v920_v41 = vrot.slane %v919_v40, 2 }
 0x8a1   :  { %v921_v42 = vadd.f32 %v920_v41, %v919_v40 }
 0x8a3   :  { %v922_v29 = vrot.slane %v921_v42, 1 }
 0x8a5   :  { %v923_v44 = vadd.f32 %v922_v29, %v921_v42 }
 0x8a7   :  { %3800 = vpush %v923_v44 }
 0x8b1   :  { %v5090_v45 = vpop.f32.mrf.mxu1 }
 0x8b2   :  { %v1012_v46 = vmul.f32 %v5090_v45, %v5090_v45 }
 0x8b4   :  { %v1013_v47 = vsel %vm117_vm2, %v1012_v46, 0.0 }
 0x8b5   :  { %1014 = vadd.xlane.f32.xlu2 %v1013_v47 }
 0x8d8   :  { %s3801_s10 = spop %3800 }
 0x8d9   :  { %s925_s26 = smax.f32 %s4407_s29, %s3801_s10 }
 0x8da   :  { %v926_v48 = vstv %s925_s26 }
 0x8db   :  { %4038 = vrsqrt.f32 %v926_v48  ;;  %vm933_vm14 = vweird.f32 %v926_v48 }
 0x8e1   :  { %v4039_v50 = vpop.eup %4038  ;;  %v966_v51 = vpop.xlane.xlu1 %965 }
 0x8e2   :  { %v928_v53 = vmul.f32 %v4039_v50, %v926_v48  ;;  %v967_v54 = vrot.slane %v966_v51, 4  ;;  %vm934_vm13 = vweird.f32 %v4039_v50 }
 0x8e3   :  { %vm935_vm15 = vmor %vm933_vm14, %vm934_vm13 }
 0x8e4   :  { %v929_v3 = vmul.f32 %v4039_v50, %v928_v53  ;;  %v968_v4 = vadd.f32 %v967_v54, %v966_v51 }
 0x8e6   :  { %v930_v56 = vmul.f32 0.5, %v929_v3  ;;  %v969_v7 = vrot.slane %v968_v4, 2 }
 0x8e8   :  { %v931_v8 = vsub.f32 1.5, %v930_v56  ;;  %v970_v58 = vadd.f32 %v969_v7, %v968_v4 }
 0x8ea   :  { %v932_v10 = vmul.f32 %v4039_v50, %v931_v8  ;;  %v971_v12 = vrot.slane %v970_v58, 1 }
 0x8ec   :  { %v936_v15 = vsel %vm935_vm15, %v4039_v50, %v932_v10  ;;  %v972_v16 = vadd.f32 %v971_v12, %v970_v58 }
 0x8ed   :  { %3802 = vpush %v936_v15 }
 0x8ee   :  { %3804 = vpush %v972_v16 }
 0x91e   :  { %s3803_s12 = spop %3802 }
 0x91f   :  { %v938_v59 = vstv %s3803_s12  ;;  %s3805_s27 = spop %3804 }
 0x920   :  { %v939_v60 = vmul.f32 %v938_v59, %v5030_v25  ;;  %s974_s28 = smax.f32 %s4407_s29, %s3805_s27 }
 0x921   :  { %v975_v61 = vstv %s974_s28 }
 0x922   :  { %4040 = vrsqrt.f32 %v975_v61  ;;  %3533 = vmatmul.msk.f32.vlgmr.msrb.gmra.mxu2 %vm92_vm0, %v939_v60  ;;  %vm982_vm5 = vweird.f32 %v975_v61 }
 0x923   :  { %3536 = vmatpush.xpose.msk.msrb.mxu2 %vm193_vm1, %v5040_v13 }
 0x927   :  { %3537 = vmatpush.xpose.msk.msrb.mxu2 %vm193_vm1, %v5046_v28 }
 0x928   :  { %v4041_v62 = vpop.eup %4040  ;;  %v1015_v18 = vpop.xlane.xlu2 %1014 }
 0x929   :  { %v977_v19 = vmul.f32 %v4041_v62, %v975_v61  ;;  %v1016_v20 = vrot.slane %v1015_v18, 4  ;;  %vm983_vm4 = vweird.f32 %v4041_v62 }
 0x92a   :  { %vm984_vm6 = vmor %vm982_vm5, %vm983_vm4 }
 0x92b   :  { %v978_v21 = vmul.f32 %v4041_v62, %v977_v19  ;;  %v1017_v2 = vadd.f32 %v1016_v20, %v1015_v18  ;;  %3538 = vmatpush.xpose.msk.msrb.mxu2 %vm193_vm1, %v5052_v30 }
 0x92d   :  { %v979_v24 = vmul.f32 0.5, %v978_v21  ;;  %v1018_v5 = vrot.slane %v1017_v2, 2 }
 0x92f   :  { %v980_v25 = vsub.f32 1.5, %v979_v24  ;;  %v1019_v6 = vadd.f32 %v1018_v5, %v1017_v2  ;;  %3539 = vmatpush.xpose.msk.msrb.mxu2 %vm193_vm1, %v5058_v31 }
 0x931   :  { %v981_v27 = vmul.f32 %v4041_v62, %v980_v25  ;;  %v1020_v9 = vrot.slane %v1019_v6, 1 }
 0x933   :  { %v985_v11 = vsel %vm984_vm6, %v4041_v62, %v981_v27  ;;  %v1021_v36 = vadd.f32 %v1020_v9, %v1019_v6  ;;  %3540 = vmatpush.xpose.msk.msrb.mxu2 %vm193_vm1, %v5064_v32 }
 0x934   :  { %3806 = vpush %v985_v11 }
 0x935   :  { %3808 = vpush %v1021_v36 }
 0x937   :  { %3541 = vmatpush.xpose.msk.msrb.mxu2 %vm193_vm1, %v5070_v33 }
 0x93b   :  { %3542 = vmatpush.xpose.msk.msrb.mxu2 %vm193_vm1, %v5076_v34 }
 0x93f   :  { %3543 = vmatpush.xpose.msk.msrb.mxu2 %vm193_vm1, %v5082_v26 }
 0x965   :  { %s3807_s11 = spop %3806 }
 0x966   :  { %v987_v37 = vstv %s3807_s11  ;;  %s3809_s0 = spop %3808 }
 0x967   :  { %v988_v38 = vmul.f32 %v987_v37, %v5085_v35  ;;  %s1023_s30 = smax.f32 %s4407_s29, %s3809_s0 }
 0x968   :  { %v1024_v39 = vstv %s1023_s30 }
 0x969   :  { %4042 = vrsqrt.f32 %v1024_v39  ;;  %3534 = vmatmul.msk.f32.vlgmr.msra.gmra.mxu1 %vm92_vm0, %v988_v38  ;;  %vm1031_vm8 = vweird.f32 %v1024_v39 }
 0x96a   :  { %1445 = vmatpush.msra.mxu1 %v4993_v49 }
 0x96c   :  { %1446 = vmatpush.msra.mxu1 %v5001_v43 }
 0x96e   :  { %1447 = vmatpush.msra.mxu1 %v5008_v55 }
 0x96f   :  { %v4043_v40 = vpop.eup %4042 }
 0x970   :  { %v1026_v41 = vmul.f32 %v4043_v40, %v1024_v39  ;;  %1448 = vmatpush.msra.mxu1 %v5015_v57  ;;  %vm1032_vm7 = vweird.f32 %v4043_v40 }
 0x971   :  { %vm1033_vm9 = vmor %vm1031_vm8, %vm1032_vm7 }
 0x972   :  { %v1027_v42 = vmul.f32 %v4043_v40, %v1026_v41 }
 0x974   :  { %v1028_v29 = vmul.f32 0.5, %v1027_v42 }
 0x976   :  { %v1029_v44 = vsub.f32 1.5, %v1028_v29 }
 0x978   :  { %v1030_v35 = vmul.f32 %v4043_v40, %v1029_v44 }
 0x97a   :  { %v1034_v46 = vsel %vm1033_vm9, %v4043_v40, %v1030_v35 }
 0x97b   :  { %3810 = vpush %v1034_v46 }
 0x9a5   :  { %v1058_v47 = vpop.f32.mrf.mxu2 }
 0x9a6   :  { %v1061_v48 = vmul.f32 %v1058_v47, %v1058_v47 }
 0x9a8   :  { %v1062_v50 = vsel %vm117_vm2, %v1061_v48, 0.0 }
 0x9a9   :  { %1063 = vadd.xlane.f32.xlu0 %v1062_v50 }
 0x9ac   :  { %s3811_s20 = spop %3810 }
 0x9ad   :  { %v1036_v51 = vstv %s3811_s20 }
 0x9ae   :  { %v1037_v53 = vmul.f32 %v1036_v51, %v5090_v45 }
 0x9b0   :  { %3535 = vmatmul.msk.f32.vlgmr.msra.gmra.mxu2 %vm193_vm1, %v1037_v53 }
 0x9b1   :  { %3571 = vmatpush.xpose.msk.msra.mxu2 %vm92_vm0, %v4932_v52 }
 0x9b5   :  { %3572 = vmatpush.xpose.msk.msra.mxu2 %vm92_vm0, %v4938_v63 }
 0x9b9   :  { %3573 = vmatpush.xpose.msk.msra.mxu2 %vm92_vm0, %v4944_v14 }
 0x9bd   :  { %3574 = vmatpush.xpose.msk.msra.mxu2 %vm92_vm0, %v4950_v17 }
 0x9c1   :  { %3575 = vmatpush.xpose.msk.msra.mxu2 %vm92_vm0, %v4956_v22 }
 0x9c5   :  { %3576 = vmatpush.xpose.msk.msra.mxu2 %vm92_vm0, %v4962_v23 }
 0x9c9   :  { %3577 = vmatpush.xpose.msk.msra.mxu2 %vm92_vm0, %v4968_v0 }
 0x9cd   :  { %3578 = vmatpush.xpose.msk.msra.mxu2 %vm92_vm0, %v4974_v1 }
 0x9e6   :  { %v5141_v45 = vpop.f32.mrf.mxu1 }
 0x9e7   :  { %v1110_v54 = vmul.f32 %v5141_v45, %v5141_v45 }
 0x9e9   :  { %v1111_v3 = vsel %vm167_vm3, %v1110_v54, 0.0 }
 0x9ea   :  { %1112 = vadd.xlane.f32.xlu1 %v1111_v3 }
 0xa1c   :  { %v1064_v4 = vpop.xlane.xlu0 %1063 }
 0xa1d   :  { %v1065_v56 = vrot.slane %v1064_v4, 4 }
 0xa1f   :  { %v1066_v7 = vadd.f32 %v1065_v56, %v1064_v4 }
 0xa21   :  { %v1067_v8 = vrot.slane %v1066_v7, 2 }
 0xa23   :  { %v1068_v58 = vadd.f32 %v1067_v8, %v1066_v7 }
 0xa25   :  { %v1069_v10 = vrot.slane %v1068_v58, 1 }
 0xa27   :  { %v1070_v12 = vadd.f32 %v1069_v10, %v1068_v58 }
 0xa29   :  { %3812 = vpush %v1070_v12 }
 0xa33   :  { %v5146_v15 = vpop.f32.mrf.mxu2 }
 0xa34   :  { %v1159_v16 = vmul.f32 %v5146_v15, %v5146_v15 }
 0xa36   :  { %v1160_v59 = vsel %vm167_vm3, %v1159_v16, 0.0 }
 0xa37   :  { %1161 = vadd.xlane.f32.xlu2 %v1160_v59 }
 0xa5a   :  { %s3813_s21 = spop %3812 }
 0xa5b   :  { %s1072_s1 = smax.f32 %s4407_s29, %s3813_s21 }
 0xa5c   :  { %v1073_v60 = vstv %s1072_s1 }
 0xa5d   :  { %4044 = vrsqrt.f32 %v1073_v60  ;;  %v1113_v61 = vpop.xlane.xlu1 %1112  ;;  %vm1080_vm11 = vweird.f32 %v1073_v60 }
 0xa5e   :  { %v1114_v62 = vrot.slane %v1113_v61, 4 }
 0xa60   :  { %v1115_v18 = vadd.f32 %v1114_v62, %v1113_v61 }
 0xa62   :  { %v1116_v19 = vrot.slane %v1115_v18, 2 }
 0xa63   :  { %v4045_v20 = vpop.eup %4044 }
 0xa64   :  { %v1075_v21 = vmul.f32 %v4045_v20, %v1073_v60  ;;  %v1117_v24 = vadd.f32 %v1116_v19, %v1115_v18  ;;  %vm1081_vm10 = vweird.f32 %v4045_v20 }
 0xa65   :  { %vm1082_vm12 = vmor %vm1080_vm11, %vm1081_vm10 }
 0xa66   :  { %v1076_v2 = vmul.f32 %v4045_v20, %v1075_v21  ;;  %v1118_v6 = vrot.slane %v1117_v24, 1 }
 0xa68   :  { %v1077_v5 = vmul.f32 0.5, %v1076_v2  ;;  %v1119_v11 = vadd.f32 %v1118_v6, %v1117_v24 }
 0xa6a   :  { %v1078_v25 = vsub.f32 1.5, %v1077_v5 }
 0xa6c   :  { %v1079_v27 = vmul.f32 %v4045_v20, %v1078_v25 }
 0xa6e   :  { %v1083_v9 = vsel %vm1082_vm12, %v4045_v20, %v1079_v27 }
 0xa6f   :  { %3814 = vpush %v1083_v9 }
 0xa70   :  { %3816 = vpush %v1119_v11 }
 0xaa0   :  { %s3815_s2 = spop %3814 }
 0xaa1   :  { %v1085_v36 = vstv %s3815_s2  ;;  %s3817_s7 = spop %3816 }
 0xaa2   :  { %v1086_v37 = vmul.f32 %v1085_v36, %v1058_v47  ;;  %s1121_s9 = smax.f32 %s4407_s29, %s3817_s7 }
 0xaa3   :  { %v1122_v38 = vstv %s1121_s9 }
 0xaa4   :  { %4046 = vrsqrt.f32 %v1122_v38  ;;  %3544 = vmatmul.msk.f32.vlgmr.msrb.gmra.mxu2 %vm193_vm1, %v1086_v37  ;;  %vm1129_vm14 = vweird.f32 %v1122_v38 }
 0xaa5   :  { %3606 = vmatpush.xpose.msk.msrb.mxu2 %vm92_vm0, %v4993_v49 }
 0xaa9   :  { %3607 = vmatpush.xpose.msk.msrb.mxu2 %vm92_vm0, %v5001_v43 }
 0xaaa   :  { %v4047_v39 = vpop.eup %4046  ;;  %v1162_v40 = vpop.xlane.xlu2 %1161 }
 0xaab   :  { %v1124_v41 = vmul.f32 %v4047_v39, %v1122_v38  ;;  %v1163_v42 = vrot.slane %v1162_v40, 4  ;;  %vm1130_vm13 = vweird.f32 %v4047_v39 }
 0xaac   :  { %vm1131_vm15 = vmor %vm1129_vm14, %vm1130_vm13 }
 0xaad   :  { %v1125_v29 = vmul.f32 %v4047_v39, %v1124_v41  ;;  %v1164_v44 = vadd.f32 %v1163_v42, %v1162_v40  ;;  %3608 = vmatpush.xpose.msk.msrb.mxu2 %vm92_vm0, %v5008_v55 }
 0xaaf   :  { %v1126_v35 = vmul.f32 0.5, %v1125_v29  ;;  %v1165_v46 = vrot.slane %v1164_v44, 2 }
 0xab1   :  { %v1127_v47 = vsub.f32 1.5, %v1126_v35  ;;  %v1166_v48 = vadd.f32 %v1165_v46, %v1164_v44  ;;  %3609 = vmatpush.xpose.msk.msrb.mxu2 %vm92_vm0, %v5015_v57 }
 0xab3   :  { %v1128_v50 = vmul.f32 %v4047_v39, %v1127_v47  ;;  %v1167_v51 = vrot.slane %v1166_v48, 1 }
 0xab5   :  { %v1132_v53 = vsel %vm1131_vm15, %v4047_v39, %v1128_v50  ;;  %v1168_v54 = vadd.f32 %v1167_v51, %v1166_v48 }
 0xab6   :  { %3818 = vpush %v1132_v53 }
 0xab7   :  { %3820 = vpush %v1168_v54 }
 0xae7   :  { %s3819_s8 = spop %3818 }
 0xae8   :  { %v1134_v3 = vstv %s3819_s8  ;;  %s3821_s23 = spop %3820 }
 0xae9   :  { %v1135_v4 = vmul.f32 %v1134_v3, %v5141_v45  ;;  %s1170_s24 = smax.f32 %s4407_s29, %s3821_s23 }
 0xaea   :  { %v1171_v56 = vstv %s1170_s24 }
 0xaeb   :  { %4048 = vrsqrt.f32 %v1171_v56  ;;  %3553 = vmatmul.msk.f32.vlgmr.msra.gmra.mxu3 %vm92_vm0, %v1135_v4  ;;  %vm1178_vm5 = vweird.f32 %v1171_v56 }
 0xaec   :  { %1686 = vmatpush.msra.mxu3 %v4932_v52 }
 0xaee   :  { %1687 = vmatpush.msra.mxu3 %v4938_v63 }
 0xaf0   :  { %1688 = vmatpush.msra.mxu3 %v4944_v14 }
 0xaf1   :  { %v4049_v7 = vpop.eup %4048 }
 0xaf2   :  { %v1173_v8 = vmul.f32 %v4049_v7, %v1171_v56  ;;  %1689 = vmatpush.msra.mxu3 %v4950_v17  ;;  %vm1179_vm4 = vweird.f32 %v4049_v7 }
 0xaf3   :  { %vm1180_vm6 = vmor %vm1178_vm5, %vm1179_vm4 }
 0xaf4   :  { %v1174_v58 = vmul.f32 %v4049_v7, %v1173_v8  ;;  %1690 = vmatpush.msra.mxu3 %v4956_v22 }
 0xaf6   :  { %v1175_v45 = vmul.f32 0.5, %v1174_v58  ;;  %1691 = vmatpush.msra.mxu3 %v4962_v23 }
 0xaf8   :  { %v1176_v10 = vsub.f32 1.5, %v1175_v45  ;;  %1692 = vmatpush.msra.mxu3 %v4968_v0 }
 0xafa   :  { %v1177_v12 = vmul.f32 %v4049_v7, %v1176_v10  ;;  %1693 = vmatpush.msra.mxu3 %v4974_v1 }
 0xafc   :  { %v1181_v16 = vsel %vm1180_vm6, %v4049_v7, %v1177_v12 }
 0xafd   :  { %3822 = vpush %v1181_v16 }
 0xb27   :  { %v1205_v59 = vpop.f32.mrf.mxu2 }
 0xb28   :  { %v1208_v60 = vmul.f32 %v1205_v59, %v1205_v59 }
 0xb2a   :  { %v1209_v61 = vsel %vm167_vm3, %v1208_v60, 0.0 }
 0xb2b   :  { %1210 = vadd.xlane.f32.xlu0 %v1209_v61 }
 0xb2e   :  { %s3823_s3 = spop %3822 }
 0xb2f   :  { %v1183_v62 = vstv %s3823_s3 }
 0xb30   :  { %v1184_v18 = vmul.f32 %v1183_v62, %v5146_v15 }
 0xb32   :  { %3558 = vmatmul.msk.f32.vlgmr.msrb.gmra.mxu0 %vm92_vm0, %v1184_v18 }
 0xb33   :  { %1637 = vmatpush.msrb.mxu0 %v5040_v13 }
 0xb35   :  { %1638 = vmatpush.msrb.mxu0 %v5046_v28 }
 0xb37   :  { %1639 = vmatpush.msrb.mxu0 %v5052_v30 }
 0xb39   :  { %1640 = vmatpush.msrb.mxu0 %v5058_v31 }
 0xb3b   :  { %1641 = vmatpush.msrb.mxu0 %v5064_v32 }
 0xb3d   :  { %1642 = vmatpush.msrb.mxu0 %v5070_v33 }
 0xb3f   :  { %1643 = vmatpush.msrb.mxu0 %v5076_v34 }
 0xb41   :  { %1644 = vmatpush.msrb.mxu0 %v5082_v26 }
 0xb6e   :  { %v5184_v19 = vpop.f32.mrf.mxu3 }
 0xb6f   :  { %v1257_v15 = vmul.f32 %v5184_v19, %v5184_v19 }
 0xb71   :  { %v1258_v20 = vsel %vm167_vm3, %v1257_v15, 0.0 }
 0xb72   :  { %1259 = vadd.xlane.f32.xlu1 %v1258_v20 }
 0xb9e   :  { %v1211_v21 = vpop.xlane.xlu0 %1210 }
 0xb9f   :  { %v1212_v2 = vrot.slane %v1211_v21, 4 }
 0xba1   :  { %v1213_v24 = vadd.f32 %v1212_v2, %v1211_v21 }
 0xba3   :  { %v1214_v5 = vrot.slane %v1213_v24, 2 }
 0xba5   :  { %v1215_v25 = vadd.f32 %v1214_v5, %v1213_v24 }
 0xba7   :  { %v1216_v6 = vrot.slane %v1215_v25, 1 }
 0xba9   :  { %v1217_v27 = vadd.f32 %v1216_v6, %v1215_v25 }
 0xbab   :  { %3824 = vpush %v1217_v27 }
 0xbaf   :  { %v5189_v9 = vpop.f32.mrf.mxu0 }
 0xbb0   :  { %v1306_v11 = vmul.f32 %v5189_v9, %v5189_v9 }
 0xbb2   :  { %v1307_v36 = vsel %vm117_vm2, %v1306_v11, 0.0 }
 0xbb3   :  { %1308 = vadd.xlane.f32.xlu2 %v1307_v36 }
 0xbdc   :  { %s3825_s10 = spop %3824 }
 0xbdd   :  { %s1219_s26 = smax.f32 %s4407_s29, %s3825_s10 }
 0xbde   :  { %v1220_v37 = vstv %s1219_s26 }
 0xbdf   :  { %4050 = vrsqrt.f32 %v1220_v37  ;;  %vm1227_vm8 = vweird.f32 %v1220_v37 }
 0xbe5   :  { %v4051_v38 = vpop.eup %4050  ;;  %v1260_v39 = vpop.xlane.xlu1 %1259 }
 0xbe6   :  { %v1222_v40 = vmul.f32 %v4051_v38, %v1220_v37  ;;  %v1261_v41 = vrot.slane %v1260_v39, 4  ;;  %vm1228_vm7 = vweird.f32 %v4051_v38 }
 0xbe7   :  { %vm1229_vm9 = vmor %vm1227_vm8, %vm1228_vm7 }
 0xbe8   :  { %v1223_v42 = vmul.f32 %v4051_v38, %v1222_v40  ;;  %v1262_v29 = vadd.f32 %v1261_v41, %v1260_v39 }
 0xbea   :  { %v1224_v44 = vmul.f32 0.5, %v1223_v42  ;;  %v1263_v35 = vrot.slane %v1262_v29, 2 }
 0xbec   :  { %v1225_v46 = vsub.f32 1.5, %v1224_v44  ;;  %v1264_v47 = vadd.f32 %v1263_v35, %v1262_v29 }
 0xbee   :  { %v1226_v48 = vmul.f32 %v4051_v38, %v1225_v46  ;;  %v1265_v50 = vrot.slane %v1264_v47, 1 }
 0xbf0   :  { %v1230_v51 = vsel %vm1229_vm9, %v4051_v38, %v1226_v48  ;;  %v1266_v53 = vadd.f32 %v1265_v50, %v1264_v47 }
 0xbf1   :  { %3826 = vpush %v1230_v51 }
 0xbf2   :  { %3828 = vpush %v1266_v53 }
 0xc22   :  { %s3827_s12 = spop %3826 }
 0xc23   :  { %v1232_v54 = vstv %s3827_s12  ;;  %s3829_s27 = spop %3828 }
 0xc24   :  { %v1233_v3 = vmul.f32 %v1232_v54, %v1205_v59  ;;  %s1268_s28 = smax.f32 %s4407_s29, %s3829_s27 }
 0xc25   :  { %v1269_v4 = vstv %s1268_s28 }
 0xc26   :  { %4052 = vrsqrt.f32 %v1269_v4  ;;  %v1309_v56 = vpop.xlane.xlu2 %1308  ;;  %3559 = vmatmul.msk.f32.vlgmr.msrb.gmra.mxu1 %vm92_vm0, %v1233_v3  ;;  %vm1276_vm11 = vweird.f32 %v1269_v4 }
 0xc27   :  { %v1310_v7 = vrot.slane %v1309_v56, 4  ;;  %3562 = vmatpush.xpose.msk.msrb.mxu1 %vm193_vm1, %v5040_v13 }
 0xc29   :  { %v1311_v8 = vadd.f32 %v1310_v7, %v1309_v56 }
 0xc2b   :  { %v1312_v58 = vrot.slane %v1311_v8, 2  ;;  %3563 = vmatpush.xpose.msk.msrb.mxu1 %vm193_vm1, %v5046_v28 }
 0xc2c   :  { %v4053_v45 = vpop.eup %4052 }
 0xc2d   :  { %v1271_v10 = vmul.f32 %v4053_v45, %v1269_v4  ;;  %v1313_v16 = vadd.f32 %v1312_v58, %v1311_v8  ;;  %vm1277_vm10 = vweird.f32 %v4053_v45 }
 0xc2e   :  { %vm1278_vm12 = vmor %vm1276_vm11, %vm1277_vm10 }
 0xc2f   :  { %v1272_v12 = vmul.f32 %v4053_v45, %v1271_v10  ;;  %3564 = vmatpush.xpose.msk.msrb.mxu1 %vm193_vm1, %v5052_v30  ;;  %v1314_v61 = vrot.slane %v1313_v16, 1 }
 0xc31   :  { %v1273_v59 = vmul.f32 0.5, %v1272_v12  ;;  %v1315_v15 = vadd.f32 %v1314_v61, %v1313_v16 }
 0xc33   :  { %v1274_v60 = vsub.f32 1.5, %v1273_v59  ;;  %3565 = vmatpush.xpose.msk.msrb.mxu1 %vm193_vm1, %v5058_v31 }
 0xc35   :  { %v1275_v62 = vmul.f32 %v4053_v45, %v1274_v60 }
 0xc37   :  { %v1279_v18 = vsel %vm1278_vm12, %v4053_v45, %v1275_v62  ;;  %3566 = vmatpush.xpose.msk.msrb.mxu1 %vm193_vm1, %v5064_v32 }
 0xc38   :  { %3830 = vpush %v1279_v18 }
 0xc39   :  { %3832 = vpush %v1315_v15 }
 0xc3b   :  { %3567 = vmatpush.xpose.msk.msrb.mxu1 %vm193_vm1, %v5070_v33 }
 0xc3f   :  { %3568 = vmatpush.xpose.msk.msrb.mxu1 %vm193_vm1, %v5076_v34 }
 0xc43   :  { %3569 = vmatpush.xpose.msk.msrb.mxu1 %vm193_vm1, %v5082_v26 }
 0xc69   :  { %s3831_s11 = spop %3830 }
 0xc6a   :  { %v1281_v20 = vstv %s3831_s11  ;;  %s3833_s0 = spop %3832 }
 0xc6b   :  { %v1282_v21 = vmul.f32 %v1281_v20, %v5184_v19  ;;  %s1317_s30 = smax.f32 %s4407_s29, %s3833_s0 }
 0xc6c   :  { %v1318_v2 = vstv %s1317_s30 }
 0xc6d   :  { %4054 = vrsqrt.f32 %v1318_v2  ;;  %3560 = vmatmul.msk.f32.vlgmr.msra.gmra.mxu0 %vm92_vm0, %v1282_v21  ;;  %vm1325_vm14 = vweird.f32 %v1318_v2 }
 0xc6e   :  { %1739 = vmatpush.msra.mxu0 %v4993_v49 }
 0xc70   :  { %1740 = vmatpush.msra.mxu0 %v5001_v43 }
 0xc72   :  { %1741 = vmatpush.msra.mxu0 %v5008_v55 }
 0xc73   :  { %v4055_v24 = vpop.eup %4054 }
 0xc74   :  { %v1320_v5 = vmul.f32 %v4055_v24, %v1318_v2  ;;  %1742 = vmatpush.msra.mxu0 %v5015_v57  ;;  %vm1326_vm13 = vweird.f32 %v4055_v24 }
 0xc75   :  { %vm1327_vm15 = vmor %vm1325_vm14, %vm1326_vm13 }
 0xc76   :  { %v1321_v25 = vmul.f32 %v4055_v24, %v1320_v5 }
 0xc78   :  { %v1322_v6 = vmul.f32 0.5, %v1321_v25 }
 0xc7a   :  { %v1323_v27 = vsub.f32 1.5, %v1322_v6 }
 0xc7c   :  { %v1324_v19 = vmul.f32 %v4055_v24, %v1323_v27 }
 0xc7e   :  { %v1328_v11 = vsel %vm1327_vm15, %v4055_v24, %v1324_v19  ;;  %v5272_v19 = vld [vmem:[%s6027_s25 + $0x30] sm:$0xff] }
 0xc7f   :  { %3834 = vpush %v1328_v11  ;;  %v5278_v11 = vld [vmem:[%s6027_s25 + $0x28] sm:$0xff] }
 0xca3   :  { %v1352_v36 = vpop.f32.mrf.mxu1 }
 0xca4   :  { %v1355_v37 = vmul.f32 %v1352_v36, %v1352_v36 }
 0xca6   :  { %v1356_v38 = vsel %vm117_vm2, %v1355_v37, 0.0 }
 0xca7   :  { %1357 = vadd.xlane.f32.xlu0 %v1356_v38  ;;  %v5284_v38 = vld [vmem:[%s6027_s25 + $0x20] sm:$0xff] }
 0xcb0   :  { %s3835_s20 = spop %3834 }
 0xcb1   :  { %v1330_v39 = vstv %s3835_s20 }
 0xcb2   :  { %v1331_v40 = vmul.f32 %v1330_v39, %v5189_v9 }
 0xcb4   :  { %3561 = vmatmul.msk.f32.vlgmr.msra.gmra.mxu1 %vm193_vm1, %v1331_v40  ;;  %v5290_v40 = vld [vmem:[%s6027_s25 + $0x18] sm:$0xff] }
 0xcb5   :  { %3597 = vmatpush.xpose.msk.msra.mxu1 %vm92_vm0, %v4932_v52 }
 0xcb9   :  { %3598 = vmatpush.xpose.msk.msra.mxu1 %vm92_vm0, %v4938_v63 }
 0xcbd   :  { %3599 = vmatpush.xpose.msk.msra.mxu1 %vm92_vm0, %v4944_v14 }
 0xcc1   :  { %3600 = vmatpush.xpose.msk.msra.mxu1 %vm92_vm0, %v4950_v17 }
 0xcc5   :  { %3601 = vmatpush.xpose.msk.msra.mxu1 %vm92_vm0, %v4956_v22 }
 0xcc9   :  { %3602 = vmatpush.xpose.msk.msra.mxu1 %vm92_vm0, %v4962_v23 }
 0xccd   :  { %3603 = vmatpush.xpose.msk.msra.mxu1 %vm92_vm0, %v4968_v0 }
 0xcd1   :  { %3604 = vmatpush.xpose.msk.msra.mxu1 %vm92_vm0, %v4974_v1 }
 0xcea   :  { %v5239_v52 = vpop.f32.mrf.mxu0 }
 0xceb   :  { %v1404_v63 = vmul.f32 %v5239_v52, %v5239_v52 }
 0xced   :  { %v1405_v14 = vsel %vm167_vm3, %v1404_v63, 0.0  ;;  %v5296_v63 = vld [vmem:[%s6027_s25 + $0x10] sm:$0xff] }
 0xcee   :  { %1406 = vadd.xlane.f32.xlu1 %v1405_v14 }
 0xd1a   :  { %v1358_v17 = vpop.xlane.xlu0 %1357 }
 0xd1b   :  { %v1359_v9 = vrot.slane %v1358_v17, 4 }
 0xd1d   :  { %v1360_v22 = vadd.f32 %v1359_v9, %v1358_v17  ;;  %v5302_v17 = vld [vmem:[%s6027_s25 + $0x8] sm:$0xff] }
 0xd1f   :  { %v1361_v41 = vrot.slane %v1360_v22, 2 }
 0xd21   :  { %v1362_v42 = vadd.f32 %v1361_v41, %v1360_v22  ;;  %v5308_v22 = vld [vmem:[%s6027_s25] sm:$0xff] }
 0xd23   :  { %v1363_v23 = vrot.slane %v1362_v42, 1 }
 0xd25   :  { %v1364_v29 = vadd.f32 %v1363_v23, %v1362_v42 }
 0xd27   :  { %3836 = vpush %v1364_v29 }
 0xd31   :  { %v5244_v0 = vpop.f32.mrf.mxu1 }
 0xd32   :  { %v1453_v1 = vmul.f32 %v5244_v0, %v5244_v0 }
 0xd34   :  { %v1454_v44 = vsel %vm167_vm3, %v1453_v1, 0.0 }
 0xd35   :  { %1455 = vadd.xlane.f32.xlu2 %v1454_v44 }
 0xd58   :  { %s3837_s21 = spop %3836 }
 0xd59   :  { %s1366_s1 = smax.f32 %s4407_s29, %s3837_s21 }
 0xd5a   :  { %v1367_v35 = vstv %s1366_s1 }
 0xd5b   :  { %4056 = vrsqrt.f32 %v1367_v35  ;;  %vm1374_vm5 = vweird.f32 %v1367_v35 }
 0xd61   :  { %v4057_v46 = vpop.eup %4056  ;;  %v1407_v47 = vpop.xlane.xlu1 %1406 }
 0xd62   :  { %v1369_v48 = vmul.f32 %v4057_v46, %v1367_v35  ;;  %v1408_v50 = vrot.slane %v1407_v47, 4  ;;  %vm1375_vm4 = vweird.f32 %v4057_v46 }
 0xd63   :  { %vm1376_vm6 = vmor %vm1374_vm5, %vm1375_vm4 }
 0xd64   :  { %v1370_v51 = vmul.f32 %v4057_v46, %v1369_v48  ;;  %v1409_v53 = vadd.f32 %v1408_v50, %v1407_v47 }
 0xd66   :  { %v1371_v54 = vmul.f32 0.5, %v1370_v51  ;;  %v1410_v3 = vrot.slane %v1409_v53, 2 }
 0xd68   :  { %v1372_v4 = vsub.f32 1.5, %v1371_v54  ;;  %v1411_v56 = vadd.f32 %v1410_v3, %v1409_v53 }
 0xd6a   :  { %v1373_v7 = vmul.f32 %v4057_v46, %v1372_v4  ;;  %v1412_v8 = vrot.slane %v1411_v56, 1 }
 0xd6c   :  { %v1377_v58 = vsel %vm1376_vm6, %v4057_v46, %v1373_v7  ;;  %v1413_v45 = vadd.f32 %v1412_v8, %v1411_v56 }
 0xd6d   :  { %3838 = vpush %v1377_v58 }
 0xd6e   :  { %3840 = vpush %v1413_v45 }
 0xd9e   :  { %s3839_s2 = spop %3838 }
 0xd9f   :  { %v1379_v10 = vstv %s3839_s2  ;;  %s3841_s7 = spop %3840 }
 0xda0   :  { %v1380_v12 = vmul.f32 %v1379_v10, %v1352_v36  ;;  %s1415_s9 = smax.f32 %s4407_s29, %s3841_s7 }
 0xda1   :  { %v1416_v16 = vstv %s1415_s9 }
 0xda2   :  { %4058 = vrsqrt.f32 %v1416_v16  ;;  %3570 = vmatmul.msk.f32.vlgmr.msrb.gmra.mxu1 %vm193_vm1, %v1380_v12  ;;  %vm1423_vm8 = vweird.f32 %v1416_v16 }
 0xda3   :  { %3632 = vmatpush.xpose.msk.msrb.mxu1 %vm92_vm0, %v4993_v49 }
 0xda7   :  { %3633 = vmatpush.xpose.msk.msrb.mxu1 %vm92_vm0, %v5001_v43 }
 0xda8   :  { %v4059_v59 = vpop.eup %4058  ;;  %v1456_v60 = vpop.xlane.xlu2 %1455 }
 0xda9   :  { %v1418_v61 = vmul.f32 %v4059_v59, %v1416_v16  ;;  %v1457_v62 = vrot.slane %v1456_v60, 4  ;;  %vm1424_vm7 = vweird.f32 %v4059_v59 }
 0xdaa   :  { %vm1425_vm9 = vmor %vm1423_vm8, %vm1424_vm7 }
 0xdab   :  { %v1419_v18 = vmul.f32 %v4059_v59, %v1418_v61  ;;  %v1458_v15 = vadd.f32 %v1457_v62, %v1456_v60  ;;  %3634 = vmatpush.xpose.msk.msrb.mxu1 %vm92_vm0, %v5008_v55 }
 0xdad   :  { %v1420_v20 = vmul.f32 0.5, %v1419_v18  ;;  %v1459_v21 = vrot.slane %v1458_v15, 2 }
 0xdaf   :  { %v1421_v2 = vsub.f32 1.5, %v1420_v20  ;;  %v1460_v24 = vadd.f32 %v1459_v21, %v1458_v15  ;;  %3635 = vmatpush.xpose.msk.msrb.mxu1 %vm92_vm0, %v5015_v57  ;;  %v5266_v57 = vld [vmem:[%s6027_s25 + $0x38] sm:$0xff] }
 0xdb1   :  { %v1422_v49 = vmul.f32 %v4059_v59, %v1421_v2  ;;  %v1461_v43 = vrot.slane %v1460_v24, 1 }
 0xdb3   :  { %v1426_v5 = vsel %vm1425_vm9, %v4059_v59, %v1422_v49  ;;  %v1462_v25 = vadd.f32 %v1461_v43, %v1460_v24 }
 0xdb4   :  { %3842 = vpush %v1426_v5 }
 0xdb5   :  { %3844 = vpush %v1462_v25 }
 0xde5   :  { %s3843_s8 = spop %3842 }
 0xde6   :  { %v1428_v6 = vstv %s3843_s8  ;;  %s3845_s23 = spop %3844 }
 0xde7   :  { %v1429_v55 = vmul.f32 %v1428_v6, %v5239_v52  ;;  %s1464_s24 = smax.f32 %s4407_s29, %s3845_s23 }
 0xde8   :  { %v1465_v27 = vstv %s1464_s24 }
 0xde9   :  { %4060 = vrsqrt.f32 %v1465_v27  ;;  %3579 = vmatmul.msk.f32.vlgmr.msra.gmra.mxu2 %vm92_vm0, %v1429_v55  ;;  %vm1472_vm11 = vweird.f32 %v1465_v27  ;;  %v5346_v55 = vld [vmem:[%s6026_s22 + $0x18] sm:$0xff] }
 0xdea   :  { %1980 = vmatpush.msra.mxu2 %v5266_v57 }
 0xdec   :  { %1981 = vmatpush.msra.mxu2 %v5272_v19 }
 0xdee   :  { %1982 = vmatpush.msra.mxu2 %v5278_v11 }
 0xdef   :  { %v4061_v36 = vpop.eup %4060 }
 0xdf0   :  { %v1467_v37 = vmul.f32 %v4061_v36, %v1465_v27  ;;  %1983 = vmatpush.msra.mxu2 %v5284_v38  ;;  %vm1473_vm10 = vweird.f32 %v4061_v36 }
 0xdf1   :  { %vm1474_vm12 = vmor %vm1472_vm11, %vm1473_vm10 }
 0xdf2   :  { %v1468_v39 = vmul.f32 %v4061_v36, %v1467_v37  ;;  %1984 = vmatpush.msra.mxu2 %v5290_v40 }
 0xdf4   :  { %v1469_v52 = vmul.f32 0.5, %v1468_v39  ;;  %1985 = vmatpush.msra.mxu2 %v5296_v63 }
 0xdf6   :  { %v1470_v14 = vsub.f32 1.5, %v1469_v52  ;;  %1986 = vmatpush.msra.mxu2 %v5302_v17  ;;  %v5360_v52 = vld [vmem:[%s6026_s22 + $0x8] sm:$0xff] }
 0xdf8   :  { %v1471_v9 = vmul.f32 %v4061_v36, %v1470_v14  ;;  %1987 = vmatpush.msra.mxu2 %v5308_v22  ;;  %v5367_v14 = vld [vmem:[%s6026_s22] sm:$0xff] }
 0xdfa   :  { %v1475_v41 = vsel %vm1474_vm12, %v4061_v36, %v1471_v9 }
 0xdfb   :  { %3846 = vpush %v1475_v41 }
 0xe1f   :  { %v1499_v42 = vpop.f32.mrf.mxu1 }
 0xe20   :  { %v1502_v23 = vmul.f32 %v1499_v42, %v1499_v42 }
 0xe22   :  { %v1503_v29 = vsel %vm167_vm3, %v1502_v23, 0.0  ;;  %v5377_v23 = vld [vmem:[%s6004_s5 + $0x18] sm:$0xff] }
 0xe23   :  { %1504 = vadd.xlane.f32.xlu0 %v1503_v29  ;;  %v5383_v29 = vld [vmem:[%s6004_s5 + $0x10] sm:$0xff] }
 0xe2c   :  { %s3847_s23 = spop %3846 }
 0xe2d   :  { %v1477_v1 = vstv %s3847_s23 }
 0xe2e   :  { %v1478_v44 = vmul.f32 %v1477_v1, %v5244_v0  ;;  %v5389_v1 = vld [vmem:[%s6004_s5 + $0x8] sm:$0xff] }
 0xe30   :  { %3584 = vmatmul.msk.f32.vlgmr.msrb.gmra.mxu3 %vm92_vm0, %v1478_v44 }
 0xe31   :  { %1931 = vmatpush.msrb.mxu3 %v5040_v13 }
 0xe33   :  { %1932 = vmatpush.msrb.mxu3 %v5046_v28 }
 0xe35   :  { %1933 = vmatpush.msrb.mxu3 %v5052_v30 }
 0xe37   :  { %1934 = vmatpush.msrb.mxu3 %v5058_v31 }
 0xe39   :  { %1935 = vmatpush.msrb.mxu3 %v5064_v32 }
 0xe3b   :  { %1936 = vmatpush.msrb.mxu3 %v5070_v33 }
 0xe3d   :  { %1937 = vmatpush.msrb.mxu3 %v5076_v34 }
 0xe3f   :  { %1938 = vmatpush.msrb.mxu3 %v5082_v26 }
 0xe6c   :  { %v5322_v35 = vpop.f32.mrf.mxu2 }
 0xe6d   :  { %v1551_v0 = vmul.f32 %v5322_v35, %v5322_v35 }
 0xe6f   :  { %v1552_v46 = vsel %vm167_vm3, %v1551_v0, 0.0  ;;  %v5395_v0 = vld [vmem:[%s6004_s5] sm:$0xff] }
 0xe70   :  { %1553 = vadd.xlane.f32.xlu1 %v1552_v46 }
 0xe96   :  { %v1505_v47 = vpop.xlane.xlu0 %1504 }
 0xe97   :  { %v1506_v48 = vrot.slane %v1505_v47, 4 }
 0xe99   :  { %v1507_v50 = vadd.f32 %v1506_v48, %v1505_v47 }
 0xe9b   :  { %v1508_v51 = vrot.slane %v1507_v50, 2 }
 0xe9d   :  { %v1509_v53 = vadd.f32 %v1508_v51, %v1507_v50 }
 0xe9f   :  { %v1510_v32 = vrot.slane %v1509_v53, 1 }
 0xea1   :  { %v1511_v54 = vadd.f32 %v1510_v32, %v1509_v53 }
 0xea3   :  { %3848 = vpush %v1511_v54 }
 0xeb3   :  { %v5327_v33 = vpop.f32.mrf.mxu3 }
 0xeb4   :  { %v1600_v34 = vmul.f32 %v5327_v33, %v5327_v33 }
 0xeb6   :  { %v1601_v26 = vsel %vm117_vm2, %v1600_v34, 0.0 }
 0xeb7   :  { %1602 = vadd.xlane.f32.xlu2 %v1601_v26 }
 0xed4   :  { %s3849_s24 = spop %3848 }
 0xed5   :  { %s1513_s3 = smax.f32 %s4407_s29, %s3849_s24 }
 0xed6   :  { %v1514_v3 = vstv %s1513_s3 }
 0xed7   :  { %4062 = vrsqrt.f32 %v1514_v3  ;;  %vm1521_vm14 = vweird.f32 %v1514_v3 }
 0xedd   :  { %v4063_v4 = vpop.eup %4062 }
 0xede   :  { %v1516_v56 = vmul.f32 %v4063_v4, %v1514_v3  ;;  %vm1522_vm13 = vweird.f32 %v4063_v4 }
 0xedf   :  { %vm1523_vm15 = vmor %vm1521_vm14, %vm1522_vm13 }
 0xee0   :  { %v1517_v7 = vmul.f32 %v4063_v4, %v1516_v56 }
 0xee2   :  { %v1518_v8 = vmul.f32 0.5, %v1517_v7 }
 0xee3   :  { %v1554_v58 = vpop.xlane.xlu1 %1553 }
 0xee4   :  { %v1519_v45 = vsub.f32 1.5, %v1518_v8  ;;  %v1555_v10 = vrot.slane %v1554_v58, 4 }
 0xee6   :  { %v1556_v12 = vadd.f32 %v1555_v10, %v1554_v58  ;;  %v1520_v16 = vmul.f32 %v4063_v4, %v1519_v45 }
 0xee8   :  { %v1557_v59 = vrot.slane %v1556_v12, 2  ;;  %v1524_v60 = vsel %vm1523_vm15, %v4063_v4, %v1520_v16 }
 0xee9   :  { %3850 = vpush %v1524_v60 }
 0xeea   :  { %v1558_v61 = vadd.f32 %v1557_v59, %v1556_v12 }
 0xeec   :  { %v1559_v62 = vrot.slane %v1558_v61, 1 }
 0xeee   :  { %v1560_v18 = vadd.f32 %v1559_v62, %v1558_v61 }
 0xef0   :  { %3852 = vpush %v1560_v18 }
 0xf1a   :  { %s3851_s10 = spop %3850 }
 0xf1b   :  { %v1526_v15 = vstv %s3851_s10 }
 0xf1c   :  { %v1527_v20 = vmul.f32 %v1526_v15, %v1499_v42 }
 0xf1e   :  { %3585 = vmatmul.msk.f32.vlgmr.msrb.gmra.mxu0 %vm92_vm0, %v1527_v20 }
 0xf1f   :  { %3588 = vmatpush.xpose.msk.msrb.mxu0 %vm193_vm1, %v5040_v13 }
 0xf21   :  { %s3853_s26 = spop %3852 }
 0xf22   :  { %s1562_s12 = smax.f32 %s4407_s29, %s3853_s26 }
 0xf23   :  { %v1563_v21 = vstv %s1562_s12  ;;  %3589 = vmatpush.xpose.msk.msrb.mxu0 %vm193_vm1, %v5046_v28 }
 0xf24   :  { %4064 = vrsqrt.f32 %v1563_v21  ;;  %vm1570_vm5 = vweird.f32 %v1563_v21 }
 0xf27   :  { %3590 = vmatpush.xpose.msk.msrb.mxu0 %vm193_vm1, %v5052_v30 }
 0xf2a   :  { %v4065_v2 = vpop.eup %4064  ;;  %v1603_v24 = vpop.xlane.xlu2 %1602 }
 0xf2b   :  { %v1565_v49 = vmul.f32 %v4065_v2, %v1563_v21  ;;  %v1604_v43 = vrot.slane %v1603_v24, 4  ;;  %3591 = vmatpush.xpose.msk.msrb.mxu0 %vm193_vm1, %v5058_v31  ;;  %vm1571_vm4 = vweird.f32 %v4065_v2  ;;  %v5353_v31 = vld [vmem:[%s6026_s22 + $0x10] sm:$0xff] }
 0xf2c   :  { %vm1572_vm6 = vmor %vm1570_vm5, %vm1571_vm4 }
 0xf2d   :  { %v1566_v5 = vmul.f32 %v4065_v2, %v1565_v49  ;;  %v1605_v13 = vadd.f32 %v1604_v43, %v1603_v24 }
 0xf2f   :  { %v1567_v25 = vmul.f32 0.5, %v1566_v5  ;;  %v1606_v6 = vrot.slane %v1605_v13, 2  ;;  %3592 = vmatpush.xpose.msk.msrb.mxu0 %vm193_vm1, %v5346_v55 }
 0xf31   :  { %v1568_v28 = vsub.f32 1.5, %v1567_v25  ;;  %v1607_v30 = vadd.f32 %v1606_v6, %v1605_v13 }
 0xf33   :  { %v1569_v27 = vmul.f32 %v4065_v2, %v1568_v28  ;;  %v1608_v36 = vrot.slane %v1607_v30, 1  ;;  %3593 = vmatpush.xpose.msk.msrb.mxu0 %vm193_vm1, %v5353_v31 }
 0xf35   :  { %v1573_v37 = vsel %vm1572_vm6, %v4065_v2, %v1569_v27  ;;  %v1609_v39 = vadd.f32 %v1608_v36, %v1607_v30 }
 0xf36   :  { %3854 = vpush %v1573_v37 }
 0xf37   :  { %3856 = vpush %v1609_v39  ;;  %3594 = vmatpush.xpose.msk.msrb.mxu0 %vm193_vm1, %v5360_v52 }
 0xf3b   :  { %3595 = vmatpush.xpose.msk.msrb.mxu0 %vm193_vm1, %v5367_v14 }
 0xf67   :  { %s3855_s2 = spop %3854 }
 0xf68   :  { %v1575_v9 = vstv %s3855_s2  ;;  %s3857_s7 = spop %3856 }
 0xf69   :  { %v1576_v41 = vmul.f32 %v1575_v9, %v5322_v35  ;;  %s1611_s9 = smax.f32 %s4407_s29, %s3857_s7 }
 0xf6a   :  { %v1612_v42 = vstv %s1611_s9 }
 0xf6b   :  { %4066 = vrsqrt.f32 %v1612_v42  ;;  %3586 = vmatmul.msk.f32.vlgmr.msra.gmra.mxu3 %vm92_vm0, %v1576_v41  ;;  %vm1619_vm8 = vweird.f32 %v1612_v42 }
 0xf6c   :  { %2033 = vmatpush.msra.mxu3 %v5377_v23 }
 0xf6e   :  { %2034 = vmatpush.msra.mxu3 %v5383_v29 }
 0xf70   :  { %2035 = vmatpush.msra.mxu3 %v5389_v1 }
 0xf71   :  { %v4067_v44 = vpop.eup %4066 }
 0xf72   :  { %v1614_v35 = vmul.f32 %v4067_v44, %v1612_v42  ;;  %2036 = vmatpush.msra.mxu3 %v5395_v0  ;;  %vm1620_vm7 = vweird.f32 %v4067_v44 }
 0xf73   :  { %vm1621_vm9 = vmor %vm1619_vm8, %vm1620_vm7 }
 0xf74   :  { %v1615_v46 = vmul.f32 %v4067_v44, %v1614_v35 }
 0xf76   :  { %v1616_v47 = vmul.f32 0.5, %v1615_v46 }
 0xf78   :  { %v1617_v48 = vsub.f32 1.5, %v1616_v47 }
 0xf7a   :  { %v1618_v50 = vmul.f32 %v4067_v44, %v1617_v48 }
 0xf7c   :  { %v1622_v51 = vsel %vm1621_vm9, %v4067_v44, %v1618_v50 }
 0xf7d   :  { %3858 = vpush %v1622_v51 }
 0xf9b   :  { %v1646_v53 = vpop.f32.mrf.mxu0 }
 0xf9c   :  { %v1649_v32 = vmul.f32 %v1646_v53, %v1646_v53 }
 0xf9e   :  { %v1650_v54 = vsel %vm117_vm2, %v1649_v32, 0.0 }
 0xf9f   :  { %1651 = vadd.xlane.f32.xlu0 %v1650_v54 }
 0xfae   :  { %s3859_s28 = spop %3858 }
 0xfaf   :  { %v1624_v34 = vstv %s3859_s28 }
 0xfb0   :  { %v1625_v26 = vmul.f32 %v1624_v34, %v5327_v33 }
 0xfb2   :  { %3587 = vmatmul.msk.f32.vlgmr.msra.gmra.mxu0 %vm193_vm1, %v1625_v26 }
 0xfb3   :  { %3623 = vmatpush.xpose.msk.msra.mxu0 %vm92_vm0, %v5266_v57 }
 0xfb7   :  { %3624 = vmatpush.xpose.msk.msra.mxu0 %vm92_vm0, %v5272_v19 }
 0xfbb   :  { %3625 = vmatpush.xpose.msk.msra.mxu0 %vm92_vm0, %v5278_v11 }
 0xfbf   :  { %3626 = vmatpush.xpose.msk.msra.mxu0 %vm92_vm0, %v5284_v38 }
 0xfc3   :  { %3627 = vmatpush.xpose.msk.msra.mxu0 %vm92_vm0, %v5290_v40 }
 0xfc7   :  { %3628 = vmatpush.xpose.msk.msra.mxu0 %vm92_vm0, %v5296_v63 }
 0xfcb   :  { %3629 = vmatpush.xpose.msk.msra.mxu0 %vm92_vm0, %v5302_v17 }
 0xfcf   :  { %3630 = vmatpush.xpose.msk.msra.mxu0 %vm92_vm0, %v5308_v22 }
 0xfee   :  { %v5417_v33 = vpop.f32.mrf.mxu3 }
 0xfef   :  { %v1698_v3 = vmul.f32 %v5417_v33, %v5417_v33 }
 0xff1   :  { %v1699_v4 = vsel %vm167_vm3, %v1698_v3, 0.0 }
 0xff2   :  { %1700 = vadd.xlane.f32.xlu1 %v1699_v4 }
0x1012   :  { %v1652_v56 = vpop.xlane.xlu0 %1651 }
0x1013   :  { %v1653_v7 = vrot.slane %v1652_v56, 4 }
0x1015   :  { %v1654_v8 = vadd.f32 %v1653_v7, %v1652_v56 }
0x1017   :  { %v1655_v58 = vrot.slane %v1654_v8, 2 }
0x1019   :  { %v1656_v45 = vadd.f32 %v1655_v58, %v1654_v8 }
0x101b   :  { %v1657_v10 = vrot.slane %v1656_v45, 1 }
0x101d   :  { %v1658_v12 = vadd.f32 %v1657_v10, %v1656_v45 }
0x101f   :  { %3860 = vpush %v1658_v12 }
0x102f   :  { %v5422_v16 = vpop.f32.mrf.mxu0 }
0x1030   :  { %v1747_v59 = vmul.f32 %v5422_v16, %v5422_v16 }
0x1032   :  { %v1748_v60 = vsel %vm167_vm3, %v1747_v59, 0.0 }
0x1033   :  { %1749 = vadd.xlane.f32.xlu2 %v1748_v60 }
0x1050   :  { %s3861_s11 = spop %3860 }
0x1051   :  { %s1660_s0 = smax.f32 %s4407_s29, %s3861_s11 }
0x1052   :  { %v1661_v61 = vstv %s1660_s0 }
0x1053   :  { %4068 = vrsqrt.f32 %v1661_v61  ;;  %vm1668_vm11 = vweird.f32 %v1661_v61 }
0x1059   :  { %v4069_v62 = vpop.eup %4068 }
0x105a   :  { %v1663_v18 = vmul.f32 %v4069_v62, %v1661_v61  ;;  %vm1669_vm10 = vweird.f32 %v4069_v62  ;;  %v5455_v61 = vld [vmem:[%s6026_s22 + $0x38] sm:$0xff] }
0x105b   :  { %vm1670_vm12 = vmor %vm1668_vm11, %vm1669_vm10 }
0x105c   :  { %v1664_v15 = vmul.f32 %v4069_v62, %v1663_v18  ;;  %v5473_v18 = vld [vmem:[%s6026_s22 + $0x20] sm:$0xff] }
0x105e   :  { %v1665_v20 = vmul.f32 0.5, %v1664_v15 }
0x1060   :  { %v1666_v21 = vsub.f32 1.5, %v1665_v20 }
0x1062   :  { %v1667_v2 = vmul.f32 %v4069_v62, %v1666_v21 }
0x1064   :  { %v1671_v24 = vsel %vm1670_vm12, %v4069_v62, %v1667_v2  ;;  %v5461_v62 = vld [vmem:[%s6026_s22 + $0x30] sm:$0xff] }
0x1065   :  { %v1701_v49 = vpop.xlane.xlu1 %1700  ;;  %3862 = vpush %v1671_v24 }
0x1066   :  { %v1702_v43 = vrot.slane %v1701_v49, 4 }
0x1068   :  { %v1703_v5 = vadd.f32 %v1702_v43, %v1701_v49 }
0x106a   :  { %v1704_v13 = vrot.slane %v1703_v5, 2 }
0x106c   :  { %v1705_v25 = vadd.f32 %v1704_v13, %v1703_v5 }
0x106e   :  { %v1706_v6 = vrot.slane %v1705_v25, 1 }
0x1070   :  { %v1707_v28 = vadd.f32 %v1706_v6, %v1705_v25 }
0x1072   :  { %3864 = vpush %v1707_v28 }
0x1096   :  { %s3863_s30 = spop %3862 }
0x1097   :  { %v1673_v30 = vstv %s3863_s30 }
0x1098   :  { %v1674_v27 = vmul.f32 %v1673_v30, %v1646_v53 }
0x109a   :  { %3596 = vmatmul.msk.f32.vlgmr.msrb.gmra.mxu0 %vm193_vm1, %v1674_v27 }
0x109b   :  { %3658 = vmatpush.xpose.msk.msrb.mxu0 %vm92_vm0, %v5377_v23 }
0x109f   :  { %3659 = vmatpush.xpose.msk.msrb.mxu0 %vm92_vm0, %v5383_v29 }
0x10a3   :  { %s3865_s20 = spop %3864  ;;  %3660 = vmatpush.xpose.msk.msrb.mxu0 %vm92_vm0, %v5389_v1 }
0x10a4   :  { %s1709_s21 = smax.f32 %s4407_s29, %s3865_s20 }
0x10a5   :  { %v1710_v36 = vstv %s1709_s21 }
0x10a6   :  { %4070 = vrsqrt.f32 %v1710_v36  ;;  %v1750_v37 = vpop.xlane.xlu2 %1749  ;;  %vm1717_vm14 = vweird.f32 %v1710_v36 }
0x10a7   :  { %v1751_v39 = vrot.slane %v1750_v37, 4  ;;  %3661 = vmatpush.xpose.msk.msrb.mxu0 %vm92_vm0, %v5395_v0 }
0x10a9   :  { %v1752_v9 = vadd.f32 %v1751_v39, %v1750_v37 }
0x10ab   :  { %v1753_v41 = vrot.slane %v1752_v9, 2 }
0x10ac   :  { %v4071_v42 = vpop.eup %4070 }
0x10ad   :  { %v1712_v44 = vmul.f32 %v4071_v42, %v1710_v36  ;;  %v1754_v46 = vadd.f32 %v1753_v41, %v1752_v9  ;;  %vm1718_vm13 = vweird.f32 %v4071_v42 }
0x10ae   :  { %vm1719_vm15 = vmor %vm1717_vm14, %vm1718_vm13 }
0x10af   :  { %v1713_v35 = vmul.f32 %v4071_v42, %v1712_v44  ;;  %v1755_v50 = vrot.slane %v1754_v46, 1 }
0x10b1   :  { %v1714_v47 = vmul.f32 0.5, %v1713_v35  ;;  %v1756_v32 = vadd.f32 %v1755_v50, %v1754_v46 }
0x10b3   :  { %v1715_v48 = vsub.f32 1.5, %v1714_v47 }
0x10b5   :  { %v1716_v51 = vmul.f32 %v4071_v42, %v1715_v48 }
0x10b7   :  { %v1720_v53 = vsel %vm1719_vm15, %v4071_v42, %v1716_v51 }
0x10b8   :  { %3866 = vpush %v1720_v53 }
0x10b9   :  { %3868 = vpush %v1756_v32 }
0x10e9   :  { %s3867_s1 = spop %3866 }
0x10ea   :  { %v1722_v54 = vstv %s3867_s1  ;;  %s3869_s2 = spop %3868 }
0x10eb   :  { %v1723_v34 = vmul.f32 %v1722_v54, %v5417_v33  ;;  %s1758_s7 = smax.f32 %s4407_s29, %s3869_s2 }
0x10ec   :  { %v1759_v26 = vstv %s1758_s7 }
0x10ed   :  { %4072 = vrsqrt.f32 %v1759_v26  ;;  %3605 = vmatmul.msk.f32.vlgmr.msra.gmra.mxu1 %vm92_vm0, %v1723_v34  ;;  %vm1766_vm5 = vweird.f32 %v1759_v26 }
0x10ee   :  { %2274 = vmatpush.msra.mxu1 %v5266_v57 }
0x10f0   :  { %2275 = vmatpush.msra.mxu1 %v5272_v19 }
0x10f2   :  { %2276 = vmatpush.msra.mxu1 %v5278_v11 }
0x10f3   :  { %v4073_v3 = vpop.eup %4072 }
0x10f4   :  { %v1761_v4 = vmul.f32 %v4073_v3, %v1759_v26  ;;  %2277 = vmatpush.msra.mxu1 %v5284_v38  ;;  %vm1767_vm4 = vweird.f32 %v4073_v3 }
0x10f5   :  { %vm1768_vm6 = vmor %vm1766_vm5, %vm1767_vm4 }
0x10f6   :  { %v1762_v56 = vmul.f32 %v4073_v3, %v1761_v4  ;;  %2278 = vmatpush.msra.mxu1 %v5290_v40 }
0x10f8   :  { %v1763_v33 = vmul.f32 0.5, %v1762_v56  ;;  %2279 = vmatpush.msra.mxu1 %v5296_v63 }
0x10fa   :  { %v1764_v7 = vsub.f32 1.5, %v1763_v33  ;;  %2280 = vmatpush.msra.mxu1 %v5302_v17 }
0x10fc   :  { %v1765_v8 = vmul.f32 %v4073_v3, %v1764_v7  ;;  %2281 = vmatpush.msra.mxu1 %v5308_v22 }
0x10fe   :  { %v1769_v58 = vsel %vm1768_vm6, %v4073_v3, %v1765_v8 }
0x10ff   :  { %3870 = vpush %v1769_v58 }
0x1117   :  { %v1793_v45 = vpop.f32.mrf.mxu0 }
0x1118   :  { %v1796_v10 = vmul.f32 %v1793_v45, %v1793_v45 }
0x111a   :  { %v1797_v12 = vsel %vm167_vm3, %v1796_v10, 0.0 }
0x111b   :  { %1798 = vadd.xlane.f32.xlu0 %v1797_v12 }
0x1130   :  { %s3871_s9 = spop %3870 }
0x1131   :  { %v1771_v59 = vstv %s3871_s9 }
0x1132   :  { %v1772_v60 = vmul.f32 %v1771_v59, %v5422_v16  ;;  %v5467_v16 = vld [vmem:[%s6026_s22 + $0x28] sm:$0xff] }
0x1134   :  { %3610 = vmatmul.msk.f32.vlgmr.msrb.gmra.mxu2 %vm92_vm0, %v1772_v60 }
0x1135   :  { %2225 = vmatpush.msrb.mxu2 %v5455_v61 }
0x1137   :  { %2226 = vmatpush.msrb.mxu2 %v5461_v62 }
0x1139   :  { %2227 = vmatpush.msrb.mxu2 %v5467_v16 }
0x113b   :  { %2228 = vmatpush.msrb.mxu2 %v5473_v18 }
0x113d   :  { %2229 = vmatpush.msrb.mxu2 %v5346_v55 }
0x113f   :  { %2230 = vmatpush.msrb.mxu2 %v5353_v31 }
0x1141   :  { %2231 = vmatpush.msrb.mxu2 %v5360_v52 }
0x1143   :  { %2232 = vmatpush.msrb.mxu2 %v5367_v14 }
0x116a   :  { %v5480_v15 = vpop.f32.mrf.mxu1 }
0x116b   :  { %v1845_v20 = vmul.f32 %v5480_v15, %v5480_v15 }
0x116d   :  { %v1846_v21 = vsel %vm167_vm3, %v1845_v20, 0.0 }
0x116e   :  { %1847 = vadd.xlane.f32.xlu1 %v1846_v21 }
0x118e   :  { %v1799_v2 = vpop.xlane.xlu0 %1798 }
0x118f   :  { %v1800_v24 = vrot.slane %v1799_v2, 4 }
0x1191   :  { %v1801_v49 = vadd.f32 %v1800_v24, %v1799_v2 }
0x1193   :  { %v1802_v43 = vrot.slane %v1801_v49, 2 }
0x1195   :  { %v1803_v5 = vadd.f32 %v1802_v43, %v1801_v49 }
0x1197   :  { %v1804_v13 = vrot.slane %v1803_v5, 1 }
0x1199   :  { %v1805_v25 = vadd.f32 %v1804_v13, %v1803_v5 }
0x119b   :  { %3872 = vpush %v1805_v25 }
0x11b7   :  { %v5485_v6 = vpop.f32.mrf.mxu2 }
0x11b8   :  { %v1894_v28 = vmul.f32 %v5485_v6, %v5485_v6 }
0x11ba   :  { %v1895_v30 = vsel %vm117_vm2, %v1894_v28, 0.0 }
0x11bb   :  { %1896 = vadd.xlane.f32.xlu2 %v1895_v30 }
0x11cc   :  { %s3873_s28 = spop %3872 }
0x11cd   :  { %s1807_s11 = smax.f32 %s4407_s29, %s3873_s28 }
0x11ce   :  { %v1808_v27 = vstv %s1807_s11 }
0x11cf   :  { %4074 = vrsqrt.f32 %v1808_v27  ;;  %vm1815_vm8 = vweird.f32 %v1808_v27 }
0x11d5   :  { %v4075_v36 = vpop.eup %4074 }
0x11d6   :  { %v1810_v37 = vmul.f32 %v4075_v36, %v1808_v27  ;;  %vm1816_vm7 = vweird.f32 %v4075_v36 }
0x11d7   :  { %vm1817_vm9 = vmor %vm1815_vm8, %vm1816_vm7 }
0x11d8   :  { %v1811_v39 = vmul.f32 %v4075_v36, %v1810_v37 }
0x11da   :  { %v1812_v9 = vmul.f32 0.5, %v1811_v39 }
0x11dc   :  { %v1813_v41 = vsub.f32 1.5, %v1812_v9 }
0x11de   :  { %v1814_v42 = vmul.f32 %v4075_v36, %v1813_v41 }
0x11e0   :  { %v1818_v44 = vsel %vm1817_vm9, %v4075_v36, %v1814_v42 }
0x11e1   :  { %v1848_v35 = vpop.xlane.xlu1 %1847  ;;  %3874 = vpush %v1818_v44 }
0x11e2   :  { %v1849_v46 = vrot.slane %v1848_v35, 4 }
0x11e4   :  { %v1850_v47 = vadd.f32 %v1849_v46, %v1848_v35 }
0x11e6   :  { %v1851_v48 = vrot.slane %v1850_v47, 2 }
0x11e8   :  { %v1852_v50 = vadd.f32 %v1851_v48, %v1850_v47 }
0x11ea   :  { %v1853_v51 = vrot.slane %v1852_v50, 1 }
0x11ec   :  { %v1854_v53 = vadd.f32 %v1853_v51, %v1852_v50 }
0x11ee   :  { %3876 = vpush %v1854_v53 }
0x1212   :  { %s3875_s0 = spop %3874 }
0x1213   :  { %v1820_v32 = vstv %s3875_s0 }
0x1214   :  { %v1821_v54 = vmul.f32 %v1820_v32, %v1793_v45 }
0x1216   :  { %3611 = vmatmul.msk.f32.vlgmr.msrb.gmra.mxu3 %vm92_vm0, %v1821_v54 }
0x1217   :  { %3614 = vmatpush.xpose.msk.msrb.mxu3 %vm193_vm1, %v5455_v61 }
0x121b   :  { %3615 = vmatpush.xpose.msk.msrb.mxu3 %vm193_vm1, %v5461_v62 }
0x121f   :  { %s3877_s30 = spop %3876  ;;  %3616 = vmatpush.xpose.msk.msrb.mxu3 %vm193_vm1, %v5467_v16 }
0x1220   :  { %s1856_s20 = smax.f32 %s4407_s29, %s3877_s30 }
0x1221   :  { %v1857_v34 = vstv %s1856_s20 }
0x1222   :  { %4076 = vrsqrt.f32 %v1857_v34  ;;  %vm1864_vm11 = vweird.f32 %v1857_v34 }
0x1223   :  { %3617 = vmatpush.xpose.msk.msrb.mxu3 %vm193_vm1, %v5473_v18 }
0x1227   :  { %3618 = vmatpush.xpose.msk.msrb.mxu3 %vm193_vm1, %v5346_v55 }
0x1228   :  { %v4077_v26 = vpop.eup %4076 }
0x1229   :  { %v1859_v3 = vmul.f32 %v4077_v26, %v1857_v34  ;;  %vm1865_vm10 = vweird.f32 %v4077_v26 }
0x122a   :  { %vm1866_vm12 = vmor %vm1864_vm11, %vm1865_vm10 }
0x122b   :  { %v1860_v4 = vmul.f32 %v4077_v26, %v1859_v3  ;;  %3619 = vmatpush.xpose.msk.msrb.mxu3 %vm193_vm1, %v5353_v31 }
0x122d   :  { %v1861_v56 = vmul.f32 0.5, %v1860_v4 }
0x122e   :  { %v1897_v33 = vpop.xlane.xlu2 %1896 }
0x122f   :  { %v1862_v7 = vsub.f32 1.5, %v1861_v56  ;;  %v1898_v8 = vrot.slane %v1897_v33, 4  ;;  %3620 = vmatpush.xpose.msk.msrb.mxu3 %vm193_vm1, %v5360_v52 }
0x1231   :  { %v1899_v58 = vadd.f32 %v1898_v8, %v1897_v33  ;;  %v1863_v45 = vmul.f32 %v4077_v26, %v1862_v7 }
0x1233   :  { %v1900_v10 = vrot.slane %v1899_v58, 2  ;;  %v1867_v12 = vsel %vm1866_vm12, %v4077_v26, %v1863_v45  ;;  %3621 = vmatpush.xpose.msk.msrb.mxu3 %vm193_vm1, %v5367_v14 }
0x1234   :  { %3878 = vpush %v1867_v12 }
0x1235   :  { %v1901_v59 = vadd.f32 %v1900_v10, %v1899_v58 }
0x1237   :  { %v1902_v60 = vrot.slane %v1901_v59, 1 }
0x1239   :  { %v1903_v20 = vadd.f32 %v1902_v60, %v1901_v59 }
0x123b   :  { %3880 = vpush %v1903_v20 }
0x1265   :  { %s3879_s21 = spop %3878 }
0x1266   :  { %v1869_v21 = vstv %s3879_s21 }
0x1267   :  { %v1870_v2 = vmul.f32 %v1869_v21, %v5480_v15 }
0x1269   :  { %3612 = vmatmul.msk.f32.vlgmr.msra.gmra.mxu2 %vm92_vm0, %v1870_v2 }
0x126a   :  { %2327 = vmatpush.msra.mxu2 %v5377_v23 }
0x126c   :  { %s3881_s1 = spop %3880  ;;  %2328 = vmatpush.msra.mxu2 %v5383_v29 }
0x126d   :  { %s1905_s2 = smax.f32 %s4407_s29, %s3881_s1 }
0x126e   :  { %v1906_v24 = vstv %s1905_s2  ;;  %2329 = vmatpush.msra.mxu2 %v5389_v1 }
0x126f   :  { %4078 = vrsqrt.f32 %v1906_v24  ;;  %vm1913_vm14 = vweird.f32 %v1906_v24 }
0x1270   :  { %2330 = vmatpush.msra.mxu2 %v5395_v0 }
0x1275   :  { %v4079_v49 = vpop.eup %4078 }
0x1276   :  { %v1908_v43 = vmul.f32 %v4079_v49, %v1906_v24  ;;  %vm1914_vm13 = vweird.f32 %v4079_v49 }
0x1277   :  { %vm1915_vm15 = vmor %vm1913_vm14, %vm1914_vm13 }
0x1278   :  { %v1909_v5 = vmul.f32 %v4079_v49, %v1908_v43 }
0x127a   :  { %v1910_v13 = vmul.f32 0.5, %v1909_v5 }
0x127c   :  { %v1911_v15 = vsub.f32 1.5, %v1910_v13 }
0x127e   :  { %v1912_v25 = vmul.f32 %v4079_v49, %v1911_v15 }
0x1280   :  { %v1916_v28 = vsel %vm1915_vm15, %v4079_v49, %v1912_v25 }
0x1281   :  { %3882 = vpush %v1916_v28 }
0x1299   :  { %v1940_v30 = vpop.f32.mrf.mxu3 }
0x129a   :  { %v1943_v27 = vmul.f32 %v1940_v30, %v1940_v30 }
0x129c   :  { %v1944_v36 = vsel %vm117_vm2, %v1943_v27, 0.0 }
0x129d   :  { %1945 = vadd.xlane.f32.xlu0 %v1944_v36 }
0x12b2   :  { %s3883_s7 = spop %3882 }
0x12b3   :  { %v1918_v37 = vstv %s3883_s7 }
0x12b4   :  { %v1919_v39 = vmul.f32 %v1918_v37, %v5485_v6 }
0x12b6   :  { %3613 = vmatmul.msk.f32.vlgmr.msra.gmra.mxu3 %vm193_vm1, %v1919_v39 }
0x12b7   :  { %3649 = vmatpush.xpose.msk.msra.mxu3 %vm92_vm0, %v5266_v57 }
0x12bb   :  { %3650 = vmatpush.xpose.msk.msra.mxu3 %vm92_vm0, %v5272_v19 }
0x12bf   :  { %3651 = vmatpush.xpose.msk.msra.mxu3 %vm92_vm0, %v5278_v11 }
0x12c3   :  { %3652 = vmatpush.xpose.msk.msra.mxu3 %vm92_vm0, %v5284_v38 }
0x12c7   :  { %3653 = vmatpush.xpose.msk.msra.mxu3 %vm92_vm0, %v5290_v40 }
0x12cb   :  { %3654 = vmatpush.xpose.msk.msra.mxu3 %vm92_vm0, %v5296_v63 }
0x12cf   :  { %3655 = vmatpush.xpose.msk.msra.mxu3 %vm92_vm0, %v5302_v17 }
0x12d3   :  { %3656 = vmatpush.xpose.msk.msra.mxu3 %vm92_vm0, %v5308_v22 }
0x12ec   :  { %v5535_v6 = vpop.f32.mrf.mxu2 }
0x12ed   :  { %v1992_v9 = vmul.f32 %v5535_v6, %v5535_v6 }
0x12ef   :  { %v1993_v41 = vsel %vm167_vm3, %v1992_v9, 0.0 }
0x12f0   :  { %1994 = vadd.xlane.f32.xlu1 %v1993_v41 }
0x1310   :  { %v1946_v42 = vpop.xlane.xlu0 %1945 }
0x1311   :  { %v1947_v44 = vrot.slane %v1946_v42, 4 }
0x1313   :  { %v1948_v35 = vadd.f32 %v1947_v44, %v1946_v42 }
0x1315   :  { %v1949_v46 = vrot.slane %v1948_v35, 2 }
0x1317   :  { %v1950_v47 = vadd.f32 %v1949_v46, %v1948_v35 }
0x1319   :  { %v1951_v48 = vrot.slane %v1950_v47, 1 }
0x131b   :  { %v1952_v50 = vadd.f32 %v1951_v48, %v1950_v47 }
0x131d   :  { %3884 = vpush %v1952_v50 }
0x1339   :  { %v5540_v51 = vpop.f32.mrf.mxu3 }
0x133a   :  { %v2041_v53 = vmul.f32 %v5540_v51, %v5540_v51 }
0x133c   :  { %v2042_v32 = vsel %vm167_vm3, %v2041_v53, 0.0 }
0x133d   :  { %2043 = vadd.xlane.f32.xlu2 %v2042_v32 }
0x134e   :  { %s3885_s9 = spop %3884 }
0x134f   :  { %s1954_s8 = smax.f32 %s4407_s29, %s3885_s9 }
0x1350   :  { %v1955_v54 = vstv %s1954_s8 }
0x1351   :  { %4080 = vrsqrt.f32 %v1955_v54  ;;  %vm1962_vm5 = vweird.f32 %v1955_v54 }
0x1357   :  { %v4081_v34 = vpop.eup %4080 }
0x1358   :  { %v1957_v26 = vmul.f32 %v4081_v34, %v1955_v54  ;;  %vm1963_vm4 = vweird.f32 %v4081_v34 }
0x1359   :  { %vm1964_vm6 = vmor %vm1962_vm5, %vm1963_vm4 }
0x135a   :  { %v1958_v3 = vmul.f32 %v4081_v34, %v1957_v26 }
0x135c   :  { %v1959_v4 = vmul.f32 0.5, %v1958_v3 }
0x135e   :  { %v1960_v56 = vsub.f32 1.5, %v1959_v4 }
0x1360   :  { %v1961_v33 = vmul.f32 %v4081_v34, %v1960_v56 }
0x1362   :  { %v1965_v7 = vsel %vm1964_vm6, %v4081_v34, %v1961_v33 }
0x1363   :  { %v1995_v8 = vpop.xlane.xlu1 %1994  ;;  %3886 = vpush %v1965_v7 }
0x1364   :  { %v1996_v58 = vrot.slane %v1995_v8, 4 }
0x1366   :  { %v1997_v45 = vadd.f32 %v1996_v58, %v1995_v8 }
0x1368   :  { %v1998_v10 = vrot.slane %v1997_v45, 2 }
0x136a   :  { %v1999_v12 = vadd.f32 %v1998_v10, %v1997_v45 }
0x136c   :  { %v2000_v59 = vrot.slane %v1999_v12, 1 }
0x136e   :  { %v2001_v60 = vadd.f32 %v2000_v59, %v1999_v12 }
0x1370   :  { %3888 = vpush %v2001_v60 }
0x1394   :  { %s3887_s23 = spop %3886 }
0x1395   :  { %v1967_v20 = vstv %s3887_s23 }
0x1396   :  { %v1968_v21 = vmul.f32 %v1967_v20, %v1940_v30 }
0x1398   :  { %3622 = vmatmul.msk.f32.vlgmr.msrb.gmra.mxu3 %vm193_vm1, %v1968_v21 }
0x1399   :  { %3684 = vmatpush.xpose.msk.msrb.mxu3 %vm92_vm0, %v5377_v23 }
0x139d   :  { %3685 = vmatpush.xpose.msk.msrb.mxu3 %vm92_vm0, %v5383_v29 }
0x13a1   :  { %s3889_s24 = spop %3888  ;;  %3686 = vmatpush.xpose.msk.msrb.mxu3 %vm92_vm0, %v5389_v1 }
0x13a2   :  { %s2003_s3 = smax.f32 %s4407_s29, %s3889_s24 }
0x13a3   :  { %v2004_v2 = vstv %s2003_s3 }
0x13a4   :  { %4082 = vrsqrt.f32 %v2004_v2  ;;  %vm2011_vm8 = vweird.f32 %v2004_v2 }
0x13a5   :  { %3687 = vmatpush.xpose.msk.msrb.mxu3 %vm92_vm0, %v5395_v0 }
0x13aa   :  { %v4083_v24 = vpop.eup %4082 }
0x13ab   :  { %v2006_v49 = vmul.f32 %v4083_v24, %v2004_v2  ;;  %vm2012_vm7 = vweird.f32 %v4083_v24 }
0x13ac   :  { %vm2013_vm9 = vmor %vm2011_vm8, %vm2012_vm7 }
0x13ad   :  { %v2007_v43 = vmul.f32 %v4083_v24, %v2006_v49 }
0x13af   :  { %v2008_v5 = vmul.f32 0.5, %v2007_v43 }
0x13b0   :  { %v2044_v13 = vpop.xlane.xlu2 %2043 }
0x13b1   :  { %v2009_v15 = vsub.f32 1.5, %v2008_v5  ;;  %v2045_v25 = vrot.slane %v2044_v13, 4 }
0x13b3   :  { %v2046_v28 = vadd.f32 %v2045_v25, %v2044_v13  ;;  %v2010_v30 = vmul.f32 %v4083_v24, %v2009_v15 }
0x13b5   :  { %v2047_v27 = vrot.slane %v2046_v28, 2  ;;  %v2014_v36 = vsel %vm2013_vm9, %v4083_v24, %v2010_v30 }
0x13b6   :  { %3890 = vpush %v2014_v36 }
0x13b7   :  { %v2048_v37 = vadd.f32 %v2047_v27, %v2046_v28 }
0x13b9   :  { %v2049_v39 = vrot.slane %v2048_v37, 1 }
0x13bb   :  { %v2050_v9 = vadd.f32 %v2049_v39, %v2048_v37 }
0x13bd   :  { %3892 = vpush %v2050_v9 }
0x13e7   :  { %s3891_s10 = spop %3890 }
0x13e8   :  { %v2016_v41 = vstv %s3891_s10 }
0x13e9   :  { %v2017_v42 = vmul.f32 %v2016_v41, %v5535_v6 }
0x13eb   :  { %3631 = vmatmul.msk.f32.vlgmr.msra.gmra.mxu0 %vm92_vm0, %v2017_v42 }
0x13ec   :  { %2568 = vmatpush.msra.mxu0 %v5266_v57 }
0x13ee   :  { %s3893_s26 = spop %3892  ;;  %2569 = vmatpush.msra.mxu0 %v5272_v19 }
0x13ef   :  { %s2052_s12 = smax.f32 %s4407_s29, %s3893_s26 }
0x13f0   :  { %v2053_v44 = vstv %s2052_s12  ;;  %2570 = vmatpush.msra.mxu0 %v5278_v11 }
0x13f1   :  { %4084 = vrsqrt.f32 %v2053_v44  ;;  %vm2060_vm11 = vweird.f32 %v2053_v44 }
0x13f2   :  { %2571 = vmatpush.msra.mxu0 %v5284_v38 }
0x13f4   :  { %2572 = vmatpush.msra.mxu0 %v5290_v40 }
0x13f6   :  { %2573 = vmatpush.msra.mxu0 %v5296_v63 }
0x13f7   :  { %v4085_v6 = vpop.eup %4084 }
0x13f8   :  { %v2055_v35 = vmul.f32 %v4085_v6, %v2053_v44  ;;  %2574 = vmatpush.msra.mxu0 %v5302_v17  ;;  %vm2061_vm10 = vweird.f32 %v4085_v6 }
0x13f9   :  { %vm2062_vm12 = vmor %vm2060_vm11, %vm2061_vm10 }
0x13fa   :  { %v2056_v57 = vmul.f32 %v4085_v6, %v2055_v35  ;;  %2575 = vmatpush.msra.mxu0 %v5308_v22 }
0x13fc   :  { %v2057_v19 = vmul.f32 0.5, %v2056_v57 }
0x13fe   :  { %v2058_v46 = vsub.f32 1.5, %v2057_v19 }
0x1400   :  { %v2059_v47 = vmul.f32 %v4085_v6, %v2058_v46 }
0x1402   :  { %v2063_v11 = vsel %vm2062_vm12, %v4085_v6, %v2059_v47 }
0x1403   :  { %3894 = vpush %v2063_v11 }
0x141b   :  { %v2087_v38 = vpop.f32.mrf.mxu3 }
0x141c   :  { %v2090_v48 = vmul.f32 %v2087_v38, %v2087_v38 }
0x141e   :  { %v2091_v40 = vsel %vm167_vm3, %v2090_v48, 0.0 }
0x141f   :  { %2092 = vadd.xlane.f32.xlu0 %v2091_v40 }
0x1434   :  { %s3895_s27 = spop %3894 }
0x1435   :  { %v2065_v63 = vstv %s3895_s27 }
0x1436   :  { %v2066_v17 = vmul.f32 %v2065_v63, %v5540_v51 }
0x1438   :  { %3636 = vmatmul.msk.f32.vlgmr.msrb.gmra.mxu1 %vm92_vm0, %v2066_v17 }
0x1439   :  { %2519 = vmatpush.msrb.mxu1 %v5455_v61 }
0x143b   :  { %2520 = vmatpush.msrb.mxu1 %v5461_v62 }
0x143d   :  { %2521 = vmatpush.msrb.mxu1 %v5467_v16 }
0x143f   :  { %2522 = vmatpush.msrb.mxu1 %v5473_v18 }
0x1441   :  { %2523 = vmatpush.msrb.mxu1 %v5346_v55 }
0x1443   :  { %2524 = vmatpush.msrb.mxu1 %v5353_v31 }
0x1445   :  { %2525 = vmatpush.msrb.mxu1 %v5360_v52 }
0x1447   :  { %2526 = vmatpush.msrb.mxu1 %v5367_v14 }
0x1468   :  { %v5578_v22 = vpop.f32.mrf.mxu0 }
0x1469   :  { %v2139_v50 = vmul.f32 %v5578_v22, %v5578_v22 }
0x146b   :  { %v2140_v51 = vsel %vm167_vm3, %v2139_v50, 0.0  ;;  %v5631_v50 = vld [vmem:[%s6027_s25 + $0x30] sm:$0xff] }
0x146c   :  { %2141 = vadd.xlane.f32.xlu1 %v2140_v51  ;;  %v5638_v51 = vld [vmem:[%s6027_s25 + $0x28] sm:$0xff] }
0x1492   :  { %v2093_v53 = vpop.xlane.xlu0 %2092 }
0x1493   :  { %v2094_v32 = vrot.slane %v2093_v53, 4 }
0x1495   :  { %v2095_v54 = vadd.f32 %v2094_v32, %v2093_v53  ;;  %v5645_v53 = vld [vmem:[%s6027_s25 + $0x20] sm:$0xff]  ;;  %v5652_v32 = vld [vmem:[%s6027_s25 + $0x18] sm:$0xff] }
0x1497   :  { %v2096_v34 = vrot.slane %v2095_v54, 2 }
0x1499   :  { %v2097_v26 = vadd.f32 %v2096_v34, %v2095_v54  ;;  %v5659_v54 = vld [vmem:[%s6027_s25 + $0x10] sm:$0xff]  ;;  %v5666_v34 = vld [vmem:[%s6027_s25 + $0x8] sm:$0xff] }
0x149b   :  { %v2098_v3 = vrot.slane %v2097_v26, 1 }
0x149d   :  { %v2099_v4 = vadd.f32 %v2098_v3, %v2097_v26  ;;  %v5673_v26 = vld [vmem:[%s6027_s25] sm:$0xff] }
0x149f   :  { %3896 = vpush %v2099_v4 }
0x14b5   :  { %v5583_v56 = vpop.f32.mrf.mxu1 }
0x14b6   :  { %v2188_v33 = vmul.f32 %v5583_v56, %v5583_v56 }
0x14b8   :  { %v2189_v7 = vsel %vm117_vm2, %v2188_v33, 0.0 }
0x14b9   :  { %2190 = vadd.xlane.f32.xlu2 %v2189_v7 }
0x14d0   :  { %s3897_s28 = spop %3896 }
0x14d1   :  { %s2101_s11 = smax.f32 %s4407_s29, %s3897_s28 }
0x14d2   :  { %v2102_v8 = vstv %s2101_s11 }
0x14d3   :  { %4086 = vrsqrt.f32 %v2102_v8  ;;  %vm2109_vm14 = vweird.f32 %v2102_v8 }
0x14d9   :  { %v4087_v58 = vpop.eup %4086 }
0x14da   :  { %v2104_v45 = vmul.f32 %v4087_v58, %v2102_v8  ;;  %vm2110_vm13 = vweird.f32 %v4087_v58 }
0x14db   :  { %vm2111_vm15 = vmor %vm2109_vm14, %vm2110_vm13 }
0x14dc   :  { %v2105_v10 = vmul.f32 %v4087_v58, %v2104_v45 }
0x14de   :  { %v2106_v12 = vmul.f32 0.5, %v2105_v10 }
0x14df   :  { %v2142_v59 = vpop.xlane.xlu1 %2141 }
0x14e0   :  { %v2107_v60 = vsub.f32 1.5, %v2106_v12  ;;  %v2143_v20 = vrot.slane %v2142_v59, 4 }
0x14e2   :  { %v2144_v21 = vadd.f32 %v2143_v20, %v2142_v59  ;;  %v2108_v2 = vmul.f32 %v4087_v58, %v2107_v60 }
0x14e4   :  { %v2145_v24 = vrot.slane %v2144_v21, 2  ;;  %v2112_v49 = vsel %vm2111_vm15, %v4087_v58, %v2108_v2 }
0x14e5   :  { %3898 = vpush %v2112_v49 }
0x14e6   :  { %v2146_v43 = vadd.f32 %v2145_v24, %v2144_v21 }
0x14e8   :  { %v2147_v5 = vrot.slane %v2146_v43, 1 }
0x14ea   :  { %v2148_v13 = vadd.f32 %v2147_v5, %v2146_v43 }
0x14ec   :  { %3900 = vpush %v2148_v13 }
0x1516   :  { %s3899_s0 = spop %3898 }
0x1517   :  { %v2114_v15 = vstv %s3899_s0 }
0x1518   :  { %v2115_v25 = vmul.f32 %v2114_v15, %v2087_v38 }
0x151a   :  { %3637 = vmatmul.msk.f32.vlgmr.msrb.gmra.mxu2 %vm92_vm0, %v2115_v25 }
0x151b   :  { %3640 = vmatpush.xpose.msk.msrb.mxu2 %vm193_vm1, %v5455_v61 }
0x151d   :  { %s3901_s30 = spop %3900 }
0x151e   :  { %s2150_s20 = smax.f32 %s4407_s29, %s3901_s30 }
0x151f   :  { %v2151_v28 = vstv %s2150_s20  ;;  %3641 = vmatpush.xpose.msk.msrb.mxu2 %vm193_vm1, %v5461_v62 }
0x1520   :  { %4088 = vrsqrt.f32 %v2151_v28  ;;  %vm2158_vm5 = vweird.f32 %v2151_v28 }
0x1523   :  { %3642 = vmatpush.xpose.msk.msrb.mxu2 %vm193_vm1, %v5467_v16 }
0x1526   :  { %v4089_v30 = vpop.eup %4088 }
0x1527   :  { %v2153_v27 = vmul.f32 %v4089_v30, %v2151_v28  ;;  %3643 = vmatpush.xpose.msk.msrb.mxu2 %vm193_vm1, %v5473_v18  ;;  %vm2159_vm4 = vweird.f32 %v4089_v30 }
0x1528   :  { %vm2160_vm6 = vmor %vm2158_vm5, %vm2159_vm4 }
0x1529   :  { %v2154_v36 = vmul.f32 %v4089_v30, %v2153_v27 }
0x152b   :  { %v2155_v37 = vmul.f32 0.5, %v2154_v36  ;;  %3644 = vmatpush.xpose.msk.msrb.mxu2 %vm193_vm1, %v5346_v55 }
0x152c   :  { %v2191_v39 = vpop.xlane.xlu2 %2190 }
0x152d   :  { %v2156_v9 = vsub.f32 1.5, %v2155_v37  ;;  %v2192_v41 = vrot.slane %v2191_v39, 4 }
0x152f   :  { %v2193_v42 = vadd.f32 %v2192_v41, %v2191_v39  ;;  %v2157_v44 = vmul.f32 %v4089_v30, %v2156_v9  ;;  %3645 = vmatpush.xpose.msk.msrb.mxu2 %vm193_vm1, %v5353_v31 }
0x1531   :  { %v2194_v6 = vrot.slane %v2193_v42, 2  ;;  %v2161_v35 = vsel %vm2160_vm6, %v4089_v30, %v2157_v44  ;;  %v5694_v44 = vld [vmem:[%s6004_s5 + $0x18] sm:$0xff] }
0x1532   :  { %3902 = vpush %v2161_v35 }
0x1533   :  { %v2195_v57 = vadd.f32 %v2194_v6, %v2193_v42  ;;  %3646 = vmatpush.xpose.msk.msrb.mxu2 %vm193_vm1, %v5360_v52  ;;  %v5701_v6 = vld [vmem:[%s6004_s5 + $0x10] sm:$0xff] }
0x1535   :  { %v2196_v19 = vrot.slane %v2195_v57, 1 }
0x1537   :  { %v2197_v55 = vadd.f32 %v2196_v19, %v2195_v57  ;;  %3647 = vmatpush.xpose.msk.msrb.mxu2 %vm193_vm1, %v5367_v14 }
0x1539   :  { %3904 = vpush %v2197_v55  ;;  %v5708_v55 = vld [vmem:[%s6004_s5 + $0x8] sm:$0xff] }
0x1563   :  { %s3903_s21 = spop %3902 }
0x1564   :  { %v2163_v46 = vstv %s3903_s21 }
0x1565   :  { %v2164_v47 = vmul.f32 %v2163_v46, %v5578_v22  ;;  %v5624_v22 = vld [vmem:[%s6027_s25 + $0x38] sm:$0xff] }
0x1567   :  { %3638 = vmatmul.msk.f32.vlgmr.msra.gmra.mxu1 %vm92_vm0, %v2164_v47 }
0x1568   :  { %2621 = vmatpush.msra.mxu1 %v5377_v23 }
0x156a   :  { %s3905_s1 = spop %3904  ;;  %2622 = vmatpush.msra.mxu1 %v5383_v29 }
0x156b   :  { %s2199_s2 = smax.f32 %s4407_s29, %s3905_s1 }
0x156c   :  { %v2200_v31 = vstv %s2199_s2  ;;  %2623 = vmatpush.msra.mxu1 %v5389_v1 }
0x156d   :  { %4090 = vrsqrt.f32 %v2200_v31  ;;  %vm2207_vm8 = vweird.f32 %v2200_v31 }
0x156e   :  { %2624 = vmatpush.msra.mxu1 %v5395_v0 }
0x1573   :  { %v4091_v52 = vpop.eup %4090 }
0x1574   :  { %v2202_v14 = vmul.f32 %v4091_v52, %v2200_v31  ;;  %vm2208_vm7 = vweird.f32 %v4091_v52  ;;  %v5715_v31 = vld [vmem:[%s6004_s5] sm:$0xff] }
0x1575   :  { %vm2209_vm9 = vmor %vm2207_vm8, %vm2208_vm7 }
0x1576   :  { %v2203_v11 = vmul.f32 %v4091_v52, %v2202_v14 }
0x1578   :  { %v2204_v38 = vmul.f32 0.5, %v2203_v11 }
0x157a   :  { %v2205_v48 = vsub.f32 1.5, %v2204_v38 }
0x157c   :  { %v2206_v40 = vmul.f32 %v4091_v52, %v2205_v48 }
0x157e   :  { %v2210_v23 = vsel %vm2209_vm9, %v4091_v52, %v2206_v40 }
0x157f   :  { %3906 = vpush %v2210_v23 }
0x159d   :  { %v5614_v29 = vpop.f32.mrf.mxu2 }
0x159e   :  { %v2237_v63 = vmul.f32 %v5614_v29, %v5614_v29 }
0x15a0   :  { %v2238_v1 = vsel %vm117_vm2, %v2237_v63, 0.0 }
0x15a1   :  { %2239 = vadd.xlane.f32.xlu0 %v2238_v1 }
0x15b0   :  { %s3907_s7 = spop %3906 }
0x15b1   :  { %v2212_v0 = vstv %s3907_s7 }
0x15b2   :  { %v2213_v17 = vmul.f32 %v2212_v0, %v5583_v56 }
0x15b4   :  { %3639 = vmatmul.msk.f32.vlgmr.msra.gmra.mxu2 %vm193_vm1, %v2213_v17 }
0x15b5   :  { %3675 = vmatpush.xpose.msk.msra.mxu2 %vm92_vm0, %v5624_v22 }
0x15b9   :  { %3676 = vmatpush.xpose.msk.msra.mxu2 %vm92_vm0, %v5631_v50 }
0x15bd   :  { %3677 = vmatpush.xpose.msk.msra.mxu2 %vm92_vm0, %v5638_v51 }
0x15c1   :  { %3678 = vmatpush.xpose.msk.msra.mxu2 %vm92_vm0, %v5645_v53 }
0x15c5   :  { %3679 = vmatpush.xpose.msk.msra.mxu2 %vm92_vm0, %v5652_v32 }
0x15c9   :  { %3680 = vmatpush.xpose.msk.msra.mxu2 %vm92_vm0, %v5659_v54 }
0x15cd   :  { %3681 = vmatpush.xpose.msk.msra.mxu2 %vm92_vm0, %v5666_v34 }
0x15d1   :  { %3682 = vmatpush.xpose.msk.msra.mxu2 %vm92_vm0, %v5673_v26 }
0x15e4   :  { %v5677_v3 = vpop.f32.mrf.mxu1 }
0x15e5   :  { %v2286_v4 = vmul.f32 %v5677_v3, %v5677_v3 }
0x15e7   :  { %v2287_v56 = vsel %vm167_vm3, %v2286_v4, 0.0 }
0x15e8   :  { %2288 = vadd.xlane.f32.xlu1 %v2287_v56 }
0x1614   :  { %v2240_v33 = vpop.xlane.xlu0 %2239 }
0x1615   :  { %v2241_v7 = vrot.slane %v2240_v33, 4 }
0x1617   :  { %v2242_v8 = vadd.f32 %v2241_v7, %v2240_v33 }
0x1619   :  { %v2243_v58 = vrot.slane %v2242_v8, 2 }
0x161b   :  { %v2244_v45 = vadd.f32 %v2243_v58, %v2242_v8 }
0x161d   :  { %v2245_v10 = vrot.slane %v2244_v45, 1 }
0x161f   :  { %v2246_v12 = vadd.f32 %v2245_v10, %v2244_v45 }
0x1621   :  { %3908 = vpush %v2246_v12 }
0x1637   :  { %v5682_v59 = vpop.f32.mrf.mxu2 }
0x1638   :  { %v2335_v60 = vmul.f32 %v5682_v59, %v5682_v59 }
0x163a   :  { %v2336_v20 = vsel %vm167_vm3, %v2335_v60, 0.0 }
0x163b   :  { %2337 = vadd.xlane.f32.xlu2 %v2336_v20 }
0x1652   :  { %s3909_s25 = spop %3908 }
0x1653   :  { %s2248_s2 = smax.f32 %s4407_s29, %s3909_s25 }
0x1654   :  { %v2249_v21 = vstv %s2248_s2 }
0x1655   :  { %4092 = vrsqrt.f32 %v2249_v21  ;;  %vm2256_vm11 = vweird.f32 %v2249_v21 }
0x165b   :  { %v4093_v2 = vpop.eup %4092  ;;  %v2289_v24 = vpop.xlane.xlu1 %2288 }
0x165c   :  { %v2251_v49 = vmul.f32 %v4093_v2, %v2249_v21  ;;  %v2290_v43 = vrot.slane %v2289_v24, 4  ;;  %vm2257_vm10 = vweird.f32 %v4093_v2  ;;  %v5740_v21 = vld [vmem:[%s6026_s22 + $0x18] sm:$0xff] }
0x165d   :  { %vm2258_vm12 = vmor %vm2256_vm11, %vm2257_vm10 }
0x165e   :  { %v2252_v5 = vmul.f32 %v4093_v2, %v2251_v49  ;;  %v2291_v13 = vadd.f32 %v2290_v43, %v2289_v24 }
0x1660   :  { %v2253_v15 = vmul.f32 0.5, %v2252_v5  ;;  %v2292_v25 = vrot.slane %v2291_v13, 2 }
0x1662   :  { %v2254_v28 = vsub.f32 1.5, %v2253_v15  ;;  %v2293_v30 = vadd.f32 %v2292_v25, %v2291_v13 }
0x1664   :  { %v2255_v27 = vmul.f32 %v4093_v2, %v2254_v28  ;;  %v2294_v36 = vrot.slane %v2293_v30, 1 }
0x1666   :  { %v2259_v37 = vsel %vm2258_vm12, %v4093_v2, %v2255_v27  ;;  %v2295_v39 = vadd.f32 %v2294_v36, %v2293_v30  ;;  %v5752_v2 = vld [vmem:[%s6026_s22 + $0x8] sm:$0xff] }
0x1667   :  { %3910 = vpush %v2259_v37 }
0x1668   :  { %3912 = vpush %v2295_v39 }
0x1698   :  { %s3911_s7 = spop %3910 }
0x1699   :  { %v2261_v9 = vstv %s3911_s7  ;;  %s3913_s9 = spop %3912 }
0x169a   :  { %v2262_v41 = vmul.f32 %v2261_v9, %v5614_v29  ;;  %s2297_s8 = smax.f32 %s4407_s29, %s3913_s9 }
0x169b   :  { %v2298_v42 = vstv %s2297_s8 }
0x169c   :  { %4094 = vrsqrt.f32 %v2298_v42  ;;  %3648 = vmatmul.msk.f32.vlgmr.msrb.gmra.mxu2 %vm193_vm1, %v2262_v41  ;;  %vm2305_vm14 = vweird.f32 %v2298_v42 }
0x169d   :  { %3710 = vmatpush.xpose.msk.msrb.mxu2 %vm92_vm0, %v5694_v44 }
0x16a1   :  { %3711 = vmatpush.xpose.msk.msrb.mxu2 %vm92_vm0, %v5701_v6 }
0x16a2   :  { %v4095_v35 = vpop.eup %4094 }
0x16a3   :  { %v2300_v57 = vmul.f32 %v4095_v35, %v2298_v42  ;;  %vm2306_vm13 = vweird.f32 %v4095_v35 }
0x16a4   :  { %vm2307_vm15 = vmor %vm2305_vm14, %vm2306_vm13 }
0x16a5   :  { %v2301_v19 = vmul.f32 %v4095_v35, %v2300_v57  ;;  %3712 = vmatpush.xpose.msk.msrb.mxu2 %vm92_vm0, %v5708_v55 }
0x16a7   :  { %v2302_v46 = vmul.f32 0.5, %v2301_v19 }
0x16a9   :  { %v2303_v47 = vsub.f32 1.5, %v2302_v46  ;;  %3713 = vmatpush.xpose.msk.msrb.mxu2 %vm92_vm0, %v5715_v31 }
0x16ab   :  { %v2304_v52 = vmul.f32 %v4095_v35, %v2303_v47 }
0x16ad   :  { %v2308_v14 = vsel %vm2307_vm15, %v4095_v35, %v2304_v52 }
0x16ae   :  { %v2338_v11 = vpop.xlane.xlu2 %2337  ;;  %3914 = vpush %v2308_v14 }
0x16af   :  { %v2339_v38 = vrot.slane %v2338_v11, 4 }
0x16b1   :  { %v2340_v48 = vadd.f32 %v2339_v38, %v2338_v11 }
0x16b3   :  { %v2341_v40 = vrot.slane %v2340_v48, 2 }
0x16b5   :  { %v2342_v23 = vadd.f32 %v2341_v40, %v2340_v48 }
0x16b7   :  { %v2343_v29 = vrot.slane %v2342_v23, 1 }
0x16b9   :  { %v2344_v63 = vadd.f32 %v2343_v29, %v2342_v23 }
0x16bb   :  { %3916 = vpush %v2344_v63 }
0x16df   :  { %s3915_s11 = spop %3914 }
0x16e0   :  { %v2310_v1 = vstv %s3915_s11 }
0x16e1   :  { %v2311_v0 = vmul.f32 %v2310_v1, %v5677_v3 }
0x16e3   :  { %3657 = vmatmul.msk.f32.vlgmr.msra.gmra.mxu3 %vm92_vm0, %v2311_v0 }
0x16e4   :  { %2862 = vmatpush.msra.mxu3 %v5624_v22 }
0x16e6   :  { %2863 = vmatpush.msra.mxu3 %v5631_v50 }
0x16e8   :  { %2864 = vmatpush.msra.mxu3 %v5638_v51 }
0x16ea   :  { %2865 = vmatpush.msra.mxu3 %v5645_v53 }
0x16ec   :  { %s3917_s5 = spop %3916  ;;  %2866 = vmatpush.msra.mxu3 %v5652_v32 }
0x16ed   :  { %s2346_s0 = smax.f32 %s4407_s29, %s3917_s5 }
0x16ee   :  { %v2347_v17 = vstv %s2346_s0  ;;  %2867 = vmatpush.msra.mxu3 %v5659_v54 }
0x16ef   :  { %4096 = vrsqrt.f32 %v2347_v17  ;;  %vm2354_vm5 = vweird.f32 %v2347_v17 }
0x16f0   :  { %2868 = vmatpush.msra.mxu3 %v5666_v34 }
0x16f2   :  { %2869 = vmatpush.msra.mxu3 %v5673_v26 }
0x16f5   :  { %v4097_v3 = vpop.eup %4096 }
0x16f6   :  { %v2349_v4 = vmul.f32 %v4097_v3, %v2347_v17  ;;  %vm2355_vm4 = vweird.f32 %v4097_v3 }
0x16f7   :  { %vm2356_vm6 = vmor %vm2354_vm5, %vm2355_vm4 }
0x16f8   :  { %v2350_v56 = vmul.f32 %v4097_v3, %v2349_v4 }
0x16fa   :  { %v2351_v33 = vmul.f32 0.5, %v2350_v56 }
0x16fc   :  { %v2352_v7 = vsub.f32 1.5, %v2351_v33 }
0x16fe   :  { %v2353_v8 = vmul.f32 %v4097_v3, %v2352_v7 }
0x1700   :  { %v2357_v58 = vsel %vm2356_vm6, %v4097_v3, %v2353_v8  ;;  %v5783_v8 = vld [vmem:[%s6026_s22 + $0x20] sm:$0xff] }
0x1701   :  { %3918 = vpush %v2357_v58 }
0x171f   :  { %v2381_v45 = vpop.f32.mrf.mxu2 }
0x1720   :  { %v2384_v10 = vmul.f32 %v2381_v45, %v2381_v45 }
0x1722   :  { %v2385_v12 = vsel %vm167_vm3, %v2384_v10, 0.0 }
0x1723   :  { %2386 = vadd.xlane.f32.xlu0 %v2385_v12 }
0x1732   :  { %s3919_s30 = spop %3918 }
0x1733   :  { %v2359_v60 = vstv %s3919_s30 }
0x1734   :  { %v2360_v20 = vmul.f32 %v2359_v60, %v5682_v59  ;;  %v5746_v59 = vld [vmem:[%s6026_s22 + $0x10] sm:$0xff] }
0x1736   :  { %3662 = vmatmul.msk.f32.vlgmr.msrb.gmra.mxu0 %vm92_vm0, %v2360_v20 }
0x1737   :  { %2813 = vmatpush.msrb.mxu0 %v5455_v61 }
0x1739   :  { %2814 = vmatpush.msrb.mxu0 %v5461_v62 }
0x173b   :  { %2815 = vmatpush.msrb.mxu0 %v5467_v16 }
0x173d   :  { %2816 = vmatpush.msrb.mxu0 %v5473_v18  ;;  %v5758_v18 = vld [vmem:[%s6026_s22] sm:$0xff] }
0x173f   :  { %2817 = vmatpush.msrb.mxu0 %v5740_v21 }
0x1741   :  { %2818 = vmatpush.msrb.mxu0 %v5746_v59 }
0x1743   :  { %2819 = vmatpush.msrb.mxu0 %v5752_v2 }
0x1745   :  { %2820 = vmatpush.msrb.mxu0 %v5758_v18 }
0x1766   :  { %v5761_v24 = vpop.f32.mrf.mxu3 }
0x1767   :  { %v2433_v49 = vmul.f32 %v5761_v24, %v5761_v24 }
0x1769   :  { %v2434_v43 = vsel %vm167_vm3, %v2433_v49, 0.0 }
0x176a   :  { %2435 = vadd.xlane.f32.xlu1 %v2434_v43 }
0x1796   :  { %v2387_v5 = vpop.xlane.xlu0 %2386 }
0x1797   :  { %v2388_v13 = vrot.slane %v2387_v5, 4 }
0x1799   :  { %v2389_v15 = vadd.f32 %v2388_v13, %v2387_v5 }
0x179b   :  { %v2390_v25 = vrot.slane %v2389_v15, 2 }
0x179d   :  { %v2391_v28 = vadd.f32 %v2390_v25, %v2389_v15 }
0x179f   :  { %v2392_v30 = vrot.slane %v2391_v28, 1 }
0x17a1   :  { %v2393_v27 = vadd.f32 %v2392_v30, %v2391_v28 }
0x17a3   :  { %3920 = vpush %v2393_v27 }
0x17b3   :  { %v5766_v36 = vpop.f32.mrf.mxu0 }
0x17b4   :  { %v2482_v37 = vmul.f32 %v5766_v36, %v5766_v36 }
0x17b6   :  { %v2483_v39 = vsel %vm117_vm2, %v2482_v37, 0.0 }
0x17b7   :  { %2484 = vadd.xlane.f32.xlu2 %v2483_v39 }
0x17d4   :  { %s3921_s23 = spop %3920 }
0x17d5   :  { %s2395_s24 = smax.f32 %s4407_s29, %s3921_s23 }
0x17d6   :  { %v2396_v9 = vstv %s2395_s24 }
0x17d7   :  { %4098 = vrsqrt.f32 %v2396_v9  ;;  %vm2403_vm8 = vweird.f32 %v2396_v9 }
0x17dd   :  { %v4099_v41 = vpop.eup %4098  ;;  %v2436_v42 = vpop.xlane.xlu1 %2435 }
0x17de   :  { %v2398_v35 = vmul.f32 %v4099_v41, %v2396_v9  ;;  %v2437_v57 = vrot.slane %v2436_v42, 4  ;;  %vm2404_vm7 = vweird.f32 %v4099_v41 }
0x17df   :  { %vm2405_vm9 = vmor %vm2403_vm8, %vm2404_vm7 }
0x17e0   :  { %v2399_v19 = vmul.f32 %v4099_v41, %v2398_v35  ;;  %v2438_v46 = vadd.f32 %v2437_v57, %v2436_v42 }
0x17e2   :  { %v2400_v47 = vmul.f32 0.5, %v2399_v19  ;;  %v2439_v52 = vrot.slane %v2438_v46, 2 }
0x17e4   :  { %v2401_v14 = vsub.f32 1.5, %v2400_v47  ;;  %v2440_v11 = vadd.f32 %v2439_v52, %v2438_v46 }
0x17e6   :  { %v2402_v38 = vmul.f32 %v4099_v41, %v2401_v14  ;;  %v2441_v48 = vrot.slane %v2440_v11, 1 }
0x17e8   :  { %v2406_v40 = vsel %vm2405_vm9, %v4099_v41, %v2402_v38  ;;  %v2442_v23 = vadd.f32 %v2441_v48, %v2440_v11 }
0x17e9   :  { %3922 = vpush %v2406_v40 }
0x17ea   :  { %3924 = vpush %v2442_v23 }
0x181a   :  { %s3923_s3 = spop %3922 }
0x181b   :  { %v2408_v29 = vstv %s3923_s3  ;;  %s3925_s10 = spop %3924 }
0x181c   :  { %v2409_v63 = vmul.f32 %v2408_v29, %v2381_v45  ;;  %s2444_s26 = smax.f32 %s4407_s29, %s3925_s10 }
0x181d   :  { %v2445_v1 = vstv %s2444_s26 }
0x181e   :  { %4100 = vrsqrt.f32 %v2445_v1  ;;  %3663 = vmatmul.msk.f32.vlgmr.msrb.gmra.mxu1 %vm92_vm0, %v2409_v63  ;;  %vm2452_vm11 = vweird.f32 %v2445_v1 }
0x181f   :  { %3666 = vmatpush.xpose.msk.msrb.mxu1 %vm193_vm1, %v5455_v61 }
0x1823   :  { %3667 = vmatpush.xpose.msk.msrb.mxu1 %vm193_vm1, %v5461_v62 }
0x1824   :  { %v4101_v0 = vpop.eup %4100 }
0x1825   :  { %v2447_v17 = vmul.f32 %v4101_v0, %v2445_v1  ;;  %vm2453_vm10 = vweird.f32 %v4101_v0 }
0x1826   :  { %vm2454_vm12 = vmor %vm2452_vm11, %vm2453_vm10 }
0x1827   :  { %v2448_v3 = vmul.f32 %v4101_v0, %v2447_v17  ;;  %3668 = vmatpush.xpose.msk.msrb.mxu1 %vm193_vm1, %v5467_v16 }
0x1829   :  { %v2449_v4 = vmul.f32 0.5, %v2448_v3 }
0x182a   :  { %v2485_v56 = vpop.xlane.xlu2 %2484 }
0x182b   :  { %v2450_v33 = vsub.f32 1.5, %v2449_v4  ;;  %v2486_v7 = vrot.slane %v2485_v56, 4  ;;  %3669 = vmatpush.xpose.msk.msrb.mxu1 %vm193_vm1, %v5783_v8 }
0x182d   :  { %v2487_v61 = vadd.f32 %v2486_v7, %v2485_v56  ;;  %v2451_v62 = vmul.f32 %v4101_v0, %v2450_v33 }
0x182f   :  { %v2488_v58 = vrot.slane %v2487_v61, 2  ;;  %v2455_v45 = vsel %vm2454_vm12, %v4101_v0, %v2451_v62  ;;  %3670 = vmatpush.xpose.msk.msrb.mxu1 %vm193_vm1, %v5740_v21 }
0x1830   :  { %3926 = vpush %v2455_v45 }
0x1831   :  { %v2489_v16 = vadd.f32 %v2488_v58, %v2487_v61 }
0x1833   :  { %v2490_v10 = vrot.slane %v2489_v16, 1  ;;  %3671 = vmatpush.xpose.msk.msrb.mxu1 %vm193_vm1, %v5746_v59 }
0x1835   :  { %v2491_v12 = vadd.f32 %v2490_v10, %v2489_v16 }
0x1837   :  { %3928 = vpush %v2491_v12  ;;  %3672 = vmatpush.xpose.msk.msrb.mxu1 %vm193_vm1, %v5752_v2 }
0x183b   :  { %3673 = vmatpush.xpose.msk.msrb.mxu1 %vm193_vm1, %v5758_v18 }
0x1861   :  { %s3927_s28 = spop %3926 }
0x1862   :  { %v2457_v60 = vstv %s3927_s28 }
0x1863   :  { %v2458_v20 = vmul.f32 %v2457_v60, %v5761_v24 }
0x1865   :  { %3664 = vmatmul.msk.f32.vlgmr.msra.gmra.mxu0 %vm92_vm0, %v2458_v20 }
0x1866   :  { %2915 = vmatpush.msra.mxu0 %v5694_v44 }
0x1868   :  { %s3929_s11 = spop %3928  ;;  %2916 = vmatpush.msra.mxu0 %v5701_v6 }
0x1869   :  { %s2493_s5 = smax.f32 %s4407_s29, %s3929_s11 }
0x186a   :  { %v2494_v49 = vstv %s2493_s5  ;;  %2917 = vmatpush.msra.mxu0 %v5708_v55 }
0x186b   :  { %4102 = vrsqrt.f32 %v2494_v49  ;;  %vm2501_vm14 = vweird.f32 %v2494_v49 }
0x186c   :  { %2918 = vmatpush.msra.mxu0 %v5715_v31 }
0x1871   :  { %v4103_v43 = vpop.eup %4102 }
0x1872   :  { %v2496_v5 = vmul.f32 %v4103_v43, %v2494_v49  ;;  %vm2502_vm13 = vweird.f32 %v4103_v43 }
0x1873   :  { %vm2503_vm15 = vmor %vm2501_vm14, %vm2502_vm13 }
0x1874   :  { %v2497_v13 = vmul.f32 %v4103_v43, %v2496_v5 }
0x1876   :  { %v2498_v15 = vmul.f32 0.5, %v2497_v13 }
0x1878   :  { %v2499_v24 = vsub.f32 1.5, %v2498_v15 }
0x187a   :  { %v2500_v25 = vmul.f32 %v4103_v43, %v2499_v24 }
0x187c   :  { %v2504_v28 = vsel %vm2503_vm15, %v4103_v43, %v2500_v25 }
0x187d   :  { %3930 = vpush %v2504_v28 }
0x189b   :  { %v2528_v30 = vpop.f32.mrf.mxu1 }
0x189c   :  { %v2531_v27 = vmul.f32 %v2528_v30, %v2528_v30 }
0x189e   :  { %v2532_v37 = vsel %vm117_vm2, %v2531_v27, 0.0 }
0x189f   :  { %2533 = vadd.xlane.f32.xlu0 %v2532_v37 }
0x18ae   :  { %s3931_s0 = spop %3930 }
0x18af   :  { %v2506_v39 = vstv %s3931_s0 }
0x18b0   :  { %v2507_v9 = vmul.f32 %v2506_v39, %v5766_v36 }
0x18b2   :  { %3665 = vmatmul.msk.f32.vlgmr.msra.gmra.mxu1 %vm193_vm1, %v2507_v9 }
0x18b3   :  { %3701 = vmatpush.xpose.msk.msra.mxu1 %vm92_vm0, %v5624_v22 }
0x18b7   :  { %3702 = vmatpush.xpose.msk.msra.mxu1 %vm92_vm0, %v5631_v50 }
0x18bb   :  { %3703 = vmatpush.xpose.msk.msra.mxu1 %vm92_vm0, %v5638_v51 }
0x18bf   :  { %3704 = vmatpush.xpose.msk.msra.mxu1 %vm92_vm0, %v5645_v53 }
0x18c3   :  { %3705 = vmatpush.xpose.msk.msra.mxu1 %vm92_vm0, %v5652_v32 }
0x18c7   :  { %3706 = vmatpush.xpose.msk.msra.mxu1 %vm92_vm0, %v5659_v54 }
0x18cb   :  { %3707 = vmatpush.xpose.msk.msra.mxu1 %vm92_vm0, %v5666_v34 }
0x18cf   :  { %3708 = vmatpush.xpose.msk.msra.mxu1 %vm92_vm0, %v5673_v26 }
0x18e2   :  { %v5821_v36 = vpop.f32.mrf.mxu0 }
0x18e3   :  { %v2580_v41 = vmul.f32 %v5821_v36, %v5821_v36 }
0x18e5   :  { %v2581_v42 = vsel %vm167_vm3, %v2580_v41, 0.0 }
0x18e6   :  { %2582 = vadd.xlane.f32.xlu1 %v2581_v42 }
0x1912   :  { %v2534_v35 = vpop.xlane.xlu0 %2533 }
0x1913   :  { %v2535_v57 = vrot.slane %v2534_v35, 4 }
0x1915   :  { %v2536_v19 = vadd.f32 %v2535_v57, %v2534_v35 }
0x1917   :  { %v2537_v46 = vrot.slane %v2536_v19, 2 }
0x1919   :  { %v2538_v47 = vadd.f32 %v2537_v46, %v2536_v19 }
0x191b   :  { %v2539_v52 = vrot.slane %v2538_v47, 1 }
0x191d   :  { %v2540_v14 = vadd.f32 %v2539_v52, %v2538_v47 }
0x191f   :  { %3932 = vpush %v2540_v14 }
0x192f   :  { %v5826_v11 = vpop.f32.mrf.mxu1 }
0x1930   :  { %v2629_v38 = vmul.f32 %v5826_v11, %v5826_v11 }
0x1932   :  { %v2630_v48 = vsel %vm167_vm3, %v2629_v38, 0.0 }
0x1933   :  { %2631 = vadd.xlane.f32.xlu2 %v2630_v48 }
0x1950   :  { %s3933_s30 = spop %3932 }
0x1951   :  { %s2542_s20 = smax.f32 %s4407_s29, %s3933_s30 }
0x1952   :  { %v2543_v40 = vstv %s2542_s20 }
0x1953   :  { %4104 = vrsqrt.f32 %v2543_v40  ;;  %vm2550_vm5 = vweird.f32 %v2543_v40 }
0x1959   :  { %v4105_v23 = vpop.eup %4104  ;;  %v2583_v29 = vpop.xlane.xlu1 %2582 }
0x195a   :  { %v2545_v63 = vmul.f32 %v4105_v23, %v2543_v40  ;;  %v2584_v1 = vrot.slane %v2583_v29, 4  ;;  %vm2551_vm4 = vweird.f32 %v4105_v23 }
0x195b   :  { %vm2552_vm6 = vmor %vm2550_vm5, %vm2551_vm4 }
0x195c   :  { %v2546_v0 = vmul.f32 %v4105_v23, %v2545_v63  ;;  %v2585_v17 = vadd.f32 %v2584_v1, %v2583_v29 }
0x195e   :  { %v2547_v3 = vmul.f32 0.5, %v2546_v0  ;;  %v2586_v4 = vrot.slane %v2585_v17, 2 }
0x1960   :  { %v2548_v56 = vsub.f32 1.5, %v2547_v3  ;;  %v2587_v33 = vadd.f32 %v2586_v4, %v2585_v17 }
0x1962   :  { %v2549_v7 = vmul.f32 %v4105_v23, %v2548_v56  ;;  %v2588_v61 = vrot.slane %v2587_v33, 1 }
0x1964   :  { %v2553_v62 = vsel %vm2552_vm6, %v4105_v23, %v2549_v7  ;;  %v2589_v58 = vadd.f32 %v2588_v61, %v2587_v33 }
0x1965   :  { %3934 = vpush %v2553_v62 }
0x1966   :  { %3936 = vpush %v2589_v58 }
0x1996   :  { %s3935_s21 = spop %3934 }
0x1997   :  { %v2555_v45 = vstv %s3935_s21  ;;  %s3937_s1 = spop %3936 }
0x1998   :  { %v2556_v16 = vmul.f32 %v2555_v45, %v2528_v30  ;;  %s2591_s25 = smax.f32 %s4407_s29, %s3937_s1 }
0x1999   :  { %v2592_v10 = vstv %s2591_s25 }
0x199a   :  { %4106 = vrsqrt.f32 %v2592_v10  ;;  %3674 = vmatmul.msk.f32.vlgmr.msrb.gmra.mxu1 %vm193_vm1, %v2556_v16  ;;  %vm2599_vm8 = vweird.f32 %v2592_v10 }
0x19a0   :  { %v4107_v12 = vpop.eup %4106 }
0x19a1   :  { %v2594_v60 = vmul.f32 %v4107_v12, %v2592_v10  ;;  %vm2600_vm7 = vweird.f32 %v4107_v12 }
0x19a2   :  { %vm2601_vm9 = vmor %vm2599_vm8, %vm2600_vm7 }
0x19a3   :  { %v2595_v20 = vmul.f32 %v4107_v12, %v2594_v60 }
0x19a5   :  { %v2596_v49 = vmul.f32 0.5, %v2595_v20 }
0x19a6   :  { %v2632_v43 = vpop.xlane.xlu2 %2631 }
0x19a7   :  { %v2597_v5 = vsub.f32 1.5, %v2596_v49  ;;  %v2633_v13 = vrot.slane %v2632_v43, 4 }
0x19a9   :  { %v2634_v15 = vadd.f32 %v2633_v13, %v2632_v43  ;;  %v2598_v24 = vmul.f32 %v4107_v12, %v2597_v5 }
0x19ab   :  { %v2635_v25 = vrot.slane %v2634_v15, 2  ;;  %v2602_v28 = vsel %vm2601_vm9, %v4107_v12, %v2598_v24 }
0x19ac   :  { %3938 = vpush %v2602_v28 }
0x19ad   :  { %v2636_v30 = vadd.f32 %v2635_v25, %v2634_v15 }
0x19af   :  { %v2637_v27 = vrot.slane %v2636_v30, 1 }
0x19b1   :  { %v2638_v37 = vadd.f32 %v2637_v27, %v2636_v30 }
0x19b3   :  { %3940 = vpush %v2638_v37 }
0x19dd   :  { %s3939_s2 = spop %3938 }
0x19de   :  { %v2604_v39 = vstv %s3939_s2 }
0x19df   :  { %v2605_v9 = vmul.f32 %v2604_v39, %v5821_v36 }
0x19e1   :  { %3683 = vmatmul.msk.f32.vlgmr.msra.gmra.mxu2 %vm92_vm0, %v2605_v9 }
0x19e2   :  { %3725 = vmatpush.xpose.msk.msra.mxu2 %vm92_vm0, %v5624_v22 }
0x19e4   :  { %s3941_s7 = spop %3940 }
0x19e5   :  { %s2640_s9 = smax.f32 %s4407_s29, %s3941_s7 }
0x19e6   :  { %v2641_v41 = vstv %s2640_s9  ;;  %3726 = vmatpush.xpose.msk.msra.mxu2 %vm92_vm0, %v5631_v50 }
0x19e7   :  { %4108 = vrsqrt.f32 %v2641_v41  ;;  %vm2648_vm11 = vweird.f32 %v2641_v41 }
0x19ea   :  { %3727 = vmatpush.xpose.msk.msra.mxu2 %vm92_vm0, %v5638_v51 }
0x19ed   :  { %v4109_v42 = vpop.eup %4108 }
0x19ee   :  { %v2643_v35 = vmul.f32 %v4109_v42, %v2641_v41  ;;  %3728 = vmatpush.xpose.msk.msra.mxu2 %vm92_vm0, %v5645_v53  ;;  %vm2649_vm10 = vweird.f32 %v4109_v42 }
0x19ef   :  { %vm2650_vm12 = vmor %vm2648_vm11, %vm2649_vm10 }
0x19f0   :  { %v2644_v36 = vmul.f32 %v4109_v42, %v2643_v35 }
0x19f2   :  { %v2645_v57 = vmul.f32 0.5, %v2644_v36  ;;  %3729 = vmatpush.xpose.msk.msra.mxu2 %vm92_vm0, %v5652_v32 }
0x19f4   :  { %v2646_v22 = vsub.f32 1.5, %v2645_v57 }
0x19f6   :  { %v2647_v19 = vmul.f32 %v4109_v42, %v2646_v22  ;;  %3730 = vmatpush.xpose.msk.msra.mxu2 %vm92_vm0, %v5659_v54  ;;  %v4201_v54 = vld [vmem:[%s6026_s22 + $0x38] sm:$0xff] }
0x19f8   :  { %v2651_v50 = vsel %vm2650_vm12, %v4109_v42, %v2647_v19 }
0x19f9   :  { %3942 = vpush %v2651_v50 }
0x19fa   :  { %3731 = vmatpush.xpose.msk.msra.mxu2 %vm92_vm0, %v5666_v34  ;;  %v4202_v34 = vld [vmem:[%s6026_s22 + $0x30] sm:$0xff] }
0x19fe   :  { %3732 = vmatpush.xpose.msk.msra.mxu2 %vm92_vm0, %v5673_v26  ;;  %v4203_v26 = vld [vmem:[%s6026_s22 + $0x28] sm:$0xff] }
0x1a17   :  { %v2675_v51 = vpop.f32.mrf.mxu1 }
0x1a18   :  { %v2678_v53 = vmul.f32 %v2675_v51, %v2675_v51 }
0x1a1a   :  { %v2679_v32 = vsel %vm167_vm3, %v2678_v53, 0.0 }
0x1a1b   :  { %2680 = vadd.xlane.f32.xlu0 %v2679_v32 }
0x1a2a   :  { %s3943_s8 = spop %3942 }
0x1a2b   :  { %v2653_v46 = vstv %s3943_s8 }
0x1a2c   :  { %v2654_v47 = vmul.f32 %v2653_v46, %v5826_v11 }
0x1a2e   :  { %3688 = vmatmul.msk.f32.vlgmr.msrb.gmra.mxu3 %vm92_vm0, %v2654_v47 }
0x1a2f   :  { %3715 = vmatpush.xpose.msk.msrb.mxu3 %vm193_vm1, %v4201_v54 }
0x1a33   :  { %3716 = vmatpush.xpose.msk.msrb.mxu3 %vm193_vm1, %v4202_v34 }
0x1a37   :  { %3717 = vmatpush.xpose.msk.msrb.mxu3 %vm193_vm1, %v4203_v26 }
0x1a3b   :  { %3718 = vmatpush.xpose.msk.msrb.mxu3 %vm193_vm1, %v5783_v8 }
0x1a3f   :  { %3719 = vmatpush.xpose.msk.msrb.mxu3 %vm193_vm1, %v5740_v21 }
0x1a43   :  { %3720 = vmatpush.xpose.msk.msrb.mxu3 %vm193_vm1, %v5746_v59 }
0x1a47   :  { %3721 = vmatpush.xpose.msk.msrb.mxu3 %vm193_vm1, %v5752_v2 }
0x1a4b   :  { %3722 = vmatpush.xpose.msk.msrb.mxu3 %vm193_vm1, %v5758_v18 }
0x1a64   :  { %v5878_v52 = vpop.f32.mrf.mxu2 }
0x1a65   :  { %v2727_v14 = vmul.f32 %v5878_v52, %v5878_v52 }
0x1a67   :  { %v2728_v11 = vsel %vm167_vm3, %v2727_v14, 0.0 }
0x1a68   :  { %2729 = vadd.xlane.f32.xlu1 %v2728_v11 }
0x1a8e   :  { %v2681_v38 = vpop.xlane.xlu0 %2680 }
0x1a8f   :  { %v2682_v48 = vrot.slane %v2681_v38, 4 }
0x1a91   :  { %v2683_v40 = vadd.f32 %v2682_v48, %v2681_v38 }
0x1a93   :  { %v2684_v23 = vrot.slane %v2683_v40, 2 }
0x1a95   :  { %v2685_v29 = vadd.f32 %v2684_v23, %v2683_v40 }
0x1a97   :  { %v2686_v63 = vrot.slane %v2685_v29, 1 }
0x1a99   :  { %v2687_v1 = vadd.f32 %v2686_v63, %v2685_v29 }
0x1a9b   :  { %3944 = vpush %v2687_v1 }
0x1ab1   :  { %v5883_v0 = vpop.f32.mrf.mxu3 }
0x1ab2   :  { %v2776_v17 = vmul.f32 %v5883_v0, %v5883_v0 }
0x1ab4   :  { %v2777_v3 = vsel %vm117_vm2, %v2776_v17, 0.0 }
0x1ab5   :  { %2778 = vadd.xlane.f32.xlu2 %v2777_v3 }
0x1acc   :  { %s3945_s22 = spop %3944 }
0x1acd   :  { %s2689_s27 = smax.f32 %s4407_s29, %s3945_s22 }
0x1ace   :  { %v2690_v4 = vstv %s2689_s27 }
0x1acf   :  { %4110 = vrsqrt.f32 %v2690_v4  ;;  %vm2697_vm14 = vweird.f32 %v2690_v4 }
0x1ad5   :  { %v4111_v56 = vpop.eup %4110 }
0x1ad6   :  { %v2692_v33 = vmul.f32 %v4111_v56, %v2690_v4  ;;  %vm2698_vm13 = vweird.f32 %v4111_v56 }
0x1ad7   :  { %vm2699_vm15 = vmor %vm2697_vm14, %vm2698_vm13 }
0x1ad8   :  { %v2693_v7 = vmul.f32 %v4111_v56, %v2692_v33 }
0x1ada   :  { %v2694_v61 = vmul.f32 0.5, %v2693_v7 }
0x1adb   :  { %v2730_v62 = vpop.xlane.xlu1 %2729 }
0x1adc   :  { %v2695_v58 = vsub.f32 1.5, %v2694_v61  ;;  %v2731_v45 = vrot.slane %v2730_v62, 4 }
0x1ade   :  { %v2732_v16 = vadd.f32 %v2731_v45, %v2730_v62  ;;  %v2696_v10 = vmul.f32 %v4111_v56, %v2695_v58 }
0x1ae0   :  { %v2733_v12 = vrot.slane %v2732_v16, 2  ;;  %v2700_v60 = vsel %vm2699_vm15, %v4111_v56, %v2696_v10 }
0x1ae1   :  { %3946 = vpush %v2700_v60 }
0x1ae2   :  { %v2734_v20 = vadd.f32 %v2733_v12, %v2732_v16 }
0x1ae4   :  { %v2735_v49 = vrot.slane %v2734_v20, 1 }
0x1ae6   :  { %v2736_v43 = vadd.f32 %v2735_v49, %v2734_v20 }
0x1ae8   :  { %3948 = vpush %v2736_v43 }
0x1b12   :  { %s3947_s28 = spop %3946 }
0x1b13   :  { %v2702_v5 = vstv %s3947_s28 }
0x1b14   :  { %v2703_v13 = vmul.f32 %v2702_v5, %v2675_v51 }
0x1b16   :  { %3689 = vmatmul.msk.f32.vlgmr.msrb.gmra.mxu0 %vm92_vm0, %v2703_v13 }
0x1b17   :  { %3692 = vmatpush.xpose.msk.msrb.mxu0 %vm193_vm1, %v4201_v54 }
0x1b19   :  { %s3949_s11 = spop %3948 }
0x1b1a   :  { %s2738_s5 = smax.f32 %s4407_s29, %s3949_s11 }
0x1b1b   :  { %v2739_v15 = vstv %s2738_s5  ;;  %3693 = vmatpush.xpose.msk.msrb.mxu0 %vm193_vm1, %v4202_v34 }
0x1b1c   :  { %4112 = vrsqrt.f32 %v2739_v15  ;;  %vm2746_vm5 = vweird.f32 %v2739_v15 }
0x1b1f   :  { %3694 = vmatpush.xpose.msk.msrb.mxu0 %vm193_vm1, %v4203_v26 }
0x1b22   :  { %v4113_v24 = vpop.eup %4112 }
0x1b23   :  { %v2741_v25 = vmul.f32 %v4113_v24, %v2739_v15  ;;  %3695 = vmatpush.xpose.msk.msrb.mxu0 %vm193_vm1, %v5783_v8  ;;  %vm2747_vm4 = vweird.f32 %v4113_v24 }
0x1b24   :  { %vm2748_vm6 = vmor %vm2746_vm5, %vm2747_vm4 }
0x1b25   :  { %v2742_v28 = vmul.f32 %v4113_v24, %v2741_v25 }
0x1b27   :  { %v2743_v30 = vmul.f32 0.5, %v2742_v28  ;;  %3696 = vmatpush.xpose.msk.msrb.mxu0 %vm193_vm1, %v5740_v21 }
0x1b28   :  { %v2779_v27 = vpop.xlane.xlu2 %2778 }
0x1b29   :  { %v2744_v37 = vsub.f32 1.5, %v2743_v30  ;;  %v2780_v39 = vrot.slane %v2779_v27, 4 }
0x1b2b   :  { %v2781_v9 = vadd.f32 %v2780_v39, %v2779_v27  ;;  %v2745_v41 = vmul.f32 %v4113_v24, %v2744_v37  ;;  %3697 = vmatpush.xpose.msk.msrb.mxu0 %vm193_vm1, %v5746_v59 }
0x1b2d   :  { %v2782_v42 = vrot.slane %v2781_v9, 2  ;;  %v2749_v35 = vsel %vm2748_vm6, %v4113_v24, %v2745_v41 }
0x1b2e   :  { %3950 = vpush %v2749_v35 }
0x1b2f   :  { %v2783_v8 = vadd.f32 %v2782_v42, %v2781_v9  ;;  %3698 = vmatpush.xpose.msk.msrb.mxu0 %vm193_vm1, %v5752_v2 }
0x1b31   :  { %v2784_v36 = vrot.slane %v2783_v8, 1 }
0x1b33   :  { %v2785_v21 = vadd.f32 %v2784_v36, %v2783_v8  ;;  %3699 = vmatpush.xpose.msk.msrb.mxu0 %vm193_vm1, %v5758_v18 }
0x1b35   :  { %3952 = vpush %v2785_v21 }
0x1b5f   :  { %s3951_s0 = spop %3950 }
0x1b60   :  { %v2751_v57 = vstv %s3951_s0 }
0x1b61   :  { %v2752_v22 = vmul.f32 %v2751_v57, %v5878_v52 }
0x1b63   :  { %3690 = vmatmul.msk.f32.vlgmr.msra.gmra.mxu3 %vm92_vm0, %v2752_v22 }
0x1b66   :  { %s3953_s30 = spop %3952 }
0x1b67   :  { %s2787_s20 = smax.f32 %s4407_s29, %s3953_s30 }
0x1b68   :  { %v2788_v59 = vstv %s2787_s20 }
0x1b69   :  { %4114 = vrsqrt.f32 %v2788_v59  ;;  %vm2795_vm8 = vweird.f32 %v2788_v59 }
0x1b6f   :  { %v4115_v19 = vpop.eup %4114 }
0x1b70   :  { %v2790_v50 = vmul.f32 %v4115_v19, %v2788_v59  ;;  %vm2796_vm7 = vweird.f32 %v4115_v19 }
0x1b71   :  { %vm2797_vm9 = vmor %vm2795_vm8, %vm2796_vm7 }
0x1b72   :  { %v2791_v2 = vmul.f32 %v4115_v19, %v2790_v50 }
0x1b74   :  { %v2792_v51 = vmul.f32 0.5, %v2791_v2 }
0x1b76   :  { %v2793_v53 = vsub.f32 1.5, %v2792_v51 }
0x1b78   :  { %v2794_v18 = vmul.f32 %v4115_v19, %v2793_v53 }
0x1b7a   :  { %v2798_v32 = vsel %vm2797_vm9, %v4115_v19, %v2794_v18 }
0x1b7b   :  { %3954 = vpush %v2798_v32 }
0x1b93   :  { %v2822_v46 = vpop.f32.mrf.mxu0 }
0x1b94   :  { %v2825_v47 = vmul.f32 %v2822_v46, %v2822_v46 }
0x1b96   :  { %v2826_v54 = vsel %vm117_vm2, %v2825_v47, 0.0 }
0x1b97   :  { %2827 = vadd.xlane.f32.xlu0 %v2826_v54 }
0x1bac   :  { %s3955_s21 = spop %3954 }
0x1bad   :  { %v2800_v34 = vstv %s3955_s21 }
0x1bae   :  { %v2801_v26 = vmul.f32 %v2800_v34, %v5883_v0 }
0x1bb0   :  { %3691 = vmatmul.msk.f32.vlgmr.msra.gmra.mxu0 %vm193_vm1, %v2801_v26 }
0x1bb1   :  { %3735 = vmatpush.xpose.msk.msra.mxu0 %vm92_vm0, %v5694_v44 }
0x1bb5   :  { %3736 = vmatpush.xpose.msk.msra.mxu0 %vm92_vm0, %v5701_v6 }
0x1bb9   :  { %3737 = vmatpush.xpose.msk.msra.mxu0 %vm92_vm0, %v5708_v55 }
0x1bbd   :  { %3738 = vmatpush.xpose.msk.msra.mxu0 %vm92_vm0, %v5715_v31 }
0x1be6   :  { %v5918_v52 = vpop.f32.mrf.mxu3 }
0x1be7   :  { %v2874_v14 = vmul.f32 %v5918_v52, %v5918_v52 }
0x1be9   :  { %v2875_v11 = vsel %vm167_vm3, %v2874_v14, 0.0 }
0x1bea   :  { %2876 = vadd.xlane.f32.xlu1 %v2875_v11 }
0x1c0a   :  { %v2828_v38 = vpop.xlane.xlu0 %2827 }
0x1c0b   :  { %v2829_v48 = vrot.slane %v2828_v38, 4 }
0x1c0d   :  { %v2830_v44 = vadd.f32 %v2829_v48, %v2828_v38 }
0x1c0f   :  { %v2831_v40 = vrot.slane %v2830_v44, 2 }
0x1c11   :  { %v2832_v23 = vadd.f32 %v2831_v40, %v2830_v44 }
0x1c13   :  { %v2833_v6 = vrot.slane %v2832_v23, 1 }
0x1c15   :  { %v2834_v29 = vadd.f32 %v2833_v6, %v2832_v23 }
0x1c17   :  { %3956 = vpush %v2834_v29 }
0x1c2d   :  { %v5923_v55 = vpop.f32.mrf.mxu0 }
0x1c2e   :  { %v2923_v31 = vmul.f32 %v5923_v55, %v5923_v55 }
0x1c30   :  { %v2924_v63 = vsel %vm167_vm3, %v2923_v31, 0.0 }
0x1c31   :  { %2925 = vadd.xlane.f32.xlu2 %v2924_v63 }
0x1c48   :  { %s3957_s1 = spop %3956 }
0x1c49   :  { %s2836_s25 = smax.f32 %s4407_s29, %s3957_s1 }
0x1c4a   :  { %v2837_v1 = vstv %s2836_s25 }
0x1c4b   :  { %4116 = vrsqrt.f32 %v2837_v1  ;;  %vm2844_vm11 = vweird.f32 %v2837_v1 }
0x1c51   :  { %v4117_v0 = vpop.eup %4116 }
0x1c52   :  { %v2839_v17 = vmul.f32 %v4117_v0, %v2837_v1  ;;  %vm2845_vm10 = vweird.f32 %v4117_v0 }
0x1c53   :  { %vm2846_vm12 = vmor %vm2844_vm11, %vm2845_vm10 }
0x1c54   :  { %v2840_v3 = vmul.f32 %v4117_v0, %v2839_v17 }
0x1c56   :  { %v2841_v4 = vmul.f32 0.5, %v2840_v3 }
0x1c58   :  { %v2842_v56 = vsub.f32 1.5, %v2841_v4 }
0x1c5a   :  { %v2843_v33 = vmul.f32 %v4117_v0, %v2842_v56 }
0x1c5c   :  { %v2847_v7 = vsel %vm2846_vm12, %v4117_v0, %v2843_v33 }
0x1c5d   :  { %v2877_v61 = vpop.xlane.xlu1 %2876  ;;  %3958 = vpush %v2847_v7 }
0x1c5e   :  { %v2878_v62 = vrot.slane %v2877_v61, 4 }
0x1c60   :  { %v2879_v58 = vadd.f32 %v2878_v62, %v2877_v61 }
0x1c62   :  { %v2880_v45 = vrot.slane %v2879_v58, 2 }
0x1c64   :  { %v2881_v16 = vadd.f32 %v2880_v45, %v2879_v58 }
0x1c66   :  { %v2882_v10 = vrot.slane %v2881_v16, 1 }
0x1c68   :  { %v2883_v12 = vadd.f32 %v2882_v10, %v2881_v16 }
0x1c6a   :  { %3960 = vpush %v2883_v12 }
0x1c8e   :  { %s3959_s2 = spop %3958 }
0x1c8f   :  { %v2849_v60 = vstv %s3959_s2  ;;  %s4409_s2 = smov 1.0  }
0x1c90   :  { %v2850_v20 = vmul.f32 %v2849_v60, %v2822_v46 }
0x1c92   :  { %3340 = vst.msk [vmem:[#allocation8] sm:$0x1] %vm117_vm2, %v2850_v20  ;;  %3700 = vmatmul.msk.f32.vlgmr.msrb.gmra.mxu0 %vm193_vm1, %v2850_v20 }
0x1c9b   :  { %s3961_s7 = spop %3960 }
0x1c9c   :  { %s2885_s9 = smax.f32 %s4407_s29, %s3961_s7 }
0x1c9d   :  { %v2886_v49 = vstv %s2885_s9 }
0x1c9e   :  { %4118 = vrsqrt.f32 %v2886_v49  ;;  %vm2893_vm14 = vweird.f32 %v2886_v49 }
0x1ca4   :  { %v4119_v43 = vpop.eup %4118  ;;  %v2926_v5 = vpop.xlane.xlu2 %2925 }
0x1ca5   :  { %v2888_v13 = vmul.f32 %v4119_v43, %v2886_v49  ;;  %v2927_v15 = vrot.slane %v2926_v5, 4  ;;  %vm2894_vm13 = vweird.f32 %v4119_v43 }
0x1ca6   :  { %vm2895_vm15 = vmor %vm2893_vm14, %vm2894_vm13 }
0x1ca7   :  { %v2889_v24 = vmul.f32 %v4119_v43, %v2888_v13  ;;  %v2928_v25 = vadd.f32 %v2927_v15, %v2926_v5 }
0x1ca9   :  { %v2890_v28 = vmul.f32 0.5, %v2889_v24  ;;  %v2929_v30 = vrot.slane %v2928_v25, 2 }
0x1cab   :  { %v2891_v27 = vsub.f32 1.5, %v2890_v28  ;;  %v2930_v37 = vadd.f32 %v2929_v30, %v2928_v25 }
0x1cad   :  { %v2892_v39 = vmul.f32 %v4119_v43, %v2891_v27  ;;  %v2931_v9 = vrot.slane %v2930_v37, 1 }
0x1caf   :  { %v2896_v41 = vsel %vm2895_vm15, %v4119_v43, %v2892_v39  ;;  %v2932_v42 = vadd.f32 %v2931_v9, %v2930_v37 }
0x1cb0   :  { %3962 = vpush %v2896_v41 }
0x1cb1   :  { %3964 = vpush %v2932_v42 }
0x1ce1   :  { %s3963_s8 = spop %3962 }
0x1ce2   :  { %v2898_v35 = vstv %s3963_s8  ;;  %s3965_s23 = spop %3964 }
0x1ce3   :  { %v2899_v8 = vmul.f32 %v2898_v35, %v5918_v52  ;;  %s2934_s24 = smax.f32 %s4407_s29, %s3965_s23 }
0x1ce4   :  { %v2935_v36 = vstv %s2934_s24 }
0x1ce5   :  { %3342 = vst.msk [vmem:[#allocation11] sm:$0x1] %vm167_vm3, %v2899_v8  ;;  %4120 = vrsqrt.f32 %v2935_v36  ;;  %3709 = vmatmul.msk.f32.vlgmr.msra.gmra.mxu1 %vm92_vm0, %v2899_v8  ;;  %vm2942_vm5 = vweird.f32 %v2935_v36 }
0x1ceb   :  { %v4121_v21 = vpop.eup %4120 }
0x1cec   :  { %v2937_v57 = vmul.f32 %v4121_v21, %v2935_v36  ;;  %vm2943_vm4 = vweird.f32 %v4121_v21 }
0x1ced   :  { %vm2944_vm6 = vmor %vm2942_vm5, %vm2943_vm4 }
0x1cee   :  { %v2938_v22 = vmul.f32 %v4121_v21, %v2937_v57 }
0x1cf0   :  { %v2939_v59 = vmul.f32 0.5, %v2938_v22 }
0x1cf2   :  { %v2940_v19 = vsub.f32 1.5, %v2939_v59 }
0x1cf4   :  { %v2941_v50 = vmul.f32 %v4121_v21, %v2940_v19 }
0x1cf6   :  { %v2945_v2 = vsel %vm2944_vm6, %v4121_v21, %v2941_v50 }
0x1cf7   :  { %3966 = vpush %v2945_v2 }
0x1d0f   :  { %v2969_v51 = vpop.f32.mrf.mxu0 }
0x1d10   :  { %v2972_v53 = vmul.f32 %v2969_v51, %v2969_v51 }
0x1d12   :  { %v2973_v18 = vsel %vm167_vm3, %v2972_v53, 0.0 }
0x1d13   :  { %2974 = vadd.xlane.f32.xlu0 %v2973_v18 }
0x1d28   :  { %s3967_s3 = spop %3966 }
0x1d29   :  { %v2947_v32 = vstv %s3967_s3  ;;  %s4413_s3 = smov [#allocation8]  }
0x1d2a   :  { %v2948_v46 = vmul.f32 %v2947_v32, %v5923_v55 }
0x1d2c   :  { %3344 = vst.msk [vmem:[#allocation14] sm:$0x1] %vm167_vm3, %v2948_v46  ;;  %3714 = vmatmul.msk.f32.vlgmr.msrb.gmra.mxu2 %vm92_vm0, %v2948_v46 }
0x1d62   :  { %v5940_v47 = vpop.f32.mrf.mxu1 }
0x1d63   :  { %v3021_v54 = vmul.f32 %v5940_v47, %v5940_v47 }
0x1d65   :  { %v3022_v34 = vsel %vm167_vm3, %v3021_v54, 0.0 }
0x1d66   :  { %3023 = vadd.xlane.f32.xlu1 %v3022_v34 }
0x1d86   :  { %v2975_v26 = vpop.xlane.xlu0 %2974 }
0x1d87   :  { %v2976_v52 = vrot.slane %v2975_v26, 4 }
0x1d89   :  { %v2977_v14 = vadd.f32 %v2976_v52, %v2975_v26 }
0x1d8b   :  { %v2978_v11 = vrot.slane %v2977_v14, 2 }
0x1d8d   :  { %v2979_v38 = vadd.f32 %v2978_v11, %v2977_v14 }
0x1d8f   :  { %v2980_v48 = vrot.slane %v2979_v38, 1 }
0x1d91   :  { %v2981_v44 = vadd.f32 %v2980_v48, %v2979_v38 }
0x1d93   :  { %3968 = vpush %v2981_v44 }
0x1daf   :  { %v5945_v40 = vpop.f32.mrf.mxu2 }
0x1db0   :  { %v3070_v23 = vmul.f32 %v5945_v40, %v5945_v40 }
0x1db2   :  { %v3071_v6 = vsel %vm117_vm2, %v3070_v23, 0.0 }
0x1db3   :  { %3072 = vadd.xlane.f32.xlu2 %v3071_v6 }
0x1dc4   :  { %s3969_s10 = spop %3968 }
0x1dc5   :  { %s2983_s26 = smax.f32 %s4407_s29, %s3969_s10  ;;  %s3372_s10 = sshll.u32 %s4413_s3, 4  ;;  %s3373_s10 = int_to_ptr.vmem [resolvable:$true] %s3372_s10 }
0x1dc6   :  { %v2984_v29 = vstv %s2983_s26  ;;  %s6028_s26 = sld [smem:[#allocation22_spill]] }
0x1dc7   :  { %4122 = vrsqrt.f32 %v2984_v29  ;;  %vm2991_vm8 = vweird.f32 %v2984_v29 }
0x1dcd   :  { %v4123_v55 = vpop.eup %4122 }
0x1dce   :  { %v2986_v31 = vmul.f32 %v4123_v55, %v2984_v29  ;;  %vm2992_vm7 = vweird.f32 %v4123_v55 }
0x1dcf   :  { %vm2993_vm9 = vmor %vm2991_vm8, %vm2992_vm7 }
0x1dd0   :  { %v2987_v63 = vmul.f32 %v4123_v55, %v2986_v31  ;;  %v4408_v31 = vmov 0.97  }
0x1dd2   :  { %v2988_v1 = vmul.f32 0.5, %v2987_v63 }
0x1dd4   :  { %v2989_v0 = vsub.f32 1.5, %v2988_v1 }
0x1dd6   :  { %v2990_v17 = vmul.f32 %v4123_v55, %v2989_v0 }
0x1dd8   :  { %v2994_v3 = vsel %vm2993_vm9, %v4123_v55, %v2990_v17  ;;  %v3207_v55 = vld [vmem:[#allocation2] sm:$0xff] }
0x1dd9   :  { %v3024_v4 = vpop.xlane.xlu1 %3023  ;;  %3970 = vpush %v2994_v3  ;;  %3723 = vmatmul.msk.f32.vlgmr.msrb.gmra.mxu3 %vm193_vm1, %v3207_v55 }
0x1dda   :  { %v3025_v56 = vrot.slane %v3024_v4, 4 }
0x1ddc   :  { %v3026_v33 = vadd.f32 %v3025_v56, %v3024_v4 }
0x1dde   :  { %v3027_v7 = vrot.slane %v3026_v33, 2 }
0x1de0   :  { %v3028_v61 = vadd.f32 %v3027_v7, %v3026_v33 }
0x1de2   :  { %v3029_v62 = vrot.slane %v3028_v61, 1 }
0x1de4   :  { %v3030_v58 = vadd.f32 %v3029_v62, %v3028_v61 }
0x1de6   :  { %3972 = vpush %v3030_v58 }
0x1e0a   :  { %s3971_s12 = spop %3970 }
0x1e0b   :  { %v2996_v45 = vstv %s3971_s12 }
0x1e0c   :  { %v2997_v16 = vmul.f32 %v2996_v45, %v2969_v51 }
0x1e0e   :  { %3339 = vst.msk [vmem:[#allocation6] sm:$0x1] %vm167_vm3, %v2997_v16  ;;  %v3096_v10 = vmul.f32 %v2997_v16, %v2969_v51 }
0x1e10   :  { %v3097_v12 = vsel %vm167_vm3, %v3096_v10, 0.0 }
0x1e11   :  { %3098 = vadd.xlane.f32.xlu0 %v3097_v12 }
0x1e17   :  { %s3973_s22 = spop %3972 }
0x1e18   :  { %s3032_s27 = smax.f32 %s4407_s29, %s3973_s22 }
0x1e19   :  { %v3033_v60 = vstv %s3032_s27 }
0x1e1a   :  { %4124 = vrsqrt.f32 %v3033_v60  ;;  %vm3040_vm11 = vweird.f32 %v3033_v60 }
0x1e20   :  { %v4125_v20 = vpop.eup %4124 }
0x1e21   :  { %v3035_v49 = vmul.f32 %v4125_v20, %v3033_v60  ;;  %vm3041_vm10 = vweird.f32 %v4125_v20 }
0x1e22   :  { %vm3042_vm12 = vmor %vm3040_vm11, %vm3041_vm10 }
0x1e23   :  { %v3036_v43 = vmul.f32 %v4125_v20, %v3035_v49 }
0x1e25   :  { %v3037_v5 = vmul.f32 0.5, %v3036_v43 }
0x1e26   :  { %v3073_v13 = vpop.xlane.xlu2 %3072 }
0x1e27   :  { %v3038_v15 = vsub.f32 1.5, %v3037_v5  ;;  %v3074_v24 = vrot.slane %v3073_v13, 4 }
0x1e29   :  { %v3075_v25 = vadd.f32 %v3074_v24, %v3073_v13  ;;  %v3039_v28 = vmul.f32 %v4125_v20, %v3038_v15 }
0x1e2b   :  { %v3076_v30 = vrot.slane %v3075_v25, 2  ;;  %v3043_v27 = vsel %vm3042_vm12, %v4125_v20, %v3039_v28 }
0x1e2c   :  { %3974 = vpush %v3043_v27 }
0x1e2d   :  { %v3077_v37 = vadd.f32 %v3076_v30, %v3075_v25 }
0x1e2f   :  { %v3078_v39 = vrot.slane %v3077_v37, 1 }
0x1e31   :  { %v3079_v9 = vadd.f32 %v3078_v39, %v3077_v37 }
0x1e33   :  { %3976 = vpush %v3079_v9 }
0x1e5d   :  { %s3975_s28 = spop %3974 }
0x1e5e   :  { %v3045_v41 = vstv %s3975_s28  ;;  %s3418_s28 = sshll.u32 %s6018_s19, 4  ;;  %s3419_s28 = int_to_ptr.hbm [resolvable:$true] %s3418_s28 }
0x1e5f   :  { %v3046_v42 = vmul.f32 %v3045_v41, %v5940_v47 }
0x1e61   :  { %3341 = vst.msk [vmem:[#allocation9] sm:$0x1] %vm167_vm3, %v3046_v42  ;;  %v3107_v35 = vmul.f32 %v3046_v42, %v5940_v47 }
0x1e63   :  { %v3108_v8 = vsel %vm167_vm3, %v3107_v35, 0.0 }
0x1e64   :  { %s3977_s11 = spop %3976  ;;  %3109 = vadd.xlane.f32.xlu1 %v3108_v8 }
0x1e65   :  { %s3081_s5 = smax.f32 %s4407_s29, %s3977_s11  ;;  %s3363_s11 = sshll.u32 %s6013_s14, 4  ;;  %s3364_s11 = int_to_ptr.hbm [resolvable:$true] %s3363_s11 }
0x1e66   :  { %v3082_v36 = vstv %s3081_s5  ;;  %s4410_s5 = smov [#allocation6]  }
0x1e67   :  { %4126 = vrsqrt.f32 %v3082_v36  ;;  %vm3089_vm14 = vweird.f32 %v3082_v36 }
0x1e68   :  { %4128 = vrcp.f32 %v4408_v31 }
0x1e6d   :  { %v4127_v21 = vpop.eup %4126 }
0x1e6e   :  { %v3084_v57 = vmul.f32 %v4127_v21, %v3082_v36  ;;  %vm3090_vm13 = vweird.f32 %v4127_v21  ;;  %v4129_v63 = vpop.eup %4128 }
0x1e6f   :  { %vm3091_vm15 = vmor %vm3089_vm14, %vm3090_vm13  ;;  %v3130_v1 = vmul.f32 0.97, %v4129_v63 }
0x1e70   :  { %v3085_v22 = vmul.f32 %v4127_v21, %v3084_v57 }
0x1e71   :  { %v3131_v0 = vsub.f32 1.0, %v3130_v1  ;;  %v4006_v1 = vld [vmem:[%s6003_s4] ss:$0 sm:$0xff] }
0x1e72   :  { %v3086_v59 = vmul.f32 0.5, %v3085_v22 }
0x1e73   :  { %v3132_v4 = vmul.f32 %v4129_v63, %v3131_v0 }
0x1e74   :  { %v3087_v19 = vsub.f32 1.5, %v3086_v59 }
0x1e75   :  { %v3133_v7 = vadd.f32 %v4129_v63, %v3132_v4 }
0x1e76   :  { %v3088_v50 = vmul.f32 %v4127_v21, %v3087_v19 }
0x1e78   :  { %v3092_v2 = vsel %vm3091_vm15, %v4127_v21, %v3088_v50 }
0x1e79   :  { %3978 = vpush %v3092_v2 }
0x1e84   :  { %v3099_v51 = vpop.xlane.xlu0 %3098 }
0x1e85   :  { %v3100_v53 = vrot.slane %v3099_v51, 4 }
0x1e87   :  { %v3101_v18 = vadd.f32 %v3100_v53, %v3099_v51 }
0x1e89   :  { %v3102_v32 = vrot.slane %v3101_v18, 2 }
0x1e8b   :  { %v3103_v46 = vadd.f32 %v3102_v32, %v3101_v18  ;;  %v3228_v18 = vpop.f32.mrf.mxu3  ;;  %v4005_v32 = vld [vmem:[%s6028_s26] ss:$0 sm:$0xff] }
0x1e8d   :  { %v3104_v47 = vrot.slane %v3103_v46, 1 }
0x1e8f   :  { %v3105_v54 = vadd.f32 %v3104_v47, %v3103_v46 }
0x1e91   :  { %3980 = vpush %v3105_v54 }
0x1eaa   :  { %s3979_s29 = spop %3978 }
0x1eab   :  { %v3094_v34 = vstv %s3979_s29  ;;  %s3361_s29 = sshll.u32 %s4410_s5, 4  ;;  %s3362_s29 = int_to_ptr.vmem [resolvable:$true] %s3361_s29 }
0x1eac   :  { %v3095_v26 = vmul.f32 %v3094_v34, %v5945_v40  ;;  %3366 = dma.vmem_to_hbm [thread:$0]  %s3362_s29, 16, %s3364_s11, [#allocation7]  }
0x1ead   :  { %s4415_s11 = smov [#allocation14]  }
0x1eae   :  { %3343 = vst.msk [vmem:[#allocation12] sm:$0x1] %vm117_vm2, %v3095_v26  ;;  %v3118_v52 = vmul.f32 %v3095_v26, %v5945_v40 }
0x1eb0   :  { %v3119_v14 = vsel %vm117_vm2, %v3118_v52, 0.0  ;;  %vm3134_vm2 = vweird.f32 %v4129_v63 }
0x1eb1   :  { %3120 = vadd.xlane.f32.xlu2 %v3119_v14  ;;  %v3135_v58 = vsel %vm3134_vm2, %v4129_v63, %v3133_v7 }
0x1ec2   :  { %s3981_s0 = spop %3980 }
0x1ed7   :  { %v3110_v11 = vpop.xlane.xlu1 %3109 }
0x1ed8   :  { %v3111_v38 = vrot.slane %v3110_v11, 4 }
0x1eda   :  { %v3112_v48 = vadd.f32 %v3111_v38, %v3110_v11 }
0x1edc   :  { %v3113_v44 = vrot.slane %v3112_v48, 2 }
0x1ede   :  { %v3114_v23 = vadd.f32 %v3113_v44, %v3112_v48 }
0x1ee0   :  { %v3115_v6 = vrot.slane %v3114_v23, 1 }
0x1ee2   :  { %v3116_v29 = vadd.f32 %v3115_v6, %v3114_v23 }
0x1ee4   :  { %3982 = vpush %v3116_v29 }
0x1f15   :  { %s3983_s30 = spop %3982 }
0x1f24   :  { %v3121_v40 = vpop.xlane.xlu2 %3120 }
0x1f25   :  { %v3122_v17 = vrot.slane %v3121_v40, 4 }
0x1f27   :  { %v3123_v3 = vadd.f32 %v3122_v17, %v3121_v40 }
0x1f29   :  { %v3124_v56 = vrot.slane %v3123_v3, 2 }
0x1f2b   :  { %v3125_v33 = vadd.f32 %v3124_v56, %v3123_v3 }
0x1f2d   :  { %v3126_v61 = vrot.slane %v3125_v33, 1 }
0x1f2f   :  { %v3127_v62 = vadd.f32 %v3126_v61, %v3125_v33 }
0x1f31   :  { %3984 = vpush %v3127_v62 }
0x1f32   :  { %3986 = vpush %v3135_v58 }
0x1f62   :  { %s3985_s20 = spop %3984 }
0x1f63   :  { %s3987_s21 = spop %3986 }
0x1f64   :  { %s3137_s1 = smul.f32 %s3987_s21, %s3981_s0  ;;  %s4411_s0 = smov [#allocation9]  }
0x1f65   :  { %s3163_s25 = smul.f32 %s3987_s21, %s3983_s30  ;;  %s3383_s30 = sshll.u32 %s4411_s0, 4  ;;  %s3384_s30 = int_to_ptr.vmem [resolvable:$true] %s3383_s30 }
0x1f66   :  { %s3138_s7 = smax.f32 %s4409_s2, %s3137_s1  ;;  %s3189_s9 = smul.f32 %s3987_s21, %s3985_s20 }
0x1f67   :  { %v3139_v45 = vstv %s3138_s7  ;;  %s3164_s8 = smax.f32 %s4409_s2, %s3163_s25  ;;  %s3385_s1 = sshll.u32 %s6015_s16, 4  ;;  %s3386_s1 = int_to_ptr.hbm [resolvable:$true] %s3385_s1 }
0x1f68   :  { %4130 = vrcp.f32 %v3139_v45  ;;  %v3165_v16 = vstv %s3164_s8  ;;  %s3190_s23 = smax.f32 %s4409_s2, %s3189_s9  ;;  %vm3145_vm3 = vweird.f32 %v3139_v45  ;;  %v3149_v15 = vand.u32 2147483647, %v3139_v45  ;;  %s3407_s7 = sshll.u32 %s6017_s18, 4  ;;  %s3408_s7 = int_to_ptr.hbm [resolvable:$true] %s3407_s7 }
0x1f69   :  { %4132 = vrcp.f32 %v3165_v16  ;;  %v3191_v10 = vstv %s3190_s23  ;;  %v3151_v24 = vand.u32 2147483648, %v3139_v45  ;;  %v3177_v30 = vand.u32 2147483648, %v3165_v16  ;;  %3388 = dma.vmem_to_hbm [thread:$0]  %s3384_s30, 16, %s3386_s1, [#allocation10]  }
0x1f6a   :  { %4134 = vrcp.f32 %v3191_v10  ;;  %v3175_v39 = vand.u32 2147483647, %v3165_v16  ;;  %v3203_v9 = vand.u32 2147483648, %v3191_v10  ;;  %v3201_v35 = vand.u32 2147483647, %v3191_v10  ;;  %s4412_s9 = smov [#allocation12]  }
0x1f6b   :  { %vm3150_vm8 = vcmp.eq.f32.partialorder %v3149_v15, 8.507059e+37  ;;  %v3152_v8 = vor.u32 1.1754944e-38, %v3151_v24  ;;  %vm3171_vm9 = vweird.f32 %v3165_v16  ;;  %v3178_v57 = vor.u32 1.1754944e-38, %v3177_v30  ;;  %s3405_s14 = sshll.u32 %s4412_s9, 4  ;;  %s4414_s16 = smov [#allocation11]   ;;  %s3406_s14 = int_to_ptr.vmem [resolvable:$true] %s3405_s14 }
0x1f6c   :  { %vm3197_vm11 = vweird.f32 %v3191_v10  ;;  %vm3176_vm12 = vcmp.eq.f32.partialorder %v3175_v39, 8.507059e+37  ;;  %v3204_v50 = vor.u32 1.1754944e-38, %v3203_v9  ;;  %vm3202_vm14 = vcmp.eq.f32.partialorder %v3201_v35, 8.507059e+37  ;;  %3410 = dma.vmem_to_hbm [thread:$0]  %s3406_s14, 16, %s3408_s7, [#allocation13]  }
0x1f6d   :  { %s3394_s26 = sshll.u32 %s4414_s16, 4  ;;  %s3396_s18 = sshll.u32 %s6016_s17, 4  ;;  %s3395_s26 = int_to_ptr.vmem [resolvable:$true] %s3394_s26  ;;  %s3397_s18 = int_to_ptr.hbm [resolvable:$true] %s3396_s18 }
0x1f6e   :  { %v4131_v12 = vpop.eup %4130  ;;  %3399 = dma.vmem_to_hbm [thread:$0]  %s3395_s26, 16, %s3397_s18, [#allocation10]  }
0x1f6f   :  { %v4133_v60 = vpop.eup %4132  ;;  %v3141_v20 = vmul.f32 %v4131_v12, %v3139_v45  ;;  %vm3146_vm4 = vweird.f32 %v4131_v12  ;;  %s4416_s17 = smov [#allocation5]   ;;  %s3352_s1 = sshll.u32 %s6012_s13, 4  ;;  %s3353_s1 = int_to_ptr.hbm [resolvable:$true] %s3352_s1 }
0x1f70   :  { %v4135_v49 = vpop.eup %4134  ;;  %v3167_v43 = vmul.f32 %v4133_v60, %v3165_v16  ;;  %vm3172_vm5 = vweird.f32 %v4133_v60  ;;  %vm3147_vm7 = vmor %vm3145_vm3, %vm3146_vm4  ;;  %s3350_s30 = sshll.u32 %s4416_s17, 4  ;;  %s3351_s30 = int_to_ptr.vmem [resolvable:$true] %s3350_s30 }
0x1f71   :  { %v3142_v5 = vsub.f32 1.0, %v3141_v20  ;;  %v3193_v13 = vmul.f32 %v4135_v49, %v3191_v10  ;;  %vm3198_vm6 = vweird.f32 %v4135_v49  ;;  %vm3173_vm10 = vmor %vm3171_vm9, %vm3172_vm5 }
0x1f72   :  { %v3168_v25 = vsub.f32 1.0, %v3167_v43  ;;  %vm3199_vm13 = vmor %vm3197_vm11, %vm3198_vm6  ;;  %v4007_v43 = vld [vmem:[%s6005_s6] ss:$0 sm:$0xff] }
0x1f73   :  { %v3143_v28 = vmul.f32 %v4131_v12, %v3142_v5  ;;  %v3194_v27 = vsub.f32 1.0, %v3193_v13 }
0x1f74   :  { %v3169_v37 = vmul.f32 %v4133_v60, %v3168_v25 }
0x1f75   :  { %v3144_v41 = vadd.f32 %v4131_v12, %v3143_v28  ;;  %v3195_v42 = vmul.f32 %v4135_v49, %v3194_v27 }
0x1f76   :  { %v3170_v36 = vadd.f32 %v4133_v60, %v3169_v37 }
0x1f77   :  { %v3148_v21 = vsel %vm3147_vm7, %v4131_v12, %v3144_v41  ;;  %v3196_v22 = vadd.f32 %v4135_v49, %v3195_v42 }
0x1f78   :  { %v3153_v59 = vsel %vm3150_vm8, %v3152_v8, %v3148_v21  ;;  %v3174_v19 = vsel %vm3173_vm10, %v4133_v60, %v3170_v36 }
0x1f79   :  { %3988 = vpush %v3153_v59  ;;  %v3179_v2 = vsel %vm3176_vm12, %v3178_v57, %v3174_v19  ;;  %v3200_v51 = vsel %vm3199_vm13, %v4135_v49, %v3196_v22 }
0x1f7a   :  { %3990 = vpush %v3179_v2  ;;  %v3205_v53 = vsel %vm3202_vm14, %v3204_v50, %v3200_v51 }
0x1f7b   :  { %3992 = vpush %v3205_v53 }
0x1faa   :  { %s3989_s24 = spop %3988 }
0x1fab   :  { %v3231_v46 = vstv %s3989_s24  ;;  %s3991_s12 = spop %3990  ;;  %s3374_s24 = sshll.u32 %s6014_s15, 4  ;;  %s3375_s24 = int_to_ptr.hbm [resolvable:$true] %s3374_s24 }
0x1fac   :  { %v3232_v47 = vmul.f32 %v3231_v46, %v3228_v18  ;;  %v3281_v0 = vstv %s3991_s12  ;;  %3377 = dma.vmem_to_hbm [thread:$0]  %s3373_s10, 16, %s3375_s24, [#allocation7]  }
0x1fad   :  { %s3416_s15 = sshll.u32 %s4415_s11, 4  ;;  %s3993_s5 = spop %3992  ;;  %s3417_s15 = int_to_ptr.vmem [resolvable:$true] %s3416_s15 }
0x1fae   :  { %v3237_v54 = vadd.f32 %v4005_v32, %v3232_v47  ;;  %3421 = dma.vmem_to_hbm [thread:$0]  %s3417_s15, 16, %s3419_s28, [#allocation13]   ;;  %v3331_v5 = vstv %s3993_s5 }
0x1fb0   :  { %v3724_v34 = vmul.f32 -1.442695, %v3237_v54 }
0x1fb2   :  { %4136 = vpow2.f32 %v3724_v34 }
0x1fb8   :  { %v4137_v26 = vpop.eup %4136 }
0x1fb9   :  { %v3241_v52 = vadd.f32 1.0, %v4137_v26 }
0x1fbb   :  { %4138 = vrcp.f32 %v3241_v52  ;;  %v3253_v48 = vand.u32 2147483648, %v3241_v52  ;;  %v3251_v23 = vand.u32 2147483647, %v3241_v52  ;;  %vm3247_vm2 = vweird.f32 %v3241_v52 }
0x1fbd   :  { %v3254_v29 = vor.u32 1.1754944e-38, %v3253_v48  ;;  %vm3252_vm4 = vcmp.eq.f32.partialorder %v3251_v23, 8.507059e+37 }
0x1fc1   :  { %v4139_v14 = vpop.eup %4138 }
0x1fc2   :  { %v3243_v11 = vmul.f32 %v4139_v14, %v3241_v52  ;;  %vm3248_vm15 = vweird.f32 %v4139_v14 }
0x1fc3   :  { %vm3249_vm3 = vmor %vm3247_vm2, %vm3248_vm15 }
0x1fc4   :  { %v3244_v38 = vsub.f32 1.0, %v3243_v11 }
0x1fc6   :  { %v3245_v44 = vmul.f32 %v4139_v14, %v3244_v38 }
0x1fc8   :  { %v3246_v6 = vadd.f32 %v4139_v14, %v3245_v44 }
0x1fca   :  { %v3250_v55 = vsel %vm3249_vm3, %v4139_v14, %v3246_v6 }
0x1fcb   :  { %v3255_v31 = vsel %vm3252_vm4, %v3254_v29, %v3250_v55 }
0x1fcc   :  { %v3257_v63 = vmul.f32 %v3255_v31, %v3237_v54 }
0x1fce   :  { %3733 = vmatmul.msk.f32.vlgmr.msra.gmra.mxu2 %vm92_vm0, %v3257_v63 }
0x2051   :  { %v3278_v40 = vpop.f32.mrf.mxu2 }
0x2052   :  { %v3282_v17 = vmul.f32 %v3281_v0, %v3278_v40 }
0x2054   :  { %v3287_v3 = vadd.f32 %v4006_v1, %v3282_v17 }
0x2056   :  { %v3734_v4 = vmul.f32 -1.442695, %v3287_v3 }
0x2058   :  { %4140 = vpow2.f32 %v3734_v4 }
0x205e   :  { %v4141_v56 = vpop.eup %4140 }
0x205f   :  { %v3291_v33 = vadd.f32 1.0, %v4141_v56 }
0x2061   :  { %4142 = vrcp.f32 %v3291_v33  ;;  %v3303_v58 = vand.u32 2147483648, %v3291_v33  ;;  %v3301_v16 = vand.u32 2147483647, %v3291_v33  ;;  %vm3297_vm6 = vweird.f32 %v3291_v33 }
0x2063   :  { %v3304_v12 = vor.u32 1.1754944e-38, %v3303_v58  ;;  %vm3302_vm8 = vcmp.eq.f32.partialorder %v3301_v16, 8.507059e+37 }
0x2067   :  { %v4143_v7 = vpop.eup %4142 }
0x2068   :  { %v3293_v61 = vmul.f32 %v4143_v7, %v3291_v33  ;;  %vm3298_vm5 = vweird.f32 %v4143_v7 }
0x2069   :  { %vm3299_vm7 = vmor %vm3297_vm6, %vm3298_vm5 }
0x206a   :  { %v3294_v62 = vsub.f32 1.0, %v3293_v61 }
0x206c   :  { %v3295_v45 = vmul.f32 %v4143_v7, %v3294_v62 }
0x206e   :  { %v3296_v10 = vadd.f32 %v4143_v7, %v3295_v45 }
0x2070   :  { %v3300_v60 = vsel %vm3299_vm7, %v4143_v7, %v3296_v10 }
0x2071   :  { %v3305_v20 = vsel %vm3302_vm8, %v3304_v12, %v3300_v60 }
0x2072   :  { %v3307_v49 = vmul.f32 %v3305_v20, %v3287_v3 }
0x2074   :  { %3739 = vmatmul.msk.f32.vlgmr.msra.gmra.mxu0 %vm92_vm0, %v3307_v49 }
0x20f1   :  { %v3328_v13 = vpop.f32.mrf.mxu0 }
0x20f2   :  { %v3332_v15 = vmul.f32 %v3331_v5, %v3328_v13 }
0x20f4   :  { %v3337_v24 = vadd.f32 %v4007_v43, %v3332_v15 }
0x20f6   :  { %3338 = vst.msk [vmem:[#allocation5] sm:$0xff] %vm193_vm1, %v3337_v24 }
0x20f7   :  { %3355 = dma.vmem_to_hbm [thread:$0]  %s3351_s30, 128, %s3353_s1, [#allocation4]  }
0x20f8   :  { %4398 = dma.done.wait [#allocation4], 128  }
0x20f9   :  { %4399 = vsyncadd [#allocation4], 4294967168 }
0x20fa   :  { %4400 = dma.done.wait [#allocation7], 32  }
0x20fb   :  { %4401 = vsyncadd [#allocation7], 4294967264 }
0x20fc   :  { %4402 = dma.done.wait [#allocation10], 32  }
0x20fd   :  { %4403 = vsyncadd [#allocation10], 4294967264 }
0x20fe   :  { %4404 = dma.done.wait [#allocation13], 32  }
0x20ff   :  { %4405 = vsyncadd [#allocation13], 4294967264 }
0x2100   :  { %3450 = vsyncpa [#allocation3], 1 }
0x2101   :  { %3451 = vsyncpa [#allocation4], 1 }
0x2102   :  { %3452 = vsyncpa [#allocation7], 1 }
0x2103   :  { %3453 = vsyncpa [#allocation10], 1 }
0x2104   :  { %3454 = vsyncpa [#allocation13], 1 }

</bundles_post_ra>
